<compile_context>
chip_gen: v7x
topology: tpu7x:2x2x1
jax: 0.10.0
libtpu: 0.0.40
codegen_flags: <defaults>
</compile_context>

<pallas_src>
import functools

import jax
import jax.numpy as jnp
import numpy as np
from jax import lax
from jax.experimental import pallas as pl
from jax.experimental.pallas import tpu as pltpu


# ----------------------------------------------------------------------------
# Host-side constant tables (layer-invariant, computed once)
# ----------------------------------------------------------------------------
def _sign_tables(n_qubits):
    dim = 1 << n_qubits
    idx = np.arange(dim)
    bits = (idx[None, :] >> np.arange(n_qubits)[:, None]) & 1        # (nq, dim)
    ry_sign = (2.0 * bits - 1.0).astype(np.float32)                  # (nq, dim)
    z = 1.0 - 2.0 * bits
    zz_sign = (z[:-1] * z[1:]).astype(np.float32)                    # (nq-1, dim)
    return jnp.asarray(zz_sign), jnp.asarray(ry_sign)


# ----------------------------------------------------------------------------
# Pallas kernel: fused statevector evolution + fidelity reduction
# ----------------------------------------------------------------------------
def metric_learning_kernel(x1_ref, x2_ref, zz_ref, y_ref, zzsign_ref,
                           rysign_ref, out_ref, *, n_qubits, n_layers):
    TB = x1_ref.shape[0]
    dim = rysign_ref.shape[1]
    R = 2 * TB
    half = jnp.float32(0.5)

    # ---- preamble: everything layer-invariant is computed exactly once -----
    # fused batch: rows [0:TB] embed inputs1, rows [TB:2TB] embed inputs2
    x = jnp.concatenate([x1_ref[...], x2_ref[...]], axis=0) * half    # (R, nq)
    cx = jnp.cos(x)
    sx = jnp.sin(x)

    zzh = zz_ref[...] * half                                          # (nq-1, L)
    cy = jnp.cos(y_ref[...] * half)                                   # (nq, L)
    sy = jnp.sin(y_ref[...] * half)

    ry_rows = [rysign_ref[q:q + 1, :] for q in range(n_qubits)]       # (1, dim)
    zz_rows = [zzsign_ref[q:q + 1, :] for q in range(n_qubits - 1)]

    # Convention-free roll-direction masks: pick_a[q][i] is True iff
    # pltpu.roll(v, 1<<q) already delivers v[i ^ (1<<q)] at lane i.
    lane = lax.broadcasted_iota(jnp.int32, (1, dim), 1)
    lane_f = lane.astype(jnp.float32)
    pick_a = []
    for q in range(n_qubits):
        sh = 1 << q
        want = (lane ^ sh).astype(jnp.float32)
        got_a = pltpu.roll(lane_f, shift=sh, axis=1)
        pick_a.append(got_a == want)

    def partner(v, q):
        """v[:, i ^ (1<<q)] via lane rotations + select (no matmul/gather)."""
        sh = 1 << q
        a = pltpu.roll(v, shift=sh, axis=1)
        if 2 * sh == dim:          # top qubit: +/- dim/2 rolls coincide
            return a
        b = pltpu.roll(v, shift=dim - sh, axis=1)
        return jnp.where(pick_a[q], a, b)

    # |0...0> initial state
    col = lax.broadcasted_iota(jnp.int32, (R, dim), 1)
    re = (col == 0).astype(jnp.float32)
    im = jnp.zeros((R, dim), jnp.float32)

    # ---- circuit: (RX encode -> fused diagonal ZZ -> RY) x n_layers --------
    for l in range(n_layers):
        # data-encoding layer: RX(x_q) on every qubit
        for q in range(n_qubits):
            c = cx[:, q:q + 1]
            s = sx[:, q:q + 1]
            pre = partner(re, q)
            pim = partner(im, q)
            re, im = c * re + s * pim, c * im - s * pre
        # entangling layer: the whole ZZ layer is diagonal -> one rotation by
        # the summed per-basis phase
        phi = zzh[0:1, l:l + 1] * zz_rows[0]
        for q in range(1, n_qubits - 1):
            phi = phi + zzh[q:q + 1, l:l + 1] * zz_rows[q]
        cphi = jnp.cos(phi)
        sphi = jnp.sin(phi)
        re, im = cphi * re + sphi * im, cphi * im - sphi * re
        # variational layer: RY(phi_{q,l}) on every qubit
        for q in range(n_qubits):
            c = cy[q:q + 1, l:l + 1]
            s = sy[q:q + 1, l:l + 1]
            ss = ry_rows[q] * s
            pre = partner(re, q)
            pim = partner(im, q)
            re, im = c * re + ss * pre, c * im + ss * pim

    # <psi2|psi1> = a + i b ;  output = |<psi2|psi1>|^2
    re1, im1 = re[:TB, :], im[:TB, :]
    re2, im2 = re[TB:, :], im[TB:, :]
    a = jnp.sum(re1 * re2 + im1 * im2, axis=-1, keepdims=True)
    b = jnp.sum(im1 * re2 - re1 * im2, axis=-1, keepdims=True)
    out_ref[...] = a * a + b * b


# ----------------------------------------------------------------------------
# Wrapper
# ----------------------------------------------------------------------------
def metric_learning_forward(inputs1, inputs2, zz_params, y_params):
    """inputs*: (B, n_qubits) angles; zz_params: (1, n_qubits-1, L);
    y_params: (1, n_qubits, L).  Returns (B,) float32 overlaps."""
    B, nq = inputs1.shape
    assert nq >= 2
    L = zz_params.shape[-1]
    dim = 1 << nq

    # batch tile: multiple of 8 sublanes; grow while it stays well inside a
    # conservative per-tile VMEM working-set budget (v5e default scoped VMEM
    # is only 16 MiB) and below 128 rows.
    row_bytes = 2 * dim * 4                      # re + im, f32, per fused row
    TB = 8
    while TB < 128 and TB < B and (2 * (2 * TB)) * row_bytes * 4 <= (8 << 20):
        TB *= 2
    n_tiles = pl.cdiv(B, TB)
    B_pad = n_tiles * TB

    x1 = jnp.asarray(inputs1, jnp.float32)
    x2 = jnp.asarray(inputs2, jnp.float32)
    if B_pad != B:
        pad = ((0, B_pad - B), (0, 0))
        x1 = jnp.pad(x1, pad)
        x2 = jnp.pad(x2, pad)

    # batch-independent parameters, passed un-broadcast
    zz2d = jnp.asarray(zz_params, jnp.float32).reshape(nq - 1, L)
    y2d = jnp.asarray(y_params, jnp.float32).reshape(nq, L)
    zz_sign, ry_sign = _sign_tables(nq)

    kernel = functools.partial(metric_learning_kernel,
                               n_qubits=nq, n_layers=L)

    out = pl.pallas_call(
        kernel,
        out_shape=jax.ShapeDtypeStruct((B_pad, 1), jnp.float32),
        grid=(n_tiles,),
        in_specs=[
            pl.BlockSpec((TB, nq), lambda i: (i, 0)),          # x1 tile
            pl.BlockSpec((TB, nq), lambda i: (i, 0)),          # x2 tile
            pl.BlockSpec((nq - 1, L), lambda i: (0, 0)),       # zz params
            pl.BlockSpec((nq, L), lambda i: (0, 0)),           # y params
            pl.BlockSpec((nq - 1, dim), lambda i: (0, 0)),     # zz sign table
            pl.BlockSpec((nq, dim), lambda i: (0, 0)),         # ry sign table
        ],
        out_specs=pl.BlockSpec((TB, 1), lambda i: (i, 0)),
        compiler_params=pltpu.CompilerParams(
            dimension_semantics=("parallel",),
            vmem_limit_bytes=32 * 1024 * 1024,
        ),
    )(x1, x2, zz2d, y2d, zz_sign, ry_sign)
    return out[:B, 0]


# ----------------------------------------------------------------------------
# Pure-JAX reference (for correctness check only)
# ----------------------------------------------------------------------------
def reference_forward(inputs1, inputs2, zz_params, y_params):
    B, nq = inputs1.shape
    L = zz_params.shape[-1]
    dim = 1 << nq
    idx = jnp.arange(dim)
    zz = jnp.broadcast_to(zz_params, (B, nq - 1, L))
    yp = jnp.broadcast_to(y_params, (B, nq, L))

    def simulate(x):
        psi = jnp.zeros((B, dim), jnp.complex64).at[:, 0].set(1.0)
        for l in range(L):
            for q in range(nq):
                th = (x[:, q:q + 1] * 0.5).astype(jnp.complex64)
                partner = psi[:, idx ^ (1 << q)]
                psi = jnp.cos(th) * psi - 1j * jnp.sin(th) * partner
            for q in range(nq - 1):
                al = (zz[:, q, l:l + 1] * 0.5).astype(jnp.complex64)
                zsign = ((1 - 2 * ((idx >> q) & 1)) *
                         (1 - 2 * ((idx >> (q + 1)) & 1)))
                psi = psi * (jnp.cos(al) - 1j * jnp.sin(al) * zsign)
            for q in range(nq):
                ph = (yp[:, q, l:l + 1] * 0.5).astype(jnp.complex64)
                sign = 2 * ((idx >> q) & 1) - 1
                partner = psi[:, idx ^ (1 << q)]
                psi = jnp.cos(ph) * psi + sign * jnp.sin(ph) * partner
        return psi

    p1 = simulate(inputs1)
    p2 = simulate(inputs2)
    ov = jnp.sum(jnp.conj(p2) * p1, axis=-1)
    return jnp.abs(ov) ** 2


# ----------------------------------------------------------------------------
if __name__ == "__main__":
    n_qubits, n_layers, batch = 7, 2, 8   # dim = 128 -> lane-dense state rows

    key = jax.random.PRNGKey(0)
    k1, k2, k3, k4 = jax.random.split(key, 4)
    # deterministic stand-ins for nn.Parameter(torch.rand(...))
    zz_params = jax.random.uniform(k1, (1, n_qubits - 1, n_layers), jnp.float32)
    y_params = jax.random.uniform(k2, (1, n_qubits, n_layers), jnp.float32)
    inputs1 = jax.random.uniform(k3, (batch, n_qubits), jnp.float32) * 2.0 * jnp.pi
    inputs2 = jax.random.uniform(k4, (batch, n_qubits), jnp.float32) * 2.0 * jnp.pi

    out = metric_learning_forward(inputs1, inputs2, zz_params, y_params)
    out = jax.block_until_ready(out)

    ref = reference_forward(inputs1, inputs2, zz_params, y_params)
    assert out.shape == (batch,)
    assert bool(jnp.all(jnp.isfinite(out)))
    np.testing.assert_allclose(np.asarray(out), np.asarray(ref),
                               rtol=2e-4, atol=2e-4)
    print("KERNEL_OK")
</pallas_src>

<mosaic_0001>
module attributes {stable_mosaic.version = 11 : i64} {
  func.func @metric_learning_kernel(%arg0: i32, %arg1: memref<8x7xf32, #tpu.memory_space<vmem>>, %arg2: memref<8x7xf32, #tpu.memory_space<vmem>>, %arg3: memref<6x2xf32, #tpu.memory_space<vmem>>, %arg4: memref<7x2xf32, #tpu.memory_space<vmem>>, %arg5: memref<6x128xf32, #tpu.memory_space<vmem>>, %arg6: memref<7x128xf32, #tpu.memory_space<vmem>>, %arg7: memref<8x1xf32, #tpu.memory_space<vmem>>) attributes {dimension_semantics = [#tpu.dimension_semantics<parallel>], iteration_bounds = array<i64: 1>, scalar_prefetch = 0 : i64, scratch_operands = 0 : i64, tpu.core_type = #tpu.core_type<tc>, window_params = [{transform_indices = @transform_0, window_bounds = array<i64: 8, 7>}, {transform_indices = @transform_1, window_bounds = array<i64: 8, 7>}, {pipeline_mode = #tpu.pipeline_mode<synchronous>, transform_indices = @transform_2, window_bounds = array<i64: 6, 2>}, {pipeline_mode = #tpu.pipeline_mode<synchronous>, transform_indices = @transform_3, window_bounds = array<i64: 7, 2>}, {pipeline_mode = #tpu.pipeline_mode<synchronous>, transform_indices = @transform_4, window_bounds = array<i64: 6, 128>}, {pipeline_mode = #tpu.pipeline_mode<synchronous>, transform_indices = @transform_5, window_bounds = array<i64: 7, 128>}, {transform_indices = @transform_6, window_bounds = array<i64: 8, 1>}]} {
    %c0 = arith.constant 0 : index
    %c0_0 = arith.constant 0 : index
    %0 = vector.load %arg1[%c0, %c0_0] : memref<8x7xf32, #tpu.memory_space<vmem>>, vector<8x7xf32>
    %c0_1 = arith.constant 0 : index
    %c0_2 = arith.constant 0 : index
    %1 = vector.load %arg2[%c0_1, %c0_2] : memref<8x7xf32, #tpu.memory_space<vmem>>, vector<8x7xf32>
    %2 = tpu.concatenate %0, %1 in 0 : vector<8x7xf32>, vector<8x7xf32> -> vector<16x7xf32>
    %cst = arith.constant 5.000000e-01 : f32
    %3 = vector.broadcast %cst : f32 to vector<16x7xf32>
    %4 = arith.mulf %2, %3 : vector<16x7xf32>
    %5 = math.cos %4 : vector<16x7xf32>
    %6 = math.sin %4 : vector<16x7xf32>
    %c0_3 = arith.constant 0 : index
    %c0_4 = arith.constant 0 : index
    %7 = vector.load %arg3[%c0_3, %c0_4] : memref<6x2xf32, #tpu.memory_space<vmem>>, vector<6x2xf32>
    %cst_5 = arith.constant 5.000000e-01 : f32
    %8 = vector.broadcast %cst_5 : f32 to vector<6x2xf32>
    %9 = arith.mulf %7, %8 : vector<6x2xf32>
    %c0_6 = arith.constant 0 : index
    %c0_7 = arith.constant 0 : index
    %10 = vector.load %arg4[%c0_6, %c0_7] : memref<7x2xf32, #tpu.memory_space<vmem>>, vector<7x2xf32>
    %cst_8 = arith.constant 5.000000e-01 : f32
    %11 = vector.broadcast %cst_8 : f32 to vector<7x2xf32>
    %12 = arith.mulf %10, %11 : vector<7x2xf32>
    %13 = math.cos %12 : vector<7x2xf32>
    %c0_9 = arith.constant 0 : index
    %c0_10 = arith.constant 0 : index
    %14 = vector.load %arg4[%c0_9, %c0_10] : memref<7x2xf32, #tpu.memory_space<vmem>>, vector<7x2xf32>
    %cst_11 = arith.constant 5.000000e-01 : f32
    %15 = vector.broadcast %cst_11 : f32 to vector<7x2xf32>
    %16 = arith.mulf %14, %15 : vector<7x2xf32>
    %17 = math.sin %16 : vector<7x2xf32>
    %c0_12 = arith.constant 0 : index
    %c0_13 = arith.constant 0 : index
    %18 = vector.load %arg6[%c0_12, %c0_13] : memref<7x128xf32, #tpu.memory_space<vmem>>, vector<1x128xf32>
    %c1 = arith.constant 1 : index
    %c0_14 = arith.constant 0 : index
    %19 = vector.load %arg6[%c1, %c0_14] : memref<7x128xf32, #tpu.memory_space<vmem>>, vector<1x128xf32>
    %c2 = arith.constant 2 : index
    %c0_15 = arith.constant 0 : index
    %20 = vector.load %arg6[%c2, %c0_15] : memref<7x128xf32, #tpu.memory_space<vmem>>, vector<1x128xf32>
    %c3 = arith.constant 3 : index
    %c0_16 = arith.constant 0 : index
    %21 = vector.load %arg6[%c3, %c0_16] : memref<7x128xf32, #tpu.memory_space<vmem>>, vector<1x128xf32>
    %c4 = arith.constant 4 : index
    %c0_17 = arith.constant 0 : index
    %22 = vector.load %arg6[%c4, %c0_17] : memref<7x128xf32, #tpu.memory_space<vmem>>, vector<1x128xf32>
    %c5 = arith.constant 5 : index
    %c0_18 = arith.constant 0 : index
    %23 = vector.load %arg6[%c5, %c0_18] : memref<7x128xf32, #tpu.memory_space<vmem>>, vector<1x128xf32>
    %c6 = arith.constant 6 : index
    %c0_19 = arith.constant 0 : index
    %24 = vector.load %arg6[%c6, %c0_19] : memref<7x128xf32, #tpu.memory_space<vmem>>, vector<1x128xf32>
    %c0_20 = arith.constant 0 : index
    %c0_21 = arith.constant 0 : index
    %25 = vector.load %arg5[%c0_20, %c0_21] : memref<6x128xf32, #tpu.memory_space<vmem>>, vector<1x128xf32>
    %c1_22 = arith.constant 1 : index
    %c0_23 = arith.constant 0 : index
    %26 = vector.load %arg5[%c1_22, %c0_23] : memref<6x128xf32, #tpu.memory_space<vmem>>, vector<1x128xf32>
    %c2_24 = arith.constant 2 : index
    %c0_25 = arith.constant 0 : index
    %27 = vector.load %arg5[%c2_24, %c0_25] : memref<6x128xf32, #tpu.memory_space<vmem>>, vector<1x128xf32>
    %c3_26 = arith.constant 3 : index
    %c0_27 = arith.constant 0 : index
    %28 = vector.load %arg5[%c3_26, %c0_27] : memref<6x128xf32, #tpu.memory_space<vmem>>, vector<1x128xf32>
    %c4_28 = arith.constant 4 : index
    %c0_29 = arith.constant 0 : index
    %29 = vector.load %arg5[%c4_28, %c0_29] : memref<6x128xf32, #tpu.memory_space<vmem>>, vector<1x128xf32>
    %c5_30 = arith.constant 5 : index
    %c0_31 = arith.constant 0 : index
    %30 = vector.load %arg5[%c5_30, %c0_31] : memref<6x128xf32, #tpu.memory_space<vmem>>, vector<1x128xf32>
    %31 = tpu.iota {dimensions = array<i32: 1>} : vector<1x128xi32>
    %32 = arith.sitofp %31 : vector<1x128xi32> to vector<1x128xf32>
    %c1_i32 = arith.constant 1 : i32
    %33 = vector.broadcast %c1_i32 : i32 to vector<1x128xi32>
    %34 = arith.xori %31, %33 : vector<1x128xi32>
    %35 = arith.sitofp %34 : vector<1x128xi32> to vector<1x128xf32>
    %c1_i32_32 = arith.constant 1 : i32
    %36 = tpu.dynamic_rotate %32 by %c1_i32_32 dim 1 : vector<1x128xf32>, i32 -> vector<1x128xf32>
    %37 = arith.cmpf oeq, %36, %35 : vector<1x128xf32>
    %c2_i32 = arith.constant 2 : i32
    %38 = vector.broadcast %c2_i32 : i32 to vector<1x128xi32>
    %39 = arith.xori %31, %38 : vector<1x128xi32>
    %40 = arith.sitofp %39 : vector<1x128xi32> to vector<1x128xf32>
    %c2_i32_33 = arith.constant 2 : i32
    %41 = tpu.dynamic_rotate %32 by %c2_i32_33 dim 1 : vector<1x128xf32>, i32 -> vector<1x128xf32>
    %42 = arith.cmpf oeq, %41, %40 : vector<1x128xf32>
    %c4_i32 = arith.constant 4 : i32
    %43 = vector.broadcast %c4_i32 : i32 to vector<1x128xi32>
    %44 = arith.xori %31, %43 : vector<1x128xi32>
    %45 = arith.sitofp %44 : vector<1x128xi32> to vector<1x128xf32>
    %c4_i32_34 = arith.constant 4 : i32
    %46 = tpu.dynamic_rotate %32 by %c4_i32_34 dim 1 : vector<1x128xf32>, i32 -> vector<1x128xf32>
    %47 = arith.cmpf oeq, %46, %45 : vector<1x128xf32>
    %c8_i32 = arith.constant 8 : i32
    %48 = vector.broadcast %c8_i32 : i32 to vector<1x128xi32>
    %49 = arith.xori %31, %48 : vector<1x128xi32>
    %50 = arith.sitofp %49 : vector<1x128xi32> to vector<1x128xf32>
    %c8_i32_35 = arith.constant 8 : i32
    %51 = tpu.dynamic_rotate %32 by %c8_i32_35 dim 1 : vector<1x128xf32>, i32 -> vector<1x128xf32>
    %52 = arith.cmpf oeq, %51, %50 : vector<1x128xf32>
    %c16_i32 = arith.constant 16 : i32
    %53 = vector.broadcast %c16_i32 : i32 to vector<1x128xi32>
    %54 = arith.xori %31, %53 : vector<1x128xi32>
    %55 = arith.sitofp %54 : vector<1x128xi32> to vector<1x128xf32>
    %c16_i32_36 = arith.constant 16 : i32
    %56 = tpu.dynamic_rotate %32 by %c16_i32_36 dim 1 : vector<1x128xf32>, i32 -> vector<1x128xf32>
    %57 = arith.cmpf oeq, %56, %55 : vector<1x128xf32>
    %c32_i32 = arith.constant 32 : i32
    %58 = vector.broadcast %c32_i32 : i32 to vector<1x128xi32>
    %59 = arith.xori %31, %58 : vector<1x128xi32>
    %60 = arith.sitofp %59 : vector<1x128xi32> to vector<1x128xf32>
    %c32_i32_37 = arith.constant 32 : i32
    %61 = tpu.dynamic_rotate %32 by %c32_i32_37 dim 1 : vector<1x128xf32>, i32 -> vector<1x128xf32>
    %62 = arith.cmpf oeq, %61, %60 : vector<1x128xf32>
    %63 = tpu.iota {dimensions = array<i32: 1>} : vector<16x128xi32>
    %c0_i32 = arith.constant 0 : i32
    %64 = vector.broadcast %c0_i32 : i32 to vector<16x128xi32>
    %65 = arith.cmpi eq, %63, %64 : vector<16x128xi32>
    %66 = arith.extui %65 : vector<16x128xi1> to vector<16x128xi32>
    %67 = arith.sitofp %66 : vector<16x128xi32> to vector<16x128xf32>
    %cst_38 = arith.constant 0.000000e+00 : f32
    %68 = vector.broadcast %cst_38 : f32 to vector<16x128xf32>
    %69 = vector.extract_strided_slice %5 {offsets = [0, 0], sizes = [16, 1], strides = [1, 1]} : vector<16x7xf32> to vector<16x1xf32>
    %70 = vector.extract_strided_slice %6 {offsets = [0, 0], sizes = [16, 1], strides = [1, 1]} : vector<16x7xf32> to vector<16x1xf32>
    %c1_i32_39 = arith.constant 1 : i32
    %71 = tpu.dynamic_rotate %67 by %c1_i32_39 dim 1 : vector<16x128xf32>, i32 -> vector<16x128xf32>
    %c127_i32 = arith.constant 127 : i32
    %72 = tpu.dynamic_rotate %67 by %c127_i32 dim 1 : vector<16x128xf32>, i32 -> vector<16x128xf32>
    %73 = vector.shape_cast %37 : vector<1x128xi1> to vector<1x128xi1>
    %74 = vector.broadcast %73 : vector<1x128xi1> to vector<16x128xi1>
    %75 = arith.select %74, %71, %72 : vector<16x128xi1>, vector<16x128xf32>
    %c1_i32_40 = arith.constant 1 : i32
    %76 = tpu.dynamic_rotate %68 by %c1_i32_40 dim 1 : vector<16x128xf32>, i32 -> vector<16x128xf32>
    %c127_i32_41 = arith.constant 127 : i32
    %77 = tpu.dynamic_rotate %68 by %c127_i32_41 dim 1 : vector<16x128xf32>, i32 -> vector<16x128xf32>
    %78 = vector.shape_cast %37 : vector<1x128xi1> to vector<1x128xi1>
    %79 = vector.broadcast %78 : vector<1x128xi1> to vector<16x128xi1>
    %80 = arith.select %79, %76, %77 : vector<16x128xi1>, vector<16x128xf32>
    %81 = vector.broadcast %69 : vector<16x1xf32> to vector<16x128xf32>
    %82 = arith.mulf %81, %67 : vector<16x128xf32>
    %83 = vector.broadcast %70 : vector<16x1xf32> to vector<16x128xf32>
    %84 = arith.mulf %83, %80 : vector<16x128xf32>
    %85 = arith.addf %82, %84 : vector<16x128xf32>
    %86 = vector.broadcast %69 : vector<16x1xf32> to vector<16x128xf32>
    %87 = arith.mulf %86, %68 : vector<16x128xf32>
    %88 = vector.broadcast %70 : vector<16x1xf32> to vector<16x128xf32>
    %89 = arith.mulf %88, %75 : vector<16x128xf32>
    %90 = arith.subf %87, %89 : vector<16x128xf32>
    %91 = vector.extract_strided_slice %5 {offsets = [0, 1], sizes = [16, 1], strides = [1, 1]} : vector<16x7xf32> to vector<16x1xf32>
    %92 = vector.extract_strided_slice %6 {offsets = [0, 1], sizes = [16, 1], strides = [1, 1]} : vector<16x7xf32> to vector<16x1xf32>
    %c2_i32_42 = arith.constant 2 : i32
    %93 = tpu.dynamic_rotate %85 by %c2_i32_42 dim 1 : vector<16x128xf32>, i32 -> vector<16x128xf32>
    %c126_i32 = arith.constant 126 : i32
    %94 = tpu.dynamic_rotate %85 by %c126_i32 dim 1 : vector<16x128xf32>, i32 -> vector<16x128xf32>
    %95 = vector.shape_cast %42 : vector<1x128xi1> to vector<1x128xi1>
    %96 = vector.broadcast %95 : vector<1x128xi1> to vector<16x128xi1>
    %97 = arith.select %96, %93, %94 : vector<16x128xi1>, vector<16x128xf32>
    %c2_i32_43 = arith.constant 2 : i32
    %98 = tpu.dynamic_rotate %90 by %c2_i32_43 dim 1 : vector<16x128xf32>, i32 -> vector<16x128xf32>
    %c126_i32_44 = arith.constant 126 : i32
    %99 = tpu.dynamic_rotate %90 by %c126_i32_44 dim 1 : vector<16x128xf32>, i32 -> vector<16x128xf32>
    %100 = vector.shape_cast %42 : vector<1x128xi1> to vector<1x128xi1>
    %101 = vector.broadcast %100 : vector<1x128xi1> to vector<16x128xi1>
    %102 = arith.select %101, %98, %99 : vector<16x128xi1>, vector<16x128xf32>
    %103 = vector.broadcast %91 : vector<16x1xf32> to vector<16x128xf32>
    %104 = arith.mulf %103, %85 : vector<16x128xf32>
    %105 = vector.broadcast %92 : vector<16x1xf32> to vector<16x128xf32>
    %106 = arith.mulf %105, %102 : vector<16x128xf32>
    %107 = arith.addf %104, %106 : vector<16x128xf32>
    %108 = vector.broadcast %91 : vector<16x1xf32> to vector<16x128xf32>
    %109 = arith.mulf %108, %90 : vector<16x128xf32>
    %110 = vector.broadcast %92 : vector<16x1xf32> to vector<16x128xf32>
    %111 = arith.mulf %110, %97 : vector<16x128xf32>
    %112 = arith.subf %109, %111 : vector<16x128xf32>
    %113 = vector.extract_strided_slice %5 {offsets = [0, 2], sizes = [16, 1], strides = [1, 1]} : vector<16x7xf32> to vector<16x1xf32>
    %114 = vector.extract_strided_slice %6 {offsets = [0, 2], sizes = [16, 1], strides = [1, 1]} : vector<16x7xf32> to vector<16x1xf32>
    %c4_i32_45 = arith.constant 4 : i32
    %115 = tpu.dynamic_rotate %107 by %c4_i32_45 dim 1 : vector<16x128xf32>, i32 -> vector<16x128xf32>
    %c124_i32 = arith.constant 124 : i32
    %116 = tpu.dynamic_rotate %107 by %c124_i32 dim 1 : vector<16x128xf32>, i32 -> vector<16x128xf32>
    %117 = vector.shape_cast %47 : vector<1x128xi1> to vector<1x128xi1>
    %118 = vector.broadcast %117 : vector<1x128xi1> to vector<16x128xi1>
    %119 = arith.select %118, %115, %116 : vector<16x128xi1>, vector<16x128xf32>
    %c4_i32_46 = arith.constant 4 : i32
    %120 = tpu.dynamic_rotate %112 by %c4_i32_46 dim 1 : vector<16x128xf32>, i32 -> vector<16x128xf32>
    %c124_i32_47 = arith.constant 124 : i32
    %121 = tpu.dynamic_rotate %112 by %c124_i32_47 dim 1 : vector<16x128xf32>, i32 -> vector<16x128xf32>
    %122 = vector.shape_cast %47 : vector<1x128xi1> to vector<1x128xi1>
    %123 = vector.broadcast %122 : vector<1x128xi1> to vector<16x128xi1>
    %124 = arith.select %123, %120, %121 : vector<16x128xi1>, vector<16x128xf32>
    %125 = vector.broadcast %113 : vector<16x1xf32> to vector<16x128xf32>
    %126 = arith.mulf %125, %107 : vector<16x128xf32>
    %127 = vector.broadcast %114 : vector<16x1xf32> to vector<16x128xf32>
    %128 = arith.mulf %127, %124 : vector<16x128xf32>
    %129 = arith.addf %126, %128 : vector<16x128xf32>
    %130 = vector.broadcast %113 : vector<16x1xf32> to vector<16x128xf32>
    %131 = arith.mulf %130, %112 : vector<16x128xf32>
    %132 = vector.broadcast %114 : vector<16x1xf32> to vector<16x128xf32>
    %133 = arith.mulf %132, %119 : vector<16x128xf32>
    %134 = arith.subf %131, %133 : vector<16x128xf32>
    %135 = vector.extract_strided_slice %5 {offsets = [0, 3], sizes = [16, 1], strides = [1, 1]} : vector<16x7xf32> to vector<16x1xf32>
    %136 = vector.extract_strided_slice %6 {offsets = [0, 3], sizes = [16, 1], strides = [1, 1]} : vector<16x7xf32> to vector<16x1xf32>
    %c8_i32_48 = arith.constant 8 : i32
    %137 = tpu.dynamic_rotate %129 by %c8_i32_48 dim 1 : vector<16x128xf32>, i32 -> vector<16x128xf32>
    %c120_i32 = arith.constant 120 : i32
    %138 = tpu.dynamic_rotate %129 by %c120_i32 dim 1 : vector<16x128xf32>, i32 -> vector<16x128xf32>
    %139 = vector.shape_cast %52 : vector<1x128xi1> to vector<1x128xi1>
    %140 = vector.broadcast %139 : vector<1x128xi1> to vector<16x128xi1>
    %141 = arith.select %140, %137, %138 : vector<16x128xi1>, vector<16x128xf32>
    %c8_i32_49 = arith.constant 8 : i32
    %142 = tpu.dynamic_rotate %134 by %c8_i32_49 dim 1 : vector<16x128xf32>, i32 -> vector<16x128xf32>
    %c120_i32_50 = arith.constant 120 : i32
    %143 = tpu.dynamic_rotate %134 by %c120_i32_50 dim 1 : vector<16x128xf32>, i32 -> vector<16x128xf32>
    %144 = vector.shape_cast %52 : vector<1x128xi1> to vector<1x128xi1>
    %145 = vector.broadcast %144 : vector<1x128xi1> to vector<16x128xi1>
    %146 = arith.select %145, %142, %143 : vector<16x128xi1>, vector<16x128xf32>
    %147 = vector.broadcast %135 : vector<16x1xf32> to vector<16x128xf32>
    %148 = arith.mulf %147, %129 : vector<16x128xf32>
    %149 = vector.broadcast %136 : vector<16x1xf32> to vector<16x128xf32>
    %150 = arith.mulf %149, %146 : vector<16x128xf32>
    %151 = arith.addf %148, %150 : vector<16x128xf32>
    %152 = vector.broadcast %135 : vector<16x1xf32> to vector<16x128xf32>
    %153 = arith.mulf %152, %134 : vector<16x128xf32>
    %154 = vector.broadcast %136 : vector<16x1xf32> to vector<16x128xf32>
    %155 = arith.mulf %154, %141 : vector<16x128xf32>
    %156 = arith.subf %153, %155 : vector<16x128xf32>
    %157 = vector.extract_strided_slice %5 {offsets = [0, 4], sizes = [16, 1], strides = [1, 1]} : vector<16x7xf32> to vector<16x1xf32>
    %158 = vector.extract_strided_slice %6 {offsets = [0, 4], sizes = [16, 1], strides = [1, 1]} : vector<16x7xf32> to vector<16x1xf32>
    %c16_i32_51 = arith.constant 16 : i32
    %159 = tpu.dynamic_rotate %151 by %c16_i32_51 dim 1 : vector<16x128xf32>, i32 -> vector<16x128xf32>
    %c112_i32 = arith.constant 112 : i32
    %160 = tpu.dynamic_rotate %151 by %c112_i32 dim 1 : vector<16x128xf32>, i32 -> vector<16x128xf32>
    %161 = vector.shape_cast %57 : vector<1x128xi1> to vector<1x128xi1>
    %162 = vector.broadcast %161 : vector<1x128xi1> to vector<16x128xi1>
    %163 = arith.select %162, %159, %160 : vector<16x128xi1>, vector<16x128xf32>
    %c16_i32_52 = arith.constant 16 : i32
    %164 = tpu.dynamic_rotate %156 by %c16_i32_52 dim 1 : vector<16x128xf32>, i32 -> vector<16x128xf32>
    %c112_i32_53 = arith.constant 112 : i32
    %165 = tpu.dynamic_rotate %156 by %c112_i32_53 dim 1 : vector<16x128xf32>, i32 -> vector<16x128xf32>
    %166 = vector.shape_cast %57 : vector<1x128xi1> to vector<1x128xi1>
    %167 = vector.broadcast %166 : vector<1x128xi1> to vector<16x128xi1>
    %168 = arith.select %167, %164, %165 : vector<16x128xi1>, vector<16x128xf32>
    %169 = vector.broadcast %157 : vector<16x1xf32> to vector<16x128xf32>
    %170 = arith.mulf %169, %151 : vector<16x128xf32>
    %171 = vector.broadcast %158 : vector<16x1xf32> to vector<16x128xf32>
    %172 = arith.mulf %171, %168 : vector<16x128xf32>
    %173 = arith.addf %170, %172 : vector<16x128xf32>
    %174 = vector.broadcast %157 : vector<16x1xf32> to vector<16x128xf32>
    %175 = arith.mulf %174, %156 : vector<16x128xf32>
    %176 = vector.broadcast %158 : vector<16x1xf32> to vector<16x128xf32>
    %177 = arith.mulf %176, %163 : vector<16x128xf32>
    %178 = arith.subf %175, %177 : vector<16x128xf32>
    %179 = vector.extract_strided_slice %5 {offsets = [0, 5], sizes = [16, 1], strides = [1, 1]} : vector<16x7xf32> to vector<16x1xf32>
    %180 = vector.extract_strided_slice %6 {offsets = [0, 5], sizes = [16, 1], strides = [1, 1]} : vector<16x7xf32> to vector<16x1xf32>
    %c32_i32_54 = arith.constant 32 : i32
    %181 = tpu.dynamic_rotate %173 by %c32_i32_54 dim 1 : vector<16x128xf32>, i32 -> vector<16x128xf32>
    %c96_i32 = arith.constant 96 : i32
    %182 = tpu.dynamic_rotate %173 by %c96_i32 dim 1 : vector<16x128xf32>, i32 -> vector<16x128xf32>
    %183 = vector.shape_cast %62 : vector<1x128xi1> to vector<1x128xi1>
    %184 = vector.broadcast %183 : vector<1x128xi1> to vector<16x128xi1>
    %185 = arith.select %184, %181, %182 : vector<16x128xi1>, vector<16x128xf32>
    %c32_i32_55 = arith.constant 32 : i32
    %186 = tpu.dynamic_rotate %178 by %c32_i32_55 dim 1 : vector<16x128xf32>, i32 -> vector<16x128xf32>
    %c96_i32_56 = arith.constant 96 : i32
    %187 = tpu.dynamic_rotate %178 by %c96_i32_56 dim 1 : vector<16x128xf32>, i32 -> vector<16x128xf32>
    %188 = vector.shape_cast %62 : vector<1x128xi1> to vector<1x128xi1>
    %189 = vector.broadcast %188 : vector<1x128xi1> to vector<16x128xi1>
    %190 = arith.select %189, %186, %187 : vector<16x128xi1>, vector<16x128xf32>
    %191 = vector.broadcast %179 : vector<16x1xf32> to vector<16x128xf32>
    %192 = arith.mulf %191, %173 : vector<16x128xf32>
    %193 = vector.broadcast %180 : vector<16x1xf32> to vector<16x128xf32>
    %194 = arith.mulf %193, %190 : vector<16x128xf32>
    %195 = arith.addf %192, %194 : vector<16x128xf32>
    %196 = vector.broadcast %179 : vector<16x1xf32> to vector<16x128xf32>
    %197 = arith.mulf %196, %178 : vector<16x128xf32>
    %198 = vector.broadcast %180 : vector<16x1xf32> to vector<16x128xf32>
    %199 = arith.mulf %198, %185 : vector<16x128xf32>
    %200 = arith.subf %197, %199 : vector<16x128xf32>
    %201 = vector.extract_strided_slice %5 {offsets = [0, 6], sizes = [16, 1], strides = [1, 1]} : vector<16x7xf32> to vector<16x1xf32>
    %202 = vector.extract_strided_slice %6 {offsets = [0, 6], sizes = [16, 1], strides = [1, 1]} : vector<16x7xf32> to vector<16x1xf32>
    %c64_i32 = arith.constant 64 : i32
    %203 = tpu.dynamic_rotate %195 by %c64_i32 dim 1 : vector<16x128xf32>, i32 -> vector<16x128xf32>
    %c64_i32_57 = arith.constant 64 : i32
    %204 = tpu.dynamic_rotate %200 by %c64_i32_57 dim 1 : vector<16x128xf32>, i32 -> vector<16x128xf32>
    %205 = vector.broadcast %201 : vector<16x1xf32> to vector<16x128xf32>
    %206 = arith.mulf %205, %195 : vector<16x128xf32>
    %207 = vector.broadcast %202 : vector<16x1xf32> to vector<16x128xf32>
    %208 = arith.mulf %207, %204 : vector<16x128xf32>
    %209 = arith.addf %206, %208 : vector<16x128xf32>
    %210 = vector.broadcast %201 : vector<16x1xf32> to vector<16x128xf32>
    %211 = arith.mulf %210, %200 : vector<16x128xf32>
    %212 = vector.broadcast %202 : vector<16x1xf32> to vector<16x128xf32>
    %213 = arith.mulf %212, %203 : vector<16x128xf32>
    %214 = arith.subf %211, %213 : vector<16x128xf32>
    %215 = vector.extract_strided_slice %9 {offsets = [0, 0], sizes = [1, 1], strides = [1, 1]} : vector<6x2xf32> to vector<1x1xf32>
    %216 = vector.broadcast %215 : vector<1x1xf32> to vector<1x128xf32>
    %217 = arith.mulf %216, %25 : vector<1x128xf32>
    %218 = vector.extract_strided_slice %9 {offsets = [1, 0], sizes = [1, 1], strides = [1, 1]} : vector<6x2xf32> to vector<1x1xf32>
    %219 = vector.broadcast %218 : vector<1x1xf32> to vector<1x128xf32>
    %220 = arith.mulf %219, %26 : vector<1x128xf32>
    %221 = arith.addf %217, %220 : vector<1x128xf32>
    %222 = vector.extract_strided_slice %9 {offsets = [2, 0], sizes = [1, 1], strides = [1, 1]} : vector<6x2xf32> to vector<1x1xf32>
    %223 = vector.broadcast %222 : vector<1x1xf32> to vector<1x128xf32>
    %224 = arith.mulf %223, %27 : vector<1x128xf32>
    %225 = arith.addf %221, %224 : vector<1x128xf32>
    %226 = vector.extract_strided_slice %9 {offsets = [3, 0], sizes = [1, 1], strides = [1, 1]} : vector<6x2xf32> to vector<1x1xf32>
    %227 = vector.broadcast %226 : vector<1x1xf32> to vector<1x128xf32>
    %228 = arith.mulf %227, %28 : vector<1x128xf32>
    %229 = arith.addf %225, %228 : vector<1x128xf32>
    %230 = vector.extract_strided_slice %9 {offsets = [4, 0], sizes = [1, 1], strides = [1, 1]} : vector<6x2xf32> to vector<1x1xf32>
    %231 = vector.broadcast %230 : vector<1x1xf32> to vector<1x128xf32>
    %232 = arith.mulf %231, %29 : vector<1x128xf32>
    %233 = arith.addf %229, %232 : vector<1x128xf32>
    %234 = vector.extract_strided_slice %9 {offsets = [5, 0], sizes = [1, 1], strides = [1, 1]} : vector<6x2xf32> to vector<1x1xf32>
    %235 = vector.broadcast %234 : vector<1x1xf32> to vector<1x128xf32>
    %236 = arith.mulf %235, %30 : vector<1x128xf32>
    %237 = arith.addf %233, %236 : vector<1x128xf32>
    %238 = math.cos %237 : vector<1x128xf32>
    %239 = math.sin %237 : vector<1x128xf32>
    %240 = vector.broadcast %238 : vector<1x128xf32> to vector<16x128xf32>
    %241 = arith.mulf %240, %209 : vector<16x128xf32>
    %242 = vector.broadcast %239 : vector<1x128xf32> to vector<16x128xf32>
    %243 = arith.mulf %242, %214 : vector<16x128xf32>
    %244 = arith.addf %241, %243 : vector<16x128xf32>
    %245 = vector.broadcast %238 : vector<1x128xf32> to vector<16x128xf32>
    %246 = arith.mulf %245, %214 : vector<16x128xf32>
    %247 = vector.broadcast %239 : vector<1x128xf32> to vector<16x128xf32>
    %248 = arith.mulf %247, %209 : vector<16x128xf32>
    %249 = arith.subf %246, %248 : vector<16x128xf32>
    %250 = vector.extract_strided_slice %13 {offsets = [0, 0], sizes = [1, 1], strides = [1, 1]} : vector<7x2xf32> to vector<1x1xf32>
    %251 = vector.extract_strided_slice %17 {offsets = [0, 0], sizes = [1, 1], strides = [1, 1]} : vector<7x2xf32> to vector<1x1xf32>
    %252 = vector.broadcast %251 : vector<1x1xf32> to vector<1x128xf32>
    %253 = arith.mulf %18, %252 : vector<1x128xf32>
    %c1_i32_58 = arith.constant 1 : i32
    %254 = tpu.dynamic_rotate %244 by %c1_i32_58 dim 1 : vector<16x128xf32>, i32 -> vector<16x128xf32>
    %c127_i32_59 = arith.constant 127 : i32
    %255 = tpu.dynamic_rotate %244 by %c127_i32_59 dim 1 : vector<16x128xf32>, i32 -> vector<16x128xf32>
    %256 = vector.shape_cast %37 : vector<1x128xi1> to vector<1x128xi1>
    %257 = vector.broadcast %256 : vector<1x128xi1> to vector<16x128xi1>
    %258 = arith.select %257, %254, %255 : vector<16x128xi1>, vector<16x128xf32>
    %c1_i32_60 = arith.constant 1 : i32
    %259 = tpu.dynamic_rotate %249 by %c1_i32_60 dim 1 : vector<16x128xf32>, i32 -> vector<16x128xf32>
    %c127_i32_61 = arith.constant 127 : i32
    %260 = tpu.dynamic_rotate %249 by %c127_i32_61 dim 1 : vector<16x128xf32>, i32 -> vector<16x128xf32>
    %261 = vector.shape_cast %37 : vector<1x128xi1> to vector<1x128xi1>
    %262 = vector.broadcast %261 : vector<1x128xi1> to vector<16x128xi1>
    %263 = arith.select %262, %259, %260 : vector<16x128xi1>, vector<16x128xf32>
    %264 = vector.broadcast %250 : vector<1x1xf32> to vector<16x128xf32>
    %265 = arith.mulf %264, %244 : vector<16x128xf32>
    %266 = vector.broadcast %253 : vector<1x128xf32> to vector<16x128xf32>
    %267 = arith.mulf %266, %258 : vector<16x128xf32>
    %268 = arith.addf %265, %267 : vector<16x128xf32>
    %269 = vector.broadcast %250 : vector<1x1xf32> to vector<16x128xf32>
    %270 = arith.mulf %269, %249 : vector<16x128xf32>
    %271 = vector.broadcast %253 : vector<1x128xf32> to vector<16x128xf32>
    %272 = arith.mulf %271, %263 : vector<16x128xf32>
    %273 = arith.addf %270, %272 : vector<16x128xf32>
    %274 = vector.extract_strided_slice %13 {offsets = [1, 0], sizes = [1, 1], strides = [1, 1]} : vector<7x2xf32> to vector<1x1xf32>
    %275 = vector.extract_strided_slice %17 {offsets = [1, 0], sizes = [1, 1], strides = [1, 1]} : vector<7x2xf32> to vector<1x1xf32>
    %276 = vector.broadcast %275 : vector<1x1xf32> to vector<1x128xf32>
    %277 = arith.mulf %19, %276 : vector<1x128xf32>
    %c2_i32_62 = arith.constant 2 : i32
    %278 = tpu.dynamic_rotate %268 by %c2_i32_62 dim 1 : vector<16x128xf32>, i32 -> vector<16x128xf32>
    %c126_i32_63 = arith.constant 126 : i32
    %279 = tpu.dynamic_rotate %268 by %c126_i32_63 dim 1 : vector<16x128xf32>, i32 -> vector<16x128xf32>
    %280 = vector.shape_cast %42 : vector<1x128xi1> to vector<1x128xi1>
    %281 = vector.broadcast %280 : vector<1x128xi1> to vector<16x128xi1>
    %282 = arith.select %281, %278, %279 : vector<16x128xi1>, vector<16x128xf32>
    %c2_i32_64 = arith.constant 2 : i32
    %283 = tpu.dynamic_rotate %273 by %c2_i32_64 dim 1 : vector<16x128xf32>, i32 -> vector<16x128xf32>
    %c126_i32_65 = arith.constant 126 : i32
    %284 = tpu.dynamic_rotate %273 by %c126_i32_65 dim 1 : vector<16x128xf32>, i32 -> vector<16x128xf32>
    %285 = vector.shape_cast %42 : vector<1x128xi1> to vector<1x128xi1>
    %286 = vector.broadcast %285 : vector<1x128xi1> to vector<16x128xi1>
    %287 = arith.select %286, %283, %284 : vector<16x128xi1>, vector<16x128xf32>
    %288 = vector.broadcast %274 : vector<1x1xf32> to vector<16x128xf32>
    %289 = arith.mulf %288, %268 : vector<16x128xf32>
    %290 = vector.broadcast %277 : vector<1x128xf32> to vector<16x128xf32>
    %291 = arith.mulf %290, %282 : vector<16x128xf32>
    %292 = arith.addf %289, %291 : vector<16x128xf32>
    %293 = vector.broadcast %274 : vector<1x1xf32> to vector<16x128xf32>
    %294 = arith.mulf %293, %273 : vector<16x128xf32>
    %295 = vector.broadcast %277 : vector<1x128xf32> to vector<16x128xf32>
    %296 = arith.mulf %295, %287 : vector<16x128xf32>
    %297 = arith.addf %294, %296 : vector<16x128xf32>
    %298 = vector.extract_strided_slice %13 {offsets = [2, 0], sizes = [1, 1], strides = [1, 1]} : vector<7x2xf32> to vector<1x1xf32>
    %299 = vector.extract_strided_slice %17 {offsets = [2, 0], sizes = [1, 1], strides = [1, 1]} : vector<7x2xf32> to vector<1x1xf32>
    %300 = vector.broadcast %299 : vector<1x1xf32> to vector<1x128xf32>
    %301 = arith.mulf %20, %300 : vector<1x128xf32>
    %c4_i32_66 = arith.constant 4 : i32
    %302 = tpu.dynamic_rotate %292 by %c4_i32_66 dim 1 : vector<16x128xf32>, i32 -> vector<16x128xf32>
    %c124_i32_67 = arith.constant 124 : i32
    %303 = tpu.dynamic_rotate %292 by %c124_i32_67 dim 1 : vector<16x128xf32>, i32 -> vector<16x128xf32>
    %304 = vector.shape_cast %47 : vector<1x128xi1> to vector<1x128xi1>
    %305 = vector.broadcast %304 : vector<1x128xi1> to vector<16x128xi1>
    %306 = arith.select %305, %302, %303 : vector<16x128xi1>, vector<16x128xf32>
    %c4_i32_68 = arith.constant 4 : i32
    %307 = tpu.dynamic_rotate %297 by %c4_i32_68 dim 1 : vector<16x128xf32>, i32 -> vector<16x128xf32>
    %c124_i32_69 = arith.constant 124 : i32
    %308 = tpu.dynamic_rotate %297 by %c124_i32_69 dim 1 : vector<16x128xf32>, i32 -> vector<16x128xf32>
    %309 = vector.shape_cast %47 : vector<1x128xi1> to vector<1x128xi1>
    %310 = vector.broadcast %309 : vector<1x128xi1> to vector<16x128xi1>
    %311 = arith.select %310, %307, %308 : vector<16x128xi1>, vector<16x128xf32>
    %312 = vector.broadcast %298 : vector<1x1xf32> to vector<16x128xf32>
    %313 = arith.mulf %312, %292 : vector<16x128xf32>
    %314 = vector.broadcast %301 : vector<1x128xf32> to vector<16x128xf32>
    %315 = arith.mulf %314, %306 : vector<16x128xf32>
    %316 = arith.addf %313, %315 : vector<16x128xf32>
    %317 = vector.broadcast %298 : vector<1x1xf32> to vector<16x128xf32>
    %318 = arith.mulf %317, %297 : vector<16x128xf32>
    %319 = vector.broadcast %301 : vector<1x128xf32> to vector<16x128xf32>
    %320 = arith.mulf %319, %311 : vector<16x128xf32>
    %321 = arith.addf %318, %320 : vector<16x128xf32>
    %322 = vector.extract_strided_slice %13 {offsets = [3, 0], sizes = [1, 1], strides = [1, 1]} : vector<7x2xf32> to vector<1x1xf32>
    %323 = vector.extract_strided_slice %17 {offsets = [3, 0], sizes = [1, 1], strides = [1, 1]} : vector<7x2xf32> to vector<1x1xf32>
    %324 = vector.broadcast %323 : vector<1x1xf32> to vector<1x128xf32>
    %325 = arith.mulf %21, %324 : vector<1x128xf32>
    %c8_i32_70 = arith.constant 8 : i32
    %326 = tpu.dynamic_rotate %316 by %c8_i32_70 dim 1 : vector<16x128xf32>, i32 -> vector<16x128xf32>
    %c120_i32_71 = arith.constant 120 : i32
    %327 = tpu.dynamic_rotate %316 by %c120_i32_71 dim 1 : vector<16x128xf32>, i32 -> vector<16x128xf32>
    %328 = vector.shape_cast %52 : vector<1x128xi1> to vector<1x128xi1>
    %329 = vector.broadcast %328 : vector<1x128xi1> to vector<16x128xi1>
    %330 = arith.select %329, %326, %327 : vector<16x128xi1>, vector<16x128xf32>
    %c8_i32_72 = arith.constant 8 : i32
    %331 = tpu.dynamic_rotate %321 by %c8_i32_72 dim 1 : vector<16x128xf32>, i32 -> vector<16x128xf32>
    %c120_i32_73 = arith.constant 120 : i32
    %332 = tpu.dynamic_rotate %321 by %c120_i32_73 dim 1 : vector<16x128xf32>, i32 -> vector<16x128xf32>
    %333 = vector.shape_cast %52 : vector<1x128xi1> to vector<1x128xi1>
    %334 = vector.broadcast %333 : vector<1x128xi1> to vector<16x128xi1>
    %335 = arith.select %334, %331, %332 : vector<16x128xi1>, vector<16x128xf32>
    %336 = vector.broadcast %322 : vector<1x1xf32> to vector<16x128xf32>
    %337 = arith.mulf %336, %316 : vector<16x128xf32>
    %338 = vector.broadcast %325 : vector<1x128xf32> to vector<16x128xf32>
    %339 = arith.mulf %338, %330 : vector<16x128xf32>
    %340 = arith.addf %337, %339 : vector<16x128xf32>
    %341 = vector.broadcast %322 : vector<1x1xf32> to vector<16x128xf32>
    %342 = arith.mulf %341, %321 : vector<16x128xf32>
    %343 = vector.broadcast %325 : vector<1x128xf32> to vector<16x128xf32>
    %344 = arith.mulf %343, %335 : vector<16x128xf32>
    %345 = arith.addf %342, %344 : vector<16x128xf32>
    %346 = vector.extract_strided_slice %13 {offsets = [4, 0], sizes = [1, 1], strides = [1, 1]} : vector<7x2xf32> to vector<1x1xf32>
    %347 = vector.extract_strided_slice %17 {offsets = [4, 0], sizes = [1, 1], strides = [1, 1]} : vector<7x2xf32> to vector<1x1xf32>
    %348 = vector.broadcast %347 : vector<1x1xf32> to vector<1x128xf32>
    %349 = arith.mulf %22, %348 : vector<1x128xf32>
    %c16_i32_74 = arith.constant 16 : i32
    %350 = tpu.dynamic_rotate %340 by %c16_i32_74 dim 1 : vector<16x128xf32>, i32 -> vector<16x128xf32>
    %c112_i32_75 = arith.constant 112 : i32
    %351 = tpu.dynamic_rotate %340 by %c112_i32_75 dim 1 : vector<16x128xf32>, i32 -> vector<16x128xf32>
    %352 = vector.shape_cast %57 : vector<1x128xi1> to vector<1x128xi1>
    %353 = vector.broadcast %352 : vector<1x128xi1> to vector<16x128xi1>
    %354 = arith.select %353, %350, %351 : vector<16x128xi1>, vector<16x128xf32>
    %c16_i32_76 = arith.constant 16 : i32
    %355 = tpu.dynamic_rotate %345 by %c16_i32_76 dim 1 : vector<16x128xf32>, i32 -> vector<16x128xf32>
    %c112_i32_77 = arith.constant 112 : i32
    %356 = tpu.dynamic_rotate %345 by %c112_i32_77 dim 1 : vector<16x128xf32>, i32 -> vector<16x128xf32>
    %357 = vector.shape_cast %57 : vector<1x128xi1> to vector<1x128xi1>
    %358 = vector.broadcast %357 : vector<1x128xi1> to vector<16x128xi1>
    %359 = arith.select %358, %355, %356 : vector<16x128xi1>, vector<16x128xf32>
    %360 = vector.broadcast %346 : vector<1x1xf32> to vector<16x128xf32>
    %361 = arith.mulf %360, %340 : vector<16x128xf32>
    %362 = vector.broadcast %349 : vector<1x128xf32> to vector<16x128xf32>
    %363 = arith.mulf %362, %354 : vector<16x128xf32>
    %364 = arith.addf %361, %363 : vector<16x128xf32>
    %365 = vector.broadcast %346 : vector<1x1xf32> to vector<16x128xf32>
    %366 = arith.mulf %365, %345 : vector<16x128xf32>
    %367 = vector.broadcast %349 : vector<1x128xf32> to vector<16x128xf32>
    %368 = arith.mulf %367, %359 : vector<16x128xf32>
    %369 = arith.addf %366, %368 : vector<16x128xf32>
    %370 = vector.extract_strided_slice %13 {offsets = [5, 0], sizes = [1, 1], strides = [1, 1]} : vector<7x2xf32> to vector<1x1xf32>
    %371 = vector.extract_strided_slice %17 {offsets = [5, 0], sizes = [1, 1], strides = [1, 1]} : vector<7x2xf32> to vector<1x1xf32>
    %372 = vector.broadcast %371 : vector<1x1xf32> to vector<1x128xf32>
    %373 = arith.mulf %23, %372 : vector<1x128xf32>
    %c32_i32_78 = arith.constant 32 : i32
    %374 = tpu.dynamic_rotate %364 by %c32_i32_78 dim 1 : vector<16x128xf32>, i32 -> vector<16x128xf32>
    %c96_i32_79 = arith.constant 96 : i32
    %375 = tpu.dynamic_rotate %364 by %c96_i32_79 dim 1 : vector<16x128xf32>, i32 -> vector<16x128xf32>
    %376 = vector.shape_cast %62 : vector<1x128xi1> to vector<1x128xi1>
    %377 = vector.broadcast %376 : vector<1x128xi1> to vector<16x128xi1>
    %378 = arith.select %377, %374, %375 : vector<16x128xi1>, vector<16x128xf32>
    %c32_i32_80 = arith.constant 32 : i32
    %379 = tpu.dynamic_rotate %369 by %c32_i32_80 dim 1 : vector<16x128xf32>, i32 -> vector<16x128xf32>
    %c96_i32_81 = arith.constant 96 : i32
    %380 = tpu.dynamic_rotate %369 by %c96_i32_81 dim 1 : vector<16x128xf32>, i32 -> vector<16x128xf32>
    %381 = vector.shape_cast %62 : vector<1x128xi1> to vector<1x128xi1>
    %382 = vector.broadcast %381 : vector<1x128xi1> to vector<16x128xi1>
    %383 = arith.select %382, %379, %380 : vector<16x128xi1>, vector<16x128xf32>
    %384 = vector.broadcast %370 : vector<1x1xf32> to vector<16x128xf32>
    %385 = arith.mulf %384, %364 : vector<16x128xf32>
    %386 = vector.broadcast %373 : vector<1x128xf32> to vector<16x128xf32>
    %387 = arith.mulf %386, %378 : vector<16x128xf32>
    %388 = arith.addf %385, %387 : vector<16x128xf32>
    %389 = vector.broadcast %370 : vector<1x1xf32> to vector<16x128xf32>
    %390 = arith.mulf %389, %369 : vector<16x128xf32>
    %391 = vector.broadcast %373 : vector<1x128xf32> to vector<16x128xf32>
    %392 = arith.mulf %391, %383 : vector<16x128xf32>
    %393 = arith.addf %390, %392 : vector<16x128xf32>
    %394 = vector.extract_strided_slice %13 {offsets = [6, 0], sizes = [1, 1], strides = [1, 1]} : vector<7x2xf32> to vector<1x1xf32>
    %395 = vector.extract_strided_slice %17 {offsets = [6, 0], sizes = [1, 1], strides = [1, 1]} : vector<7x2xf32> to vector<1x1xf32>
    %396 = vector.broadcast %395 : vector<1x1xf32> to vector<1x128xf32>
    %397 = arith.mulf %24, %396 : vector<1x128xf32>
    %c64_i32_82 = arith.constant 64 : i32
    %398 = tpu.dynamic_rotate %388 by %c64_i32_82 dim 1 : vector<16x128xf32>, i32 -> vector<16x128xf32>
    %c64_i32_83 = arith.constant 64 : i32
    %399 = tpu.dynamic_rotate %393 by %c64_i32_83 dim 1 : vector<16x128xf32>, i32 -> vector<16x128xf32>
    %400 = vector.broadcast %394 : vector<1x1xf32> to vector<16x128xf32>
    %401 = arith.mulf %400, %388 : vector<16x128xf32>
    %402 = vector.broadcast %397 : vector<1x128xf32> to vector<16x128xf32>
    %403 = arith.mulf %402, %398 : vector<16x128xf32>
    %404 = arith.addf %401, %403 : vector<16x128xf32>
    %405 = vector.broadcast %394 : vector<1x1xf32> to vector<16x128xf32>
    %406 = arith.mulf %405, %393 : vector<16x128xf32>
    %407 = vector.broadcast %397 : vector<1x128xf32> to vector<16x128xf32>
    %408 = arith.mulf %407, %399 : vector<16x128xf32>
    %409 = arith.addf %406, %408 : vector<16x128xf32>
    %410 = vector.extract_strided_slice %5 {offsets = [0, 0], sizes = [16, 1], strides = [1, 1]} : vector<16x7xf32> to vector<16x1xf32>
    %411 = vector.extract_strided_slice %6 {offsets = [0, 0], sizes = [16, 1], strides = [1, 1]} : vector<16x7xf32> to vector<16x1xf32>
    %c1_i32_84 = arith.constant 1 : i32
    %412 = tpu.dynamic_rotate %404 by %c1_i32_84 dim 1 : vector<16x128xf32>, i32 -> vector<16x128xf32>
    %c127_i32_85 = arith.constant 127 : i32
    %413 = tpu.dynamic_rotate %404 by %c127_i32_85 dim 1 : vector<16x128xf32>, i32 -> vector<16x128xf32>
    %414 = vector.shape_cast %37 : vector<1x128xi1> to vector<1x128xi1>
    %415 = vector.broadcast %414 : vector<1x128xi1> to vector<16x128xi1>
    %416 = arith.select %415, %412, %413 : vector<16x128xi1>, vector<16x128xf32>
    %c1_i32_86 = arith.constant 1 : i32
    %417 = tpu.dynamic_rotate %409 by %c1_i32_86 dim 1 : vector<16x128xf32>, i32 -> vector<16x128xf32>
    %c127_i32_87 = arith.constant 127 : i32
    %418 = tpu.dynamic_rotate %409 by %c127_i32_87 dim 1 : vector<16x128xf32>, i32 -> vector<16x128xf32>
    %419 = vector.shape_cast %37 : vector<1x128xi1> to vector<1x128xi1>
    %420 = vector.broadcast %419 : vector<1x128xi1> to vector<16x128xi1>
    %421 = arith.select %420, %417, %418 : vector<16x128xi1>, vector<16x128xf32>
    %422 = vector.broadcast %410 : vector<16x1xf32> to vector<16x128xf32>
    %423 = arith.mulf %422, %404 : vector<16x128xf32>
    %424 = vector.broadcast %411 : vector<16x1xf32> to vector<16x128xf32>
    %425 = arith.mulf %424, %421 : vector<16x128xf32>
    %426 = arith.addf %423, %425 : vector<16x128xf32>
    %427 = vector.broadcast %410 : vector<16x1xf32> to vector<16x128xf32>
    %428 = arith.mulf %427, %409 : vector<16x128xf32>
    %429 = vector.broadcast %411 : vector<16x1xf32> to vector<16x128xf32>
    %430 = arith.mulf %429, %416 : vector<16x128xf32>
    %431 = arith.subf %428, %430 : vector<16x128xf32>
    %432 = vector.extract_strided_slice %5 {offsets = [0, 1], sizes = [16, 1], strides = [1, 1]} : vector<16x7xf32> to vector<16x1xf32>
    %433 = vector.extract_strided_slice %6 {offsets = [0, 1], sizes = [16, 1], strides = [1, 1]} : vector<16x7xf32> to vector<16x1xf32>
    %c2_i32_88 = arith.constant 2 : i32
    %434 = tpu.dynamic_rotate %426 by %c2_i32_88 dim 1 : vector<16x128xf32>, i32 -> vector<16x128xf32>
    %c126_i32_89 = arith.constant 126 : i32
    %435 = tpu.dynamic_rotate %426 by %c126_i32_89 dim 1 : vector<16x128xf32>, i32 -> vector<16x128xf32>
    %436 = vector.shape_cast %42 : vector<1x128xi1> to vector<1x128xi1>
    %437 = vector.broadcast %436 : vector<1x128xi1> to vector<16x128xi1>
    %438 = arith.select %437, %434, %435 : vector<16x128xi1>, vector<16x128xf32>
    %c2_i32_90 = arith.constant 2 : i32
    %439 = tpu.dynamic_rotate %431 by %c2_i32_90 dim 1 : vector<16x128xf32>, i32 -> vector<16x128xf32>
    %c126_i32_91 = arith.constant 126 : i32
    %440 = tpu.dynamic_rotate %431 by %c126_i32_91 dim 1 : vector<16x128xf32>, i32 -> vector<16x128xf32>
    %441 = vector.shape_cast %42 : vector<1x128xi1> to vector<1x128xi1>
    %442 = vector.broadcast %441 : vector<1x128xi1> to vector<16x128xi1>
    %443 = arith.select %442, %439, %440 : vector<16x128xi1>, vector<16x128xf32>
    %444 = vector.broadcast %432 : vector<16x1xf32> to vector<16x128xf32>
    %445 = arith.mulf %444, %426 : vector<16x128xf32>
    %446 = vector.broadcast %433 : vector<16x1xf32> to vector<16x128xf32>
    %447 = arith.mulf %446, %443 : vector<16x128xf32>
    %448 = arith.addf %445, %447 : vector<16x128xf32>
    %449 = vector.broadcast %432 : vector<16x1xf32> to vector<16x128xf32>
    %450 = arith.mulf %449, %431 : vector<16x128xf32>
    %451 = vector.broadcast %433 : vector<16x1xf32> to vector<16x128xf32>
    %452 = arith.mulf %451, %438 : vector<16x128xf32>
    %453 = arith.subf %450, %452 : vector<16x128xf32>
    %454 = vector.extract_strided_slice %5 {offsets = [0, 2], sizes = [16, 1], strides = [1, 1]} : vector<16x7xf32> to vector<16x1xf32>
    %455 = vector.extract_strided_slice %6 {offsets = [0, 2], sizes = [16, 1], strides = [1, 1]} : vector<16x7xf32> to vector<16x1xf32>
    %c4_i32_92 = arith.constant 4 : i32
    %456 = tpu.dynamic_rotate %448 by %c4_i32_92 dim 1 : vector<16x128xf32>, i32 -> vector<16x128xf32>
    %c124_i32_93 = arith.constant 124 : i32
    %457 = tpu.dynamic_rotate %448 by %c124_i32_93 dim 1 : vector<16x128xf32>, i32 -> vector<16x128xf32>
    %458 = vector.shape_cast %47 : vector<1x128xi1> to vector<1x128xi1>
    %459 = vector.broadcast %458 : vector<1x128xi1> to vector<16x128xi1>
    %460 = arith.select %459, %456, %457 : vector<16x128xi1>, vector<16x128xf32>
    %c4_i32_94 = arith.constant 4 : i32
    %461 = tpu.dynamic_rotate %453 by %c4_i32_94 dim 1 : vector<16x128xf32>, i32 -> vector<16x128xf32>
    %c124_i32_95 = arith.constant 124 : i32
    %462 = tpu.dynamic_rotate %453 by %c124_i32_95 dim 1 : vector<16x128xf32>, i32 -> vector<16x128xf32>
    %463 = vector.shape_cast %47 : vector<1x128xi1> to vector<1x128xi1>
    %464 = vector.broadcast %463 : vector<1x128xi1> to vector<16x128xi1>
    %465 = arith.select %464, %461, %462 : vector<16x128xi1>, vector<16x128xf32>
    %466 = vector.broadcast %454 : vector<16x1xf32> to vector<16x128xf32>
    %467 = arith.mulf %466, %448 : vector<16x128xf32>
    %468 = vector.broadcast %455 : vector<16x1xf32> to vector<16x128xf32>
    %469 = arith.mulf %468, %465 : vector<16x128xf32>
    %470 = arith.addf %467, %469 : vector<16x128xf32>
    %471 = vector.broadcast %454 : vector<16x1xf32> to vector<16x128xf32>
    %472 = arith.mulf %471, %453 : vector<16x128xf32>
    %473 = vector.broadcast %455 : vector<16x1xf32> to vector<16x128xf32>
    %474 = arith.mulf %473, %460 : vector<16x128xf32>
    %475 = arith.subf %472, %474 : vector<16x128xf32>
    %476 = vector.extract_strided_slice %5 {offsets = [0, 3], sizes = [16, 1], strides = [1, 1]} : vector<16x7xf32> to vector<16x1xf32>
    %477 = vector.extract_strided_slice %6 {offsets = [0, 3], sizes = [16, 1], strides = [1, 1]} : vector<16x7xf32> to vector<16x1xf32>
    %c8_i32_96 = arith.constant 8 : i32
    %478 = tpu.dynamic_rotate %470 by %c8_i32_96 dim 1 : vector<16x128xf32>, i32 -> vector<16x128xf32>
    %c120_i32_97 = arith.constant 120 : i32
    %479 = tpu.dynamic_rotate %470 by %c120_i32_97 dim 1 : vector<16x128xf32>, i32 -> vector<16x128xf32>
    %480 = vector.shape_cast %52 : vector<1x128xi1> to vector<1x128xi1>
    %481 = vector.broadcast %480 : vector<1x128xi1> to vector<16x128xi1>
    %482 = arith.select %481, %478, %479 : vector<16x128xi1>, vector<16x128xf32>
    %c8_i32_98 = arith.constant 8 : i32
    %483 = tpu.dynamic_rotate %475 by %c8_i32_98 dim 1 : vector<16x128xf32>, i32 -> vector<16x128xf32>
    %c120_i32_99 = arith.constant 120 : i32
    %484 = tpu.dynamic_rotate %475 by %c120_i32_99 dim 1 : vector<16x128xf32>, i32 -> vector<16x128xf32>
    %485 = vector.shape_cast %52 : vector<1x128xi1> to vector<1x128xi1>
    %486 = vector.broadcast %485 : vector<1x128xi1> to vector<16x128xi1>
    %487 = arith.select %486, %483, %484 : vector<16x128xi1>, vector<16x128xf32>
    %488 = vector.broadcast %476 : vector<16x1xf32> to vector<16x128xf32>
    %489 = arith.mulf %488, %470 : vector<16x128xf32>
    %490 = vector.broadcast %477 : vector<16x1xf32> to vector<16x128xf32>
    %491 = arith.mulf %490, %487 : vector<16x128xf32>
    %492 = arith.addf %489, %491 : vector<16x128xf32>
    %493 = vector.broadcast %476 : vector<16x1xf32> to vector<16x128xf32>
    %494 = arith.mulf %493, %475 : vector<16x128xf32>
    %495 = vector.broadcast %477 : vector<16x1xf32> to vector<16x128xf32>
    %496 = arith.mulf %495, %482 : vector<16x128xf32>
    %497 = arith.subf %494, %496 : vector<16x128xf32>
    %498 = vector.extract_strided_slice %5 {offsets = [0, 4], sizes = [16, 1], strides = [1, 1]} : vector<16x7xf32> to vector<16x1xf32>
    %499 = vector.extract_strided_slice %6 {offsets = [0, 4], sizes = [16, 1], strides = [1, 1]} : vector<16x7xf32> to vector<16x1xf32>
    %c16_i32_100 = arith.constant 16 : i32
    %500 = tpu.dynamic_rotate %492 by %c16_i32_100 dim 1 : vector<16x128xf32>, i32 -> vector<16x128xf32>
    %c112_i32_101 = arith.constant 112 : i32
    %501 = tpu.dynamic_rotate %492 by %c112_i32_101 dim 1 : vector<16x128xf32>, i32 -> vector<16x128xf32>
    %502 = vector.shape_cast %57 : vector<1x128xi1> to vector<1x128xi1>
    %503 = vector.broadcast %502 : vector<1x128xi1> to vector<16x128xi1>
    %504 = arith.select %503, %500, %501 : vector<16x128xi1>, vector<16x128xf32>
    %c16_i32_102 = arith.constant 16 : i32
    %505 = tpu.dynamic_rotate %497 by %c16_i32_102 dim 1 : vector<16x128xf32>, i32 -> vector<16x128xf32>
    %c112_i32_103 = arith.constant 112 : i32
    %506 = tpu.dynamic_rotate %497 by %c112_i32_103 dim 1 : vector<16x128xf32>, i32 -> vector<16x128xf32>
    %507 = vector.shape_cast %57 : vector<1x128xi1> to vector<1x128xi1>
    %508 = vector.broadcast %507 : vector<1x128xi1> to vector<16x128xi1>
    %509 = arith.select %508, %505, %506 : vector<16x128xi1>, vector<16x128xf32>
    %510 = vector.broadcast %498 : vector<16x1xf32> to vector<16x128xf32>
    %511 = arith.mulf %510, %492 : vector<16x128xf32>
    %512 = vector.broadcast %499 : vector<16x1xf32> to vector<16x128xf32>
    %513 = arith.mulf %512, %509 : vector<16x128xf32>
    %514 = arith.addf %511, %513 : vector<16x128xf32>
    %515 = vector.broadcast %498 : vector<16x1xf32> to vector<16x128xf32>
    %516 = arith.mulf %515, %497 : vector<16x128xf32>
    %517 = vector.broadcast %499 : vector<16x1xf32> to vector<16x128xf32>
    %518 = arith.mulf %517, %504 : vector<16x128xf32>
    %519 = arith.subf %516, %518 : vector<16x128xf32>
    %520 = vector.extract_strided_slice %5 {offsets = [0, 5], sizes = [16, 1], strides = [1, 1]} : vector<16x7xf32> to vector<16x1xf32>
    %521 = vector.extract_strided_slice %6 {offsets = [0, 5], sizes = [16, 1], strides = [1, 1]} : vector<16x7xf32> to vector<16x1xf32>
    %c32_i32_104 = arith.constant 32 : i32
    %522 = tpu.dynamic_rotate %514 by %c32_i32_104 dim 1 : vector<16x128xf32>, i32 -> vector<16x128xf32>
    %c96_i32_105 = arith.constant 96 : i32
    %523 = tpu.dynamic_rotate %514 by %c96_i32_105 dim 1 : vector<16x128xf32>, i32 -> vector<16x128xf32>
    %524 = vector.shape_cast %62 : vector<1x128xi1> to vector<1x128xi1>
    %525 = vector.broadcast %524 : vector<1x128xi1> to vector<16x128xi1>
    %526 = arith.select %525, %522, %523 : vector<16x128xi1>, vector<16x128xf32>
    %c32_i32_106 = arith.constant 32 : i32
    %527 = tpu.dynamic_rotate %519 by %c32_i32_106 dim 1 : vector<16x128xf32>, i32 -> vector<16x128xf32>
    %c96_i32_107 = arith.constant 96 : i32
    %528 = tpu.dynamic_rotate %519 by %c96_i32_107 dim 1 : vector<16x128xf32>, i32 -> vector<16x128xf32>
    %529 = vector.shape_cast %62 : vector<1x128xi1> to vector<1x128xi1>
    %530 = vector.broadcast %529 : vector<1x128xi1> to vector<16x128xi1>
    %531 = arith.select %530, %527, %528 : vector<16x128xi1>, vector<16x128xf32>
    %532 = vector.broadcast %520 : vector<16x1xf32> to vector<16x128xf32>
    %533 = arith.mulf %532, %514 : vector<16x128xf32>
    %534 = vector.broadcast %521 : vector<16x1xf32> to vector<16x128xf32>
    %535 = arith.mulf %534, %531 : vector<16x128xf32>
    %536 = arith.addf %533, %535 : vector<16x128xf32>
    %537 = vector.broadcast %520 : vector<16x1xf32> to vector<16x128xf32>
    %538 = arith.mulf %537, %519 : vector<16x128xf32>
    %539 = vector.broadcast %521 : vector<16x1xf32> to vector<16x128xf32>
    %540 = arith.mulf %539, %526 : vector<16x128xf32>
    %541 = arith.subf %538, %540 : vector<16x128xf32>
    %542 = vector.extract_strided_slice %5 {offsets = [0, 6], sizes = [16, 1], strides = [1, 1]} : vector<16x7xf32> to vector<16x1xf32>
    %543 = vector.extract_strided_slice %6 {offsets = [0, 6], sizes = [16, 1], strides = [1, 1]} : vector<16x7xf32> to vector<16x1xf32>
    %c64_i32_108 = arith.constant 64 : i32
    %544 = tpu.dynamic_rotate %536 by %c64_i32_108 dim 1 : vector<16x128xf32>, i32 -> vector<16x128xf32>
    %c64_i32_109 = arith.constant 64 : i32
    %545 = tpu.dynamic_rotate %541 by %c64_i32_109 dim 1 : vector<16x128xf32>, i32 -> vector<16x128xf32>
    %546 = vector.broadcast %542 : vector<16x1xf32> to vector<16x128xf32>
    %547 = arith.mulf %546, %536 : vector<16x128xf32>
    %548 = vector.broadcast %543 : vector<16x1xf32> to vector<16x128xf32>
    %549 = arith.mulf %548, %545 : vector<16x128xf32>
    %550 = arith.addf %547, %549 : vector<16x128xf32>
    %551 = vector.broadcast %542 : vector<16x1xf32> to vector<16x128xf32>
    %552 = arith.mulf %551, %541 : vector<16x128xf32>
    %553 = vector.broadcast %543 : vector<16x1xf32> to vector<16x128xf32>
    %554 = arith.mulf %553, %544 : vector<16x128xf32>
    %555 = arith.subf %552, %554 : vector<16x128xf32>
    %556 = vector.extract_strided_slice %9 {offsets = [0, 1], sizes = [1, 1], strides = [1, 1]} : vector<6x2xf32> to vector<1x1xf32>
    %557 = vector.broadcast %556 : vector<1x1xf32> to vector<1x128xf32>
    %558 = arith.mulf %557, %25 : vector<1x128xf32>
    %559 = vector.extract_strided_slice %9 {offsets = [1, 1], sizes = [1, 1], strides = [1, 1]} : vector<6x2xf32> to vector<1x1xf32>
    %560 = vector.broadcast %559 : vector<1x1xf32> to vector<1x128xf32>
    %561 = arith.mulf %560, %26 : vector<1x128xf32>
    %562 = arith.addf %558, %561 : vector<1x128xf32>
    %563 = vector.extract_strided_slice %9 {offsets = [2, 1], sizes = [1, 1], strides = [1, 1]} : vector<6x2xf32> to vector<1x1xf32>
    %564 = vector.broadcast %563 : vector<1x1xf32> to vector<1x128xf32>
    %565 = arith.mulf %564, %27 : vector<1x128xf32>
    %566 = arith.addf %562, %565 : vector<1x128xf32>
    %567 = vector.extract_strided_slice %9 {offsets = [3, 1], sizes = [1, 1], strides = [1, 1]} : vector<6x2xf32> to vector<1x1xf32>
    %568 = vector.broadcast %567 : vector<1x1xf32> to vector<1x128xf32>
    %569 = arith.mulf %568, %28 : vector<1x128xf32>
    %570 = arith.addf %566, %569 : vector<1x128xf32>
    %571 = vector.extract_strided_slice %9 {offsets = [4, 1], sizes = [1, 1], strides = [1, 1]} : vector<6x2xf32> to vector<1x1xf32>
    %572 = vector.broadcast %571 : vector<1x1xf32> to vector<1x128xf32>
    %573 = arith.mulf %572, %29 : vector<1x128xf32>
    %574 = arith.addf %570, %573 : vector<1x128xf32>
    %575 = vector.extract_strided_slice %9 {offsets = [5, 1], sizes = [1, 1], strides = [1, 1]} : vector<6x2xf32> to vector<1x1xf32>
    %576 = vector.broadcast %575 : vector<1x1xf32> to vector<1x128xf32>
    %577 = arith.mulf %576, %30 : vector<1x128xf32>
    %578 = arith.addf %574, %577 : vector<1x128xf32>
    %579 = math.cos %578 : vector<1x128xf32>
    %580 = math.sin %578 : vector<1x128xf32>
    %581 = vector.broadcast %579 : vector<1x128xf32> to vector<16x128xf32>
    %582 = arith.mulf %581, %550 : vector<16x128xf32>
    %583 = vector.broadcast %580 : vector<1x128xf32> to vector<16x128xf32>
    %584 = arith.mulf %583, %555 : vector<16x128xf32>
    %585 = arith.addf %582, %584 : vector<16x128xf32>
    %586 = vector.broadcast %579 : vector<1x128xf32> to vector<16x128xf32>
    %587 = arith.mulf %586, %555 : vector<16x128xf32>
    %588 = vector.broadcast %580 : vector<1x128xf32> to vector<16x128xf32>
    %589 = arith.mulf %588, %550 : vector<16x128xf32>
    %590 = arith.subf %587, %589 : vector<16x128xf32>
    %591 = vector.extract_strided_slice %13 {offsets = [0, 1], sizes = [1, 1], strides = [1, 1]} : vector<7x2xf32> to vector<1x1xf32>
    %592 = vector.extract_strided_slice %17 {offsets = [0, 1], sizes = [1, 1], strides = [1, 1]} : vector<7x2xf32> to vector<1x1xf32>
    %593 = vector.broadcast %592 : vector<1x1xf32> to vector<1x128xf32>
    %594 = arith.mulf %18, %593 : vector<1x128xf32>
    %c1_i32_110 = arith.constant 1 : i32
    %595 = tpu.dynamic_rotate %585 by %c1_i32_110 dim 1 : vector<16x128xf32>, i32 -> vector<16x128xf32>
    %c127_i32_111 = arith.constant 127 : i32
    %596 = tpu.dynamic_rotate %585 by %c127_i32_111 dim 1 : vector<16x128xf32>, i32 -> vector<16x128xf32>
    %597 = vector.shape_cast %37 : vector<1x128xi1> to vector<1x128xi1>
    %598 = vector.broadcast %597 : vector<1x128xi1> to vector<16x128xi1>
    %599 = arith.select %598, %595, %596 : vector<16x128xi1>, vector<16x128xf32>
    %c1_i32_112 = arith.constant 1 : i32
    %600 = tpu.dynamic_rotate %590 by %c1_i32_112 dim 1 : vector<16x128xf32>, i32 -> vector<16x128xf32>
    %c127_i32_113 = arith.constant 127 : i32
    %601 = tpu.dynamic_rotate %590 by %c127_i32_113 dim 1 : vector<16x128xf32>, i32 -> vector<16x128xf32>
    %602 = vector.shape_cast %37 : vector<1x128xi1> to vector<1x128xi1>
    %603 = vector.broadcast %602 : vector<1x128xi1> to vector<16x128xi1>
    %604 = arith.select %603, %600, %601 : vector<16x128xi1>, vector<16x128xf32>
    %605 = vector.broadcast %591 : vector<1x1xf32> to vector<16x128xf32>
    %606 = arith.mulf %605, %585 : vector<16x128xf32>
    %607 = vector.broadcast %594 : vector<1x128xf32> to vector<16x128xf32>
    %608 = arith.mulf %607, %599 : vector<16x128xf32>
    %609 = arith.addf %606, %608 : vector<16x128xf32>
    %610 = vector.broadcast %591 : vector<1x1xf32> to vector<16x128xf32>
    %611 = arith.mulf %610, %590 : vector<16x128xf32>
    %612 = vector.broadcast %594 : vector<1x128xf32> to vector<16x128xf32>
    %613 = arith.mulf %612, %604 : vector<16x128xf32>
    %614 = arith.addf %611, %613 : vector<16x128xf32>
    %615 = vector.extract_strided_slice %13 {offsets = [1, 1], sizes = [1, 1], strides = [1, 1]} : vector<7x2xf32> to vector<1x1xf32>
    %616 = vector.extract_strided_slice %17 {offsets = [1, 1], sizes = [1, 1], strides = [1, 1]} : vector<7x2xf32> to vector<1x1xf32>
    %617 = vector.broadcast %616 : vector<1x1xf32> to vector<1x128xf32>
    %618 = arith.mulf %19, %617 : vector<1x128xf32>
    %c2_i32_114 = arith.constant 2 : i32
    %619 = tpu.dynamic_rotate %609 by %c2_i32_114 dim 1 : vector<16x128xf32>, i32 -> vector<16x128xf32>
    %c126_i32_115 = arith.constant 126 : i32
    %620 = tpu.dynamic_rotate %609 by %c126_i32_115 dim 1 : vector<16x128xf32>, i32 -> vector<16x128xf32>
    %621 = vector.shape_cast %42 : vector<1x128xi1> to vector<1x128xi1>
    %622 = vector.broadcast %621 : vector<1x128xi1> to vector<16x128xi1>
    %623 = arith.select %622, %619, %620 : vector<16x128xi1>, vector<16x128xf32>
    %c2_i32_116 = arith.constant 2 : i32
    %624 = tpu.dynamic_rotate %614 by %c2_i32_116 dim 1 : vector<16x128xf32>, i32 -> vector<16x128xf32>
    %c126_i32_117 = arith.constant 126 : i32
    %625 = tpu.dynamic_rotate %614 by %c126_i32_117 dim 1 : vector<16x128xf32>, i32 -> vector<16x128xf32>
    %626 = vector.shape_cast %42 : vector<1x128xi1> to vector<1x128xi1>
    %627 = vector.broadcast %626 : vector<1x128xi1> to vector<16x128xi1>
    %628 = arith.select %627, %624, %625 : vector<16x128xi1>, vector<16x128xf32>
    %629 = vector.broadcast %615 : vector<1x1xf32> to vector<16x128xf32>
    %630 = arith.mulf %629, %609 : vector<16x128xf32>
    %631 = vector.broadcast %618 : vector<1x128xf32> to vector<16x128xf32>
    %632 = arith.mulf %631, %623 : vector<16x128xf32>
    %633 = arith.addf %630, %632 : vector<16x128xf32>
    %634 = vector.broadcast %615 : vector<1x1xf32> to vector<16x128xf32>
    %635 = arith.mulf %634, %614 : vector<16x128xf32>
    %636 = vector.broadcast %618 : vector<1x128xf32> to vector<16x128xf32>
    %637 = arith.mulf %636, %628 : vector<16x128xf32>
    %638 = arith.addf %635, %637 : vector<16x128xf32>
    %639 = vector.extract_strided_slice %13 {offsets = [2, 1], sizes = [1, 1], strides = [1, 1]} : vector<7x2xf32> to vector<1x1xf32>
    %640 = vector.extract_strided_slice %17 {offsets = [2, 1], sizes = [1, 1], strides = [1, 1]} : vector<7x2xf32> to vector<1x1xf32>
    %641 = vector.broadcast %640 : vector<1x1xf32> to vector<1x128xf32>
    %642 = arith.mulf %20, %641 : vector<1x128xf32>
    %c4_i32_118 = arith.constant 4 : i32
    %643 = tpu.dynamic_rotate %633 by %c4_i32_118 dim 1 : vector<16x128xf32>, i32 -> vector<16x128xf32>
    %c124_i32_119 = arith.constant 124 : i32
    %644 = tpu.dynamic_rotate %633 by %c124_i32_119 dim 1 : vector<16x128xf32>, i32 -> vector<16x128xf32>
    %645 = vector.shape_cast %47 : vector<1x128xi1> to vector<1x128xi1>
    %646 = vector.broadcast %645 : vector<1x128xi1> to vector<16x128xi1>
    %647 = arith.select %646, %643, %644 : vector<16x128xi1>, vector<16x128xf32>
    %c4_i32_120 = arith.constant 4 : i32
    %648 = tpu.dynamic_rotate %638 by %c4_i32_120 dim 1 : vector<16x128xf32>, i32 -> vector<16x128xf32>
    %c124_i32_121 = arith.constant 124 : i32
    %649 = tpu.dynamic_rotate %638 by %c124_i32_121 dim 1 : vector<16x128xf32>, i32 -> vector<16x128xf32>
    %650 = vector.shape_cast %47 : vector<1x128xi1> to vector<1x128xi1>
    %651 = vector.broadcast %650 : vector<1x128xi1> to vector<16x128xi1>
    %652 = arith.select %651, %648, %649 : vector<16x128xi1>, vector<16x128xf32>
    %653 = vector.broadcast %639 : vector<1x1xf32> to vector<16x128xf32>
    %654 = arith.mulf %653, %633 : vector<16x128xf32>
    %655 = vector.broadcast %642 : vector<1x128xf32> to vector<16x128xf32>
    %656 = arith.mulf %655, %647 : vector<16x128xf32>
    %657 = arith.addf %654, %656 : vector<16x128xf32>
    %658 = vector.broadcast %639 : vector<1x1xf32> to vector<16x128xf32>
    %659 = arith.mulf %658, %638 : vector<16x128xf32>
    %660 = vector.broadcast %642 : vector<1x128xf32> to vector<16x128xf32>
    %661 = arith.mulf %660, %652 : vector<16x128xf32>
    %662 = arith.addf %659, %661 : vector<16x128xf32>
    %663 = vector.extract_strided_slice %13 {offsets = [3, 1], sizes = [1, 1], strides = [1, 1]} : vector<7x2xf32> to vector<1x1xf32>
    %664 = vector.extract_strided_slice %17 {offsets = [3, 1], sizes = [1, 1], strides = [1, 1]} : vector<7x2xf32> to vector<1x1xf32>
    %665 = vector.broadcast %664 : vector<1x1xf32> to vector<1x128xf32>
    %666 = arith.mulf %21, %665 : vector<1x128xf32>
    %c8_i32_122 = arith.constant 8 : i32
    %667 = tpu.dynamic_rotate %657 by %c8_i32_122 dim 1 : vector<16x128xf32>, i32 -> vector<16x128xf32>
    %c120_i32_123 = arith.constant 120 : i32
    %668 = tpu.dynamic_rotate %657 by %c120_i32_123 dim 1 : vector<16x128xf32>, i32 -> vector<16x128xf32>
    %669 = vector.shape_cast %52 : vector<1x128xi1> to vector<1x128xi1>
    %670 = vector.broadcast %669 : vector<1x128xi1> to vector<16x128xi1>
    %671 = arith.select %670, %667, %668 : vector<16x128xi1>, vector<16x128xf32>
    %c8_i32_124 = arith.constant 8 : i32
    %672 = tpu.dynamic_rotate %662 by %c8_i32_124 dim 1 : vector<16x128xf32>, i32 -> vector<16x128xf32>
    %c120_i32_125 = arith.constant 120 : i32
    %673 = tpu.dynamic_rotate %662 by %c120_i32_125 dim 1 : vector<16x128xf32>, i32 -> vector<16x128xf32>
    %674 = vector.shape_cast %52 : vector<1x128xi1> to vector<1x128xi1>
    %675 = vector.broadcast %674 : vector<1x128xi1> to vector<16x128xi1>
    %676 = arith.select %675, %672, %673 : vector<16x128xi1>, vector<16x128xf32>
    %677 = vector.broadcast %663 : vector<1x1xf32> to vector<16x128xf32>
    %678 = arith.mulf %677, %657 : vector<16x128xf32>
    %679 = vector.broadcast %666 : vector<1x128xf32> to vector<16x128xf32>
    %680 = arith.mulf %679, %671 : vector<16x128xf32>
    %681 = arith.addf %678, %680 : vector<16x128xf32>
    %682 = vector.broadcast %663 : vector<1x1xf32> to vector<16x128xf32>
    %683 = arith.mulf %682, %662 : vector<16x128xf32>
    %684 = vector.broadcast %666 : vector<1x128xf32> to vector<16x128xf32>
    %685 = arith.mulf %684, %676 : vector<16x128xf32>
    %686 = arith.addf %683, %685 : vector<16x128xf32>
    %687 = vector.extract_strided_slice %13 {offsets = [4, 1], sizes = [1, 1], strides = [1, 1]} : vector<7x2xf32> to vector<1x1xf32>
    %688 = vector.extract_strided_slice %17 {offsets = [4, 1], sizes = [1, 1], strides = [1, 1]} : vector<7x2xf32> to vector<1x1xf32>
    %689 = vector.broadcast %688 : vector<1x1xf32> to vector<1x128xf32>
    %690 = arith.mulf %22, %689 : vector<1x128xf32>
    %c16_i32_126 = arith.constant 16 : i32
    %691 = tpu.dynamic_rotate %681 by %c16_i32_126 dim 1 : vector<16x128xf32>, i32 -> vector<16x128xf32>
    %c112_i32_127 = arith.constant 112 : i32
    %692 = tpu.dynamic_rotate %681 by %c112_i32_127 dim 1 : vector<16x128xf32>, i32 -> vector<16x128xf32>
    %693 = vector.shape_cast %57 : vector<1x128xi1> to vector<1x128xi1>
    %694 = vector.broadcast %693 : vector<1x128xi1> to vector<16x128xi1>
    %695 = arith.select %694, %691, %692 : vector<16x128xi1>, vector<16x128xf32>
    %c16_i32_128 = arith.constant 16 : i32
    %696 = tpu.dynamic_rotate %686 by %c16_i32_128 dim 1 : vector<16x128xf32>, i32 -> vector<16x128xf32>
    %c112_i32_129 = arith.constant 112 : i32
    %697 = tpu.dynamic_rotate %686 by %c112_i32_129 dim 1 : vector<16x128xf32>, i32 -> vector<16x128xf32>
    %698 = vector.shape_cast %57 : vector<1x128xi1> to vector<1x128xi1>
    %699 = vector.broadcast %698 : vector<1x128xi1> to vector<16x128xi1>
    %700 = arith.select %699, %696, %697 : vector<16x128xi1>, vector<16x128xf32>
    %701 = vector.broadcast %687 : vector<1x1xf32> to vector<16x128xf32>
    %702 = arith.mulf %701, %681 : vector<16x128xf32>
    %703 = vector.broadcast %690 : vector<1x128xf32> to vector<16x128xf32>
    %704 = arith.mulf %703, %695 : vector<16x128xf32>
    %705 = arith.addf %702, %704 : vector<16x128xf32>
    %706 = vector.broadcast %687 : vector<1x1xf32> to vector<16x128xf32>
    %707 = arith.mulf %706, %686 : vector<16x128xf32>
    %708 = vector.broadcast %690 : vector<1x128xf32> to vector<16x128xf32>
    %709 = arith.mulf %708, %700 : vector<16x128xf32>
    %710 = arith.addf %707, %709 : vector<16x128xf32>
    %711 = vector.extract_strided_slice %13 {offsets = [5, 1], sizes = [1, 1], strides = [1, 1]} : vector<7x2xf32> to vector<1x1xf32>
    %712 = vector.extract_strided_slice %17 {offsets = [5, 1], sizes = [1, 1], strides = [1, 1]} : vector<7x2xf32> to vector<1x1xf32>
    %713 = vector.broadcast %712 : vector<1x1xf32> to vector<1x128xf32>
    %714 = arith.mulf %23, %713 : vector<1x128xf32>
    %c32_i32_130 = arith.constant 32 : i32
    %715 = tpu.dynamic_rotate %705 by %c32_i32_130 dim 1 : vector<16x128xf32>, i32 -> vector<16x128xf32>
    %c96_i32_131 = arith.constant 96 : i32
    %716 = tpu.dynamic_rotate %705 by %c96_i32_131 dim 1 : vector<16x128xf32>, i32 -> vector<16x128xf32>
    %717 = vector.shape_cast %62 : vector<1x128xi1> to vector<1x128xi1>
    %718 = vector.broadcast %717 : vector<1x128xi1> to vector<16x128xi1>
    %719 = arith.select %718, %715, %716 : vector<16x128xi1>, vector<16x128xf32>
    %c32_i32_132 = arith.constant 32 : i32
    %720 = tpu.dynamic_rotate %710 by %c32_i32_132 dim 1 : vector<16x128xf32>, i32 -> vector<16x128xf32>
    %c96_i32_133 = arith.constant 96 : i32
    %721 = tpu.dynamic_rotate %710 by %c96_i32_133 dim 1 : vector<16x128xf32>, i32 -> vector<16x128xf32>
    %722 = vector.shape_cast %62 : vector<1x128xi1> to vector<1x128xi1>
    %723 = vector.broadcast %722 : vector<1x128xi1> to vector<16x128xi1>
    %724 = arith.select %723, %720, %721 : vector<16x128xi1>, vector<16x128xf32>
    %725 = vector.broadcast %711 : vector<1x1xf32> to vector<16x128xf32>
    %726 = arith.mulf %725, %705 : vector<16x128xf32>
    %727 = vector.broadcast %714 : vector<1x128xf32> to vector<16x128xf32>
    %728 = arith.mulf %727, %719 : vector<16x128xf32>
    %729 = arith.addf %726, %728 : vector<16x128xf32>
    %730 = vector.broadcast %711 : vector<1x1xf32> to vector<16x128xf32>
    %731 = arith.mulf %730, %710 : vector<16x128xf32>
    %732 = vector.broadcast %714 : vector<1x128xf32> to vector<16x128xf32>
    %733 = arith.mulf %732, %724 : vector<16x128xf32>
    %734 = arith.addf %731, %733 : vector<16x128xf32>
    %735 = vector.extract_strided_slice %13 {offsets = [6, 1], sizes = [1, 1], strides = [1, 1]} : vector<7x2xf32> to vector<1x1xf32>
    %736 = vector.extract_strided_slice %17 {offsets = [6, 1], sizes = [1, 1], strides = [1, 1]} : vector<7x2xf32> to vector<1x1xf32>
    %737 = vector.broadcast %736 : vector<1x1xf32> to vector<1x128xf32>
    %738 = arith.mulf %24, %737 : vector<1x128xf32>
    %c64_i32_134 = arith.constant 64 : i32
    %739 = tpu.dynamic_rotate %729 by %c64_i32_134 dim 1 : vector<16x128xf32>, i32 -> vector<16x128xf32>
    %c64_i32_135 = arith.constant 64 : i32
    %740 = tpu.dynamic_rotate %734 by %c64_i32_135 dim 1 : vector<16x128xf32>, i32 -> vector<16x128xf32>
    %741 = vector.broadcast %735 : vector<1x1xf32> to vector<16x128xf32>
    %742 = arith.mulf %741, %729 : vector<16x128xf32>
    %743 = vector.broadcast %738 : vector<1x128xf32> to vector<16x128xf32>
    %744 = arith.mulf %743, %739 : vector<16x128xf32>
    %745 = arith.addf %742, %744 : vector<16x128xf32>
    %746 = vector.broadcast %735 : vector<1x1xf32> to vector<16x128xf32>
    %747 = arith.mulf %746, %734 : vector<16x128xf32>
    %748 = vector.broadcast %738 : vector<1x128xf32> to vector<16x128xf32>
    %749 = arith.mulf %748, %740 : vector<16x128xf32>
    %750 = arith.addf %747, %749 : vector<16x128xf32>
    %751 = vector.extract_strided_slice %745 {offsets = [0, 0], sizes = [8, 128], strides = [1, 1]} : vector<16x128xf32> to vector<8x128xf32>
    %752 = vector.extract_strided_slice %750 {offsets = [0, 0], sizes = [8, 128], strides = [1, 1]} : vector<16x128xf32> to vector<8x128xf32>
    %753 = vector.extract_strided_slice %745 {offsets = [8, 0], sizes = [8, 128], strides = [1, 1]} : vector<16x128xf32> to vector<8x128xf32>
    %754 = vector.extract_strided_slice %750 {offsets = [8, 0], sizes = [8, 128], strides = [1, 1]} : vector<16x128xf32> to vector<8x128xf32>
    %755 = arith.mulf %751, %753 : vector<8x128xf32>
    %756 = arith.mulf %752, %754 : vector<8x128xf32>
    %757 = arith.addf %755, %756 : vector<8x128xf32>
    %cst_136 = arith.constant dense<0.000000e+00> : vector<8xf32>
    %758 = vector.multi_reduction <add>, %757, %cst_136 [1] : vector<8x128xf32> to vector<8xf32>
    %759 = vector.shape_cast %758 : vector<8xf32> to vector<8x1xf32>
    %760 = arith.mulf %752, %753 : vector<8x128xf32>
    %761 = arith.mulf %751, %754 : vector<8x128xf32>
    %762 = arith.subf %760, %761 : vector<8x128xf32>
    %cst_137 = arith.constant dense<0.000000e+00> : vector<8xf32>
    %763 = vector.multi_reduction <add>, %762, %cst_137 [1] : vector<8x128xf32> to vector<8xf32>
    %764 = vector.shape_cast %763 : vector<8xf32> to vector<8x1xf32>
    %765 = arith.mulf %759, %759 : vector<8x1xf32>
    %766 = arith.mulf %764, %764 : vector<8x1xf32>
    %767 = arith.addf %765, %766 : vector<8x1xf32>
    %c0_138 = arith.constant 0 : index
    %c0_139 = arith.constant 0 : index
    %768 = vector.load %arg7[%c0_138, %c0_139] : memref<8x1xf32, #tpu.memory_space<vmem>>, vector<8x1xf32>
    tpu.vector_store %arg7[%c0_138, %c0_139], %767 {strides = array<i32>} : memref<8x1xf32, #tpu.memory_space<vmem>>, vector<8x1xf32>,
    return
  }
  func.func @transform_0(%arg0: i32) -> (i32, i32) {
    %c0_i32 = arith.constant 0 : i32
    %c0_i32_0 = arith.constant 0 : i32
    return %arg0, %c0_i32 : i32, i32
  }
  func.func @transform_1(%arg0: i32) -> (i32, i32) {
    %c0_i32 = arith.constant 0 : i32
    %c0_i32_0 = arith.constant 0 : i32
    return %arg0, %c0_i32 : i32, i32
  }
  func.func @transform_2(%arg0: i32) -> (i32, i32) {
    %c0_i32 = arith.constant 0 : i32
    %c0_i32_0 = arith.constant 0 : i32
    %c0_i32_1 = arith.constant 0 : i32
    return %c0_i32, %c0_i32_0 : i32, i32
  }
  func.func @transform_3(%arg0: i32) -> (i32, i32) {
    %c0_i32 = arith.constant 0 : i32
    %c0_i32_0 = arith.constant 0 : i32
    %c0_i32_1 = arith.constant 0 : i32
    return %c0_i32, %c0_i32_0 : i32, i32
  }
  func.func @transform_4(%arg0: i32) -> (i32, i32) {
    %c0_i32 = arith.constant 0 : i32
    %c0_i32_0 = arith.constant 0 : i32
    %c0_i32_1 = arith.constant 0 : i32
    return %c0_i32, %c0_i32_0 : i32, i32
  }
  func.func @transform_5(%arg0: i32) -> (i32, i32) {
    %c0_i32 = arith.constant 0 : i32
    %c0_i32_0 = arith.constant 0 : i32
    %c0_i32_1 = arith.constant 0 : i32
    return %c0_i32, %c0_i32_0 : i32, i32
  }
  func.func @transform_6(%arg0: i32) -> (i32, i32) {
    %c0_i32 = arith.constant 0 : i32
    %c0_i32_0 = arith.constant 0 : i32
    return %arg0, %c0_i32 : i32, i32
  }
}

</mosaic_0001>

<bundles_post_ra>
// kernel: tpu_custom_call.1
= control target key start
LH: loop header
LB: loop body
LE: loop exit
PB: predicated region body
PF: predicated region fallthrough
CT: control target
= control target key end

     0   :  { %v2578_v0 = vmov 0   ;;  %v3876_v27 = vmov 683565275   ;;  %v3874_v29 = vmov 2475754826   ;;  %s2589_s25 = smov 2   ;;  %s3861_s0 = inlined_call_operand.vmem [shape: f32[8,7], index: 0, kind: input, shape index: {}]   ;;  %s3862_s1 = inlined_call_operand.vmem [shape: f32[8,7], index: 1, kind: input, shape index: {}]   ;;  %s3863_s2 = inlined_call_operand.vmem [shape: f32[6,2], index: 2, kind: input, shape index: {}]   ;;  %s3864_s3 = inlined_call_operand.vmem [shape: f32[7,2], index: 3, kind: input, shape index: {}]   ;;  %s3865_s4 = inlined_call_operand.vmem [shape: f32[6,128], index: 4, kind: input, shape index: {}]   ;;  %s3866_s5 = inlined_call_operand.vmem [shape: f32[7,128], index: 5, kind: input, shape index: {}]   ;;  %s3867_s6 = inlined_call_operand.vmem [shape: f32[8,1], index: 6, kind: output, shape index: {}]  }
   0x1   :  { %2523 = vset.pattern.permute.xlu1 %v2578_v0  ;;  %2522 = vset.pattern.permute.xlu0 %v2578_v0  ;;  %v23_v1 = vld [vmem:[%s3861_s0] sm:$0xff]  ;;  %v3868_v31 = vmov 2131351028   ;;  %v3888_v33 = vmov 2102212464   ;;  %s2586_s0 = smov 1  }
   0x2   :  { %v24_v2 = vld [vmem:[%s3862_s1] sm:$0xff]  ;;  %v2648_v3 = vmul.f32 0.5, %v23_v1  ;;  %v3895_v35 = vmov 920167782   ;;  %v3878_v43 = vmov 1326507024  }
   0x3   :  { %v2650_v4 = vmul.f32 0.5, %v24_v2  ;;  %s2588_s1 = smov 127   ;;  %s2591_s26 = smov 126  }
   0x4   :  { %v27_v5 = vand.u32 2147483647, %v2648_v3  ;;  %v30_v6 = vand.u32 2139095040, %v2648_v3  ;;  %vm29_vm14 = vcmp.lt.s32.totalorder %v2648_v3, 0  ;;  %s2592_s27 = smov 4   ;;  %s2594_s28 = smov 124  }
   0x5   :  { %v130_v7 = vand.u32 2147483647, %v2650_v4  ;;  %v133_v8 = vand.u32 2139095040, %v2650_v4  ;;  %s2595_s29 = smov 8   ;;  %s2597_s30 = smov 120  }
   0x6   :  { %v31_v9 = vshrl.u32 %v30_v6, 23  ;;  %v34_v10 = vand.u32 8388607, %v27_v5  ;;  %vm28_vm15 = vcmp.le.f32.partialorder %v27_v5, 0.7853982  ;;  %s2598_s7 = smov 16  }
   0x7   :  { %v134_v11 = vshrl.u32 %v133_v8, 23  ;;  %v137_v12 = vand.u32 8388607, %v130_v7  ;;  %s2600_s8 = smov 112   ;;  %s2604_s9 = smov 64  }
   0x8   :  { %v2406_v13 = vadd.s32 4294967169, %v31_v9  ;;  %v35_v16 = vor.u32 8388608, %v34_v10 }
   0x9   :  { %v2410_v14 = vadd.s32 4294967169, %v134_v11  ;;  %v138_v17 = vor.u32 8388608, %v137_v12 }
   0xa   :  { %v37_v15 = vadd.s32 1, %v2406_v13  ;;  %v2660_v23 = vshll.u32 %v35_v16, 8 }
   0xb   :  { %v140_v18 = vadd.s32 1, %v2410_v14  ;;  %v2662_v25 = vshll.u32 %v138_v17, 8 }
   0xc   :  { %vm38_vm0 = vcmp.gt.s32.totalorder %v37_v15, 0 }
   0xd   :  { %v39_v19 = vsel %vm38_vm0, %v37_v15, 0  ;;  %vm141_vm1 = vcmp.gt.s32.totalorder %v140_v18, 0  ;;  %vm132_vm0 = vcmp.lt.s32.totalorder %v2650_v4, 0 }
   0xe   :  { %v40_v20 = vshrl.u32 %v39_v19, 5  ;;  %v41_v21 = vand.u32 31, %v39_v19  ;;  %v142_v22 = vsel %vm141_vm1, %v140_v18, 0  ;;  %vm131_vm1 = vcmp.le.f32.partialorder %v130_v7, 0.7853982 }
   0xf   :  { %v144_v24 = vand.u32 31, %v142_v22  ;;  %v2669_v37 = vshrl.u32 %v142_v22, 5 }
  0x10   :  { %v42_v26 = vsub.s32 32, %v41_v21  ;;  %v44_v28 = vshll.u32 %v3876_v27, %v41_v21  ;;  %v47_v30 = vshll.u32 %v3874_v29, %v41_v21  ;;  %v50_v32 = vshll.u32 %v3868_v31, %v41_v21 }
  0x11   :  { %v53_v34 = vshll.u32 %v3888_v33, %v41_v21  ;;  %v56_v36 = vshll.u32 %v3895_v35, %v41_v21  ;;  %vm59_vm2 = vcmp.lt.s32.totalorder %v40_v20, 1  ;;  %vm60_vm3 = vcmp.lt.s32.totalorder %v40_v20, 2 }
  0x12   :  { %v43_v38 = vshrl.u32 %v3876_v27, %v42_v26  ;;  %v45_v39 = vshrl.u32 %v3874_v29, %v42_v26  ;;  %v48_v40 = vshrl.u32 %v3868_v31, %v42_v26  ;;  %v51_v41 = vshrl.u32 %v3888_v33, %v42_v26 }
  0x13   :  { %v54_v42 = vshrl.u32 %v3895_v35, %v42_v26  ;;  %v57_v44 = vshrl.u32 %v3878_v43, %v42_v26  ;;  %vm62_vm4 = vcmp.lt.s32.totalorder %v40_v20, 4  ;;  %v145_v48 = vsub.s32 32, %v144_v24 }
  0x14   :  { %v46_v45 = vor.u32 %v45_v39, %v44_v28  ;;  %v49_v46 = vor.u32 %v48_v40, %v47_v30  ;;  %v52_v47 = vor.u32 %v51_v41, %v50_v32  ;;  %vm61_vm5 = vcmp.lt.s32.totalorder %v40_v20, 3 }
  0x15   :  { %v55_v49 = vor.u32 %v54_v42, %v53_v34  ;;  %v58_v50 = vor.u32 %v57_v44, %v56_v36  ;;  %v147_v51 = vshll.u32 %v3876_v27, %v144_v24  ;;  %v150_v59 = vshll.u32 %v3874_v29, %v144_v24 }
  0x16   :  { %v63_v52 = vsel %vm59_vm2, %v43_v38, %v46_v45  ;;  %v64_v53 = vsel %vm62_vm4, %v52_v47, 2102212464  ;;  %v67_v54 = vsel %vm59_vm2, %v46_v45, %v49_v46  ;;  %v71_v55 = vsel %vm59_vm2, %v49_v46, %v52_v47 }
  0x17   :  { %v65_v56 = vsel %vm61_vm5, %v49_v46, %v64_v53  ;;  %v68_v57 = vsel %vm62_vm4, %v55_v49, 920167782  ;;  %v72_v58 = vsel %vm62_vm4, %v58_v50, 1326507024  ;;  %v146_v62 = vshrl.u32 %v3876_v27, %v145_v48 }
  0x18   :  { %v69_v60 = vsel %vm61_vm5, %v52_v47, %v68_v57  ;;  %v73_v61 = vsel %vm61_vm5, %v55_v49, %v72_v58  ;;  %v148_v63 = vshrl.u32 %v3874_v29, %v145_v48  ;;  %v66_v1 = vsel %vm60_vm3, %v63_v52, %v65_v56 }
  0x19   :  { %v70_v2 = vsel %vm60_vm3, %v67_v54, %v69_v60  ;;  %v74_v6 = vsel %vm60_vm3, %v71_v55, %v73_v61  ;;  %v151_v8 = vshrl.u32 %v3868_v31, %v145_v48  ;;  %v153_v15 = vshll.u32 %v3868_v31, %v144_v24 }
  0x1a   :  { %v2689_v9 = vmul.u32.u64.low %v2660_v23, %v74_v6  ;;  %v2690_v10 = vmul.u32.u64.high %v2660_v23, %v74_v6, %v2689_v9  ;;  %v2693_v11 = vmul.u32.u64.low %v2660_v23, %v70_v2  ;;  %v2694_v12 = vmul.u32.u64.high %v2660_v23, %v70_v2, %v2693_v11 }
  0x1b   :  { %v149_v13 = vor.u32 %v148_v63, %v147_v51  ;;  %v152_v14 = vor.u32 %v151_v8, %v150_v59  ;;  %v154_v16 = vshrl.u32 %v3888_v33, %v145_v48  ;;  %v156_v17 = vshll.u32 %v3888_v33, %v144_v24 }
  0x1c   :  { %v157_v18 = vshrl.u32 %v3895_v35, %v145_v48  ;;  %v159_v19 = vshll.u32 %v3895_v35, %v144_v24  ;;  %v160_v20 = vshrl.u32 %v3878_v43, %v145_v48  ;;  %v82_v21 = vmul.u32 %v2660_v23, %v66_v1 }
  0x1d   :  { %v155_v22 = vor.u32 %v154_v16, %v153_v15  ;;  %vm162_vm6 = vcmp.lt.s32.totalorder %v2669_v37, 1  ;;  %vm163_vm7 = vcmp.lt.s32.totalorder %v2669_v37, 2  ;;  %vm84_vm8 = vc.u32 %v2690_v10, %v2693_v11 }
  0x1e   :  { %v85_v26 = vadd.s32 1, %v2694_v12  ;;  %v158_v28 = vor.u32 %v157_v18, %v156_v17  ;;  %vm164_vm9 = vcmp.lt.s32.totalorder %v2669_v37, 3  ;;  %v161_v30 = vor.u32 %v160_v20, %v159_v19 }
  0x1f   :  { %vm165_vm10 = vcmp.lt.s32.totalorder %v2669_v37, 4  ;;  %v166_v24 = vsel %vm162_vm6, %v146_v62, %v149_v13  ;;  %v170_v32 = vsel %vm162_vm6, %v149_v13, %v152_v14  ;;  %v174_v38 = vsel %vm162_vm6, %v152_v14, %v155_v22 }
  0x20   :  { %v86_v34 = vsel %vm84_vm8, %v85_v26, %v2694_v12  ;;  %v167_v23 = vsel %vm165_vm10, %v155_v22, 2102212464  ;;  %v171_v36 = vsel %vm165_vm10, %v158_v28, 920167782  ;;  %v175_v42 = vsel %vm165_vm10, %v161_v30, 1326507024 }
  0x21   :  { %v87_v39 = vadd.s32 %v86_v34, %v82_v21  ;;  %v168_v40 = vsel %vm164_vm9, %v152_v14, %v167_v23  ;;  %v172_v41 = vsel %vm164_vm9, %v155_v22, %v171_v36  ;;  %v176_v46 = vsel %vm164_vm9, %v158_v28, %v175_v42 }
  0x22   :  { %v169_v44 = vsel %vm163_vm7, %v166_v24, %v168_v40  ;;  %v173_v45 = vsel %vm163_vm7, %v170_v32, %v172_v41  ;;  %v177_v48 = vsel %vm163_vm7, %v174_v38, %v176_v46  ;;  %v83_v8 = vadd.s32 %v2693_v11, %v2690_v10 }
  0x23   :  { %v88_v47 = vadd.s32 536870912, %v87_v39  ;;  %v2717_v49 = vmul.u32.u64.low %v2662_v25, %v173_v45  ;;  %v2718_v50 = vmul.u32.u64.high %v2662_v25, %v173_v45, %v2717_v49  ;;  %v185_v54 = vmul.u32 %v2662_v25, %v169_v44 }
  0x24   :  { %v2721_v51 = vmul.u32.u64.low %v2662_v25, %v177_v48  ;;  %v2722_v52 = vmul.u32.u64.high %v2662_v25, %v177_v48, %v2721_v51  ;;  %vm119_vm8 = vweird.f32 %v2648_v3 }
  0x25   :  { %v89_v53 = vshrl.u32 %v88_v47, 30  ;;  %v188_v56 = vadd.s32 1, %v2718_v50 }
  0x26   :  { %vm187_vm11 = vc.u32 %v2722_v52, %v2717_v49  ;;  %v186_v28 = vadd.s32 %v2717_v49, %v2722_v52 }
  0x27   :  { %v90_v55 = vshll.u32 %v89_v53, 30  ;;  %v189_v37 = vsel %vm187_vm11, %v188_v56, %v2718_v50  ;;  %v113_v10 = vsub.s32 4, %v89_v53 }
  0x28   :  { %v190_v58 = vadd.s32 %v189_v37, %v185_v54 }
  0x29   :  { %v91_v57 = vsub.s32 %v87_v39, %v90_v55  ;;  %v114_v40 = vsel %vm29_vm14, %v113_v10, %v89_v53 }
  0x2a   :  { %v191_v60 = vadd.s32 536870912, %v190_v58  ;;  %v116_v46 = vsel %vm28_vm15, 0, %v114_v40 }
  0x2b   :  { %v93_v59 = vsub.s32 0, %v91_v57  ;;  %v326_v51 = vadd.s32 3, %v116_v46  ;;  %v120_v55 = vand.u32 3, %v116_v46 }
  0x2c   :  { %v192_v62 = vshrl.u32 %v191_v60, 30 }
  0x2d   :  { %v2407_v61 = vmin.u32 %v93_v59, %v91_v57  ;;  %v327_v54 = vand.u32 3, %v326_v51  ;;  %vm125_vm3 = vcmp.eq.s32.totalorder %v120_v55, 2  ;;  %vm122_vm5 = vcmp.eq.s32.totalorder %v120_v55, 0 }
  0x2e   :  { %v193_v1 = vshll.u32 %v192_v62, 30  ;;  %v216_v50 = vsub.s32 4, %v192_v62  ;;  %vm121_vm7 = vcmp.lt.s32.totalorder %v120_v55, 2 }
  0x2f   :  { %v95_v63 = vclz %v2407_v61  ;;  %vm332_vm2 = vcmp.eq.s32.totalorder %v327_v54, 2  ;;  %vm329_vm4 = vcmp.eq.s32.totalorder %v327_v54, 0  ;;  %vm328_vm6 = vcmp.lt.s32.totalorder %v327_v54, 2 }
  0x30   :  { %v194_v6 = vsub.s32 %v190_v58, %v193_v1  ;;  %v217_v53 = vsel %vm132_vm0, %v216_v50, %v192_v62 }
  0x31   :  { %v2408_v2 = vadd.s32 4294967294, %v95_v63  ;;  %v219_v37 = vsel %vm131_vm1, 0, %v217_v53 }
  0x32   :  { %v196_v9 = vsub.s32 0, %v194_v6  ;;  %v430_v61 = vadd.s32 3, %v219_v37 }
  0x33   :  { %vm2409_vm12 = vcmp.lt.s32.totalorder %v2408_v2, 0 }
  0x34   :  { %v98_v25 = vsel %vm2409_vm12, 0, %v2408_v2  ;;  %v2411_v15 = vmin.u32 %v196_v9, %v194_v6  ;;  %v223_v9 = vand.u32 3, %v219_v37 }
  0x35   :  { %v99_v12 = vsub.s32 32, %v98_v25  ;;  %v100_v13 = vshll.u32 %v91_v57, %v98_v25  ;;  %v103_v14 = vsub.s32 4294967266, %v98_v25  ;;  %v431_v25 = vand.u32 3, %v430_v61 }
  0x36   :  { %v198_v18 = vclz %v2411_v15  ;;  %vm228_vm10 = vcmp.eq.s32.totalorder %v223_v9, 2  ;;  %vm225_vm12 = vcmp.eq.s32.totalorder %v223_v9, 0 }
  0x37   :  { %v101_v16 = vshrl.u32 %v83_v8, %v99_v12  ;;  %v104_v17 = vadd.s32 127, %v103_v14  ;;  %v665_v14 = vlaneseq  ;;  %vm436_vm9 = vcmp.eq.s32.totalorder %v431_v25, 2 }
  0x38   :  { %v2412_v21 = vadd.s32 4294967294, %v198_v18  ;;  %vm433_vm11 = vcmp.eq.s32.totalorder %v431_v25, 0 }
  0x39   :  { %v102_v19 = vor.u32 %v101_v16, %v100_v13  ;;  %v105_v20 = vshll.u32 %v104_v17, 23  ;;  %v2745_v17 = vand.u32 127, %v665_v14  ;;  %v707_v40 = vshrl.u32 %v665_v14, 7 }
  0x3a   :  { %vm2413_vm13 = vcmp.lt.s32.totalorder %v2412_v21, 0 }
  0x3b   :  { %v106_v22 = vor.u32 4788187, %v105_v20  ;;  %v109_v26 = vcvt.s32.f32 %v102_v19  ;;  %v201_v11 = vsel %vm2413_vm13, 0, %v2412_v21  ;;  %vm432_vm13 = vcmp.lt.s32.totalorder %v431_v25, 2 }
  0x3c   :  { %v202_v24 = vsub.s32 32, %v201_v11  ;;  %v203_v32 = vshll.u32 %v194_v6, %v201_v11  ;;  %v206_v34 = vsub.s32 4294967266, %v201_v11  ;;  %v2585_v11 = vmov 0.0  }
  0x3d   :  { %v107_v30 = vand.u32 2147483647, %v106_v22 }
  0x3e   :  { %v204_v36 = vshrl.u32 %v186_v28, %v202_v24  ;;  %v207_v38 = vadd.s32 127, %v206_v34  ;;  %v3873_v34 = vmov 1  }
  0x3f   :  { %v110_v23 = vmul.f32 %v109_v26, %v107_v30 }
  0x40   :  { %v205_v41 = vor.u32 %v204_v36, %v203_v32  ;;  %v208_v42 = vshll.u32 %v207_v38, 23 }
  0x41   :  { %v111_v39 = vxor.u32 2147483648, %v110_v23 }
  0x42   :  { %v209_v47 = vor.u32 4788187, %v208_v42  ;;  %v212_v48 = vcvt.s32.f32 %v205_v41 }
  0x43   :  { %v112_v44 = vsel %vm29_vm14, %v111_v39, %v110_v23  ;;  %vm224_vm14 = vcmp.lt.s32.totalorder %v223_v9, 2  ;;  %v2590_v23 = vmov 2   ;;  %v668_v39 = vxor.u32 1, %v2745_v17 }
  0x44   :  { %v115_v45 = vsel %vm28_vm15, %v2648_v3, %v112_v44  ;;  %v210_v49 = vand.u32 2147483647, %v209_v47  ;;  %vm222_vm15 = vweird.f32 %v2650_v4 }
  0x45   :  { %2550 = vcosq.f32 %v115_v45  ;;  %v669_v44 = vcvt.s32.f32 %v668_v39 }
  0x46   :  { %2552 = vsinq.f32 %v115_v45  ;;  %v213_v52 = vmul.f32 %v212_v48, %v210_v49  ;;  %v2779_v45 = vsub.s32 0, %v707_v40 }
  0x48   :  { %v214_v5 = vxor.u32 2147483648, %v213_v52 }
  0x4a   :  { %v215_v56 = vsel %vm132_vm0, %v214_v5, %v213_v52  ;;  %vm698_vm0 = vcmp.eq.s32.totalorder %v2745_v17, 0 }
  0x4b   :  { %v218_v57 = vsel %vm131_vm1, %v2650_v4, %v215_v56  ;;  %v2430_v24 = vsel %vm698_vm0, 1.0, %v2585_v11  ;;  %v2756_v4 = vcvt.s32.f32 %v2745_v17 }
  0x4c   :  { %2554 = vcosq.f32 %v218_v57  ;;  %v2524_v32 = vpack.i.bf16 %v2585_v11, %v2430_v24 }
  0x4d   :  { %2556 = vsinq.f32 %v218_v57 }
  0x4f   :  { %v2551_v58 = vpop.eup %2550 }
  0x50   :  { %v2553_v59 = vpop.eup %2552  ;;  %v126_v60 = vxor.u32 2147483648, %v2551_v58 }
  0x51   :  { %v123_v63 = vxor.u32 2147483648, %v2553_v59 }
  0x52   :  { %v334_v7 = vsel %vm332_vm2, %v126_v60, %v2553_v59  ;;  %v127_v62 = vsel %vm125_vm3, %v126_v60, %v2553_v59 }
  0x53   :  { %v331_v1 = vsel %vm329_vm4, %v2551_v58, %v123_v63  ;;  %v124_v2 = vsel %vm122_vm5, %v2551_v58, %v123_v63 }
  0x54   :  { %v335_v6 = vsel %vm328_vm6, %v331_v1, %v334_v7  ;;  %v128_v8 = vsel %vm121_vm7, %v124_v2, %v127_v62 }
  0x55   :  { %v2739_v12 = vsel %vm119_vm8, nan, %v335_v6  ;;  %v2741_v13 = vsel %vm119_vm8, nan, %v128_v8  ;;  %v2593_v8 = vmov 3  }
  0x56   :  { %731 = vperm.xlu1 %2523, %v2739_v12   ;;  %719 = vperm.xlu0 %2522, %v2741_v13   ;;  %v2555_v15 = vpop.eup %2554 }
  0x57   :  { %v2557_v3 = vpop.eup %2556  ;;  %v229_v16 = vxor.u32 2147483648, %v2555_v15 }
  0x58   :  { %v226_v18 = vxor.u32 2147483648, %v2557_v3 }
  0x59   :  { %v438_v19 = vsel %vm436_vm9, %v229_v16, %v2557_v3  ;;  %v230_v20 = vsel %vm228_vm10, %v229_v16, %v2557_v3 }
  0x5a   :  { %v435_v21 = vsel %vm433_vm11, %v2555_v15, %v226_v18  ;;  %v227_v22 = vsel %vm225_vm12, %v2555_v15, %v226_v18  ;;  %v673_v15 = vxor.u32 2, %v2745_v17 }
  0x5b   :  { %v439_v26 = vsel %vm432_vm13, %v435_v21, %v438_v19  ;;  %v231_v28 = vsel %vm224_vm14, %v227_v22, %v230_v20 }
  0x5c   :  { %v2749_v30 = vsel %vm222_vm15, nan, %v439_v26  ;;  %v2751_v10 = vsel %vm222_vm15, nan, %v231_v28  ;;  %v674_v18 = vcvt.s32.f32 %v673_v15 }
  0x5d   :  { %736 = vperm.xlu1 %2523, %v2749_v30   ;;  %724 = vperm.xlu0 %2522, %v2751_v10  }
  0x61   :  { %670 = vrot.lane.b32.xlu0 %v2756_v4, %s2586_s0  ;;  %2525 = vrot.lane.b32.xlu1 %v2524_v32, %s2586_s0 }
  0x62   :  { %2534 = vset.pattern.permute.xlu1 %v3873_v34  ;;  %2535 = vset.pattern.permute.xlu0 %v3873_v34 }
  0x65   :  { %2530 = vrot.lane.b32.xlu0 %v2524_v32, %s2588_s1  ;;  %776 = vperm.xlu1 %2534, %v2741_v13  }
  0x69   :  { %675 = vrot.lane.b32.xlu0 %v2756_v4, %s2589_s25  ;;  %786 = vperm.xlu1 %2534, %v2739_v12  }
  0x6d   :  { %780 = vperm.xlu0 %2535, %v2751_v10   ;;  %790 = vperm.xlu1 %2534, %v2749_v30  }
  0x71   :  { %2536 = vset.pattern.permute.xlu1 %v2590_v23  ;;  %2537 = vset.pattern.permute.xlu0 %v2590_v23 }
  0xd5   :  { %v2770_v36 = vpop.permute.xlu1 %731  ;;  %v2772_v38 = vpop.permute.xlu0 %719 }
  0xd6   :  { %v727_v37 = vmul.f32 %v2430_v24, %v2772_v38  ;;  %v743_v1 = vmul.f32 0.0, %v2772_v38 }
  0xdc   :  { %v2775_v41 = vpop.permute.xlu1 %736  ;;  %v2777_v42 = vpop.permute.xlu0 %724 }
  0xdd   :  { %v728_v56 = vmul.f32 %v2430_v24, %v2777_v42  ;;  %v744_v62 = vmul.f32 0.0, %v2777_v42 }
  0xe0   :  { %v671_v46 = vpop.permute.xlu0 %670  ;;  %v2526_v47 = vpop.permute.xlu1 %2525 }
  0xe1   :  { %vm672_vm1 = vcmp.eq.f32.partialorder %v671_v46, %v669_v44  ;;  %v2528_v50 = vunpack.i.h.bf16 %v2526_v47  ;;  %v2527_v53 = vunpack.i.l.bf16 %v2526_v47 }
  0xe2   :  { %v705_v48 = vsel %vm672_vm1, 1, %v2578_v0 }
  0xe3   :  { %v709_v49 = vrot.slane %v705_v48, %v2779_v45 }
  0xe4   :  { %v2531_v51 = vpop.permute.xlu0 %2530  ;;  %v2813_v25 = vpop.permute.xlu1 %776 }
  0xe5   :  { %vm2783_vm2 = vcmp.eq.s32.totalorder %v709_v49, 1  ;;  %v2533_v5 = vunpack.i.h.bf16 %v2531_v51  ;;  %v2532_v54 = vunpack.i.l.bf16 %v2531_v51 }
  0xe7   :  { %v716_v55 = vsel %vm2783_vm2, %v2528_v50, %v2533_v5  ;;  %v711_v61 = vsel %vm2783_vm2, %v2527_v53, %v2532_v54 }
  0xe8   :  { %v740_v57 = vmul.f32 %v2775_v41, %v716_v55  ;;  %v739_v58 = vmul.f32 %v2770_v36, %v716_v55  ;;  %v746_v63 = vmul.f32 %v2775_v41, %v711_v61  ;;  %v745_v7 = vmul.f32 %v2770_v36, %v711_v61  ;;  %v676_v9 = vpop.permute.xlu0 %675  ;;  %v2815_v14 = vpop.permute.xlu1 %786 }
  0xe9   :  { %vm677_vm3 = vcmp.eq.f32.partialorder %v676_v9, %v674_v18 }
  0xea   :  { %v742_v59 = vadd.f32 %v740_v57, %v728_v56  ;;  %v741_v60 = vadd.f32 %v739_v58, %v727_v37  ;;  %v748_v2 = vsub.f32 %v744_v62, %v746_v63  ;;  %v747_v6 = vsub.f32 %v743_v1, %v745_v7 }
  0xeb   :  { %v757_v26 = vsel %vm677_vm3, 1, %v2578_v0  ;;  %v678_v7 = vxor.u32 4, %v2745_v17 }
  0xec   :  { %751 = vrot.lane.b32.xlu0 %v742_v59, %s2589_s25  ;;  %749 = vrot.lane.b32.xlu1 %v741_v60, %s2589_s25  ;;  %v2818_v3 = vpop.permute.xlu0 %780  ;;  %v2820_v16 = vpop.permute.xlu1 %790  ;;  %v761_v28 = vrot.slane %v757_v26, %v2779_v45  ;;  %v783_v49 = vmul.f32 %v2813_v25, %v741_v60  ;;  %v797_v57 = vmul.f32 %v2813_v25, %v747_v6 }
  0xed   :  { %v784_v48 = vmul.f32 %v2818_v3, %v742_v59  ;;  %v798_v56 = vmul.f32 %v2818_v3, %v748_v2 }
  0xee   :  { %vm2824_vm4 = vcmp.eq.s32.totalorder %v761_v28, 1 }
  0xf0   :  { %755 = vrot.lane.b32.xlu0 %v742_v59, %s2591_s26  ;;  %753 = vrot.lane.b32.xlu1 %v741_v60, %s2591_s26  ;;  %v2596_v59 = vmov 4  }
  0xf4   :  { %767 = vrot.lane.b32.xlu0 %v748_v2, %s2589_s25  ;;  %765 = vrot.lane.b32.xlu1 %v747_v6, %s2589_s25 }
  0xf8   :  { %771 = vrot.lane.b32.xlu0 %v748_v2, %s2591_s26  ;;  %769 = vrot.lane.b32.xlu1 %v747_v6, %s2591_s26  ;;  %v679_v2 = vcvt.s32.f32 %v678_v7 }
  0xfc   :  { %834 = vperm.xlu0 %2537, %v2751_v10   ;;  %830 = vperm.xlu1 %2536, %v2741_v13  }
 0x100   :  { %840 = vperm.xlu1 %2536, %v2739_v12   ;;  %680 = vrot.lane.b32.xlu0 %v2756_v4, %s2592_s27 }
 0x101   :  { %2539 = vset.pattern.permute.xlu0 %v2593_v8 }
 0x104   :  { %844 = vperm.xlu1 %2536, %v2749_v30  }
 0x108   :  { %2538 = vset.pattern.permute.xlu1 %v2593_v8 }
 0x15e   :  { %v752_v19 = vpop.permute.xlu0 %751  ;;  %v750_v20 = vpop.permute.xlu1 %749 }
 0x162   :  { %v756_v21 = vpop.permute.xlu0 %755  ;;  %v754_v22 = vpop.permute.xlu1 %753 }
 0x163   :  { %v764_v5 = vsel %vm2824_vm4, %v752_v19, %v756_v21  ;;  %v763_v53 = vsel %vm2824_vm4, %v750_v20, %v754_v22 }
 0x164   :  { %v800_v54 = vmul.f32 %v2820_v16, %v764_v5  ;;  %v799_v55 = vmul.f32 %v2815_v14, %v763_v53 }
 0x166   :  { %v768_v11 = vpop.permute.xlu0 %767  ;;  %v766_v24 = vpop.permute.xlu1 %765  ;;  %v802_v37 = vsub.f32 %v798_v56, %v800_v54  ;;  %v801_v58 = vsub.f32 %v797_v57, %v799_v55  ;;  %v2599_v56 = vmov 5  }
 0x16a   :  { %v772_v23 = vpop.permute.xlu0 %771  ;;  %v770_v39 = vpop.permute.xlu1 %769 }
 0x16b   :  { %v774_v40 = vsel %vm2824_vm4, %v768_v11, %v772_v23  ;;  %v773_v44 = vsel %vm2824_vm4, %v766_v24, %v770_v39 }
 0x16c   :  { %v794_v46 = vmul.f32 %v2820_v16, %v774_v40  ;;  %v793_v47 = vmul.f32 %v2815_v14, %v773_v44 }
 0x16e   :  { %v796_v50 = vadd.f32 %v794_v46, %v784_v48  ;;  %v795_v51 = vadd.f32 %v793_v47, %v783_v49 }
 0x170   :  { %805 = vrot.lane.b32.xlu0 %v796_v50, %s2592_s27  ;;  %803 = vrot.lane.b32.xlu1 %v795_v51, %s2592_s27 }
 0x174   :  { %809 = vrot.lane.b32.xlu0 %v796_v50, %s2594_s28  ;;  %807 = vrot.lane.b32.xlu1 %v795_v51, %s2594_s28 }
 0x178   :  { %821 = vrot.lane.b32.xlu0 %v802_v37, %s2592_s27  ;;  %819 = vrot.lane.b32.xlu1 %v801_v58, %s2592_s27 }
 0x17b   :  { %v2858_v60 = vpop.permute.xlu1 %830  ;;  %v2860_v61 = vpop.permute.xlu0 %834 }
 0x17c   :  { %825 = vrot.lane.b32.xlu0 %v802_v37, %s2594_s28  ;;  %823 = vrot.lane.b32.xlu1 %v801_v58, %s2594_s28  ;;  %v838_v40 = vmul.f32 %v2860_v61, %v796_v50  ;;  %v837_v44 = vmul.f32 %v2858_v60, %v795_v51  ;;  %v852_v50 = vmul.f32 %v2860_v61, %v802_v37 }
 0x17d   :  { %v851_v51 = vmul.f32 %v2858_v60, %v801_v58 }
 0x17f   :  { %v2862_v63 = vpop.permute.xlu1 %840  ;;  %v681_v62 = vpop.permute.xlu0 %680 }
 0x180   :  { %888 = vperm.xlu0 %2539, %v2751_v10   ;;  %884 = vperm.xlu1 %2538, %v2741_v13   ;;  %vm682_vm5 = vcmp.eq.f32.partialorder %v681_v62, %v679_v2 }
 0x181   :  { %v811_v18 = vsel %vm682_vm5, 1, %v2578_v0 }
 0x182   :  { %v815_v19 = vrot.slane %v811_v18, %v2779_v45 }
 0x183   :  { %v2865_v1 = vpop.permute.xlu1 %844 }
 0x184   :  { %894 = vperm.xlu1 %2538, %v2739_v12   ;;  %685 = vrot.lane.b32.xlu0 %v2756_v4, %s2595_s29  ;;  %vm2869_vm6 = vcmp.eq.s32.totalorder %v815_v19, 1 }
 0x185   :  { %2541 = vset.pattern.permute.xlu0 %v2596_v59 }
 0x188   :  { %898 = vperm.xlu1 %2538, %v2749_v30  }
 0x18c   :  { %2540 = vset.pattern.permute.xlu1 %v2596_v59  ;;  %v683_v59 = vxor.u32 8, %v2745_v17 }
 0x18e   :  { %v684_v2 = vcvt.s32.f32 %v683_v59 }
 0x1e2   :  { %v806_v6 = vpop.permute.xlu0 %805  ;;  %v804_v8 = vpop.permute.xlu1 %803 }
 0x1e6   :  { %v810_v9 = vpop.permute.xlu0 %809  ;;  %v808_v15 = vpop.permute.xlu1 %807 }
 0x1e7   :  { %v818_v48 = vsel %vm2869_vm6, %v806_v6, %v810_v9  ;;  %v817_v49 = vsel %vm2869_vm6, %v804_v8, %v808_v15 }
 0x1e8   :  { %v854_v5 = vmul.f32 %v2865_v1, %v818_v48  ;;  %v853_v53 = vmul.f32 %v2862_v63, %v817_v49 }
 0x1ea   :  { %v822_v20 = vpop.permute.xlu0 %821  ;;  %v820_v21 = vpop.permute.xlu1 %819  ;;  %v856_v54 = vsub.f32 %v852_v50, %v854_v5  ;;  %v855_v55 = vsub.f32 %v851_v51, %v853_v53 }
 0x1ee   :  { %v826_v26 = vpop.permute.xlu0 %825  ;;  %v824_v28 = vpop.permute.xlu1 %823 }
 0x1ef   :  { %v828_v11 = vsel %vm2869_vm6, %v822_v20, %v826_v26  ;;  %v827_v24 = vsel %vm2869_vm6, %v820_v21, %v824_v28 }
 0x1f0   :  { %v848_v23 = vmul.f32 %v2865_v1, %v828_v11  ;;  %v847_v39 = vmul.f32 %v2862_v63, %v827_v24 }
 0x1f2   :  { %v850_v46 = vadd.f32 %v848_v23, %v838_v40  ;;  %v849_v47 = vadd.f32 %v847_v39, %v837_v44 }
 0x1f4   :  { %859 = vrot.lane.b32.xlu0 %v850_v46, %s2595_s29  ;;  %857 = vrot.lane.b32.xlu1 %v849_v47, %s2595_s29 }
 0x1f8   :  { %863 = vrot.lane.b32.xlu0 %v850_v46, %s2597_s30  ;;  %861 = vrot.lane.b32.xlu1 %v849_v47, %s2597_s30 }
 0x1fc   :  { %875 = vrot.lane.b32.xlu0 %v856_v54, %s2595_s29  ;;  %873 = vrot.lane.b32.xlu1 %v855_v55, %s2595_s29 }
 0x1ff   :  { %v2904_v57 = vpop.permute.xlu1 %884  ;;  %v2906_v37 = vpop.permute.xlu0 %888 }
 0x200   :  { %879 = vrot.lane.b32.xlu0 %v856_v54, %s2597_s30  ;;  %877 = vrot.lane.b32.xlu1 %v855_v55, %s2597_s30  ;;  %3916 = vst [vmem:[#allocation2_spill] sm:$0xff] %v2904_v57  ;;  %v892_v44 = vmul.f32 %v2906_v37, %v850_v46  ;;  %v891_v48 = vmul.f32 %v2904_v57, %v849_v47 }
 0x201   :  { %v906_v46 = vmul.f32 %v2906_v37, %v856_v54  ;;  %v905_v47 = vmul.f32 %v2904_v57, %v855_v55  ;;  %v2601_v54 = vmov 6  }
 0x203   :  { %v2908_v58 = vpop.permute.xlu1 %894  ;;  %v686_v7 = vpop.permute.xlu0 %685 }
 0x204   :  { %942 = vperm.xlu0 %2541, %v2751_v10   ;;  %938 = vperm.xlu1 %2540, %v2741_v13   ;;  %3917 = vst [vmem:[#allocation3_spill] sm:$0xff] %v2908_v58  ;;  %vm687_vm7 = vcmp.eq.f32.partialorder %v686_v7, %v684_v2 }
 0x205   :  { %v865_v18 = vsel %vm687_vm7, 1, %v2578_v0 }
 0x206   :  { %v869_v19 = vrot.slane %v865_v18, %v2779_v45 }
 0x207   :  { %v2911_v62 = vpop.permute.xlu1 %898 }
 0x208   :  { %948 = vperm.xlu1 %2540, %v2739_v12   ;;  %690 = vrot.lane.b32.xlu0 %v2756_v4, %s2598_s7  ;;  %3918 = vst [vmem:[#allocation4_spill] sm:$0xff] %v2911_v62  ;;  %vm2915_vm8 = vcmp.eq.s32.totalorder %v869_v19, 1 }
 0x209   :  { %2543 = vset.pattern.permute.xlu0 %v2599_v56 }
 0x20c   :  { %952 = vperm.xlu1 %2540, %v2749_v30  }
 0x210   :  { %2542 = vset.pattern.permute.xlu1 %v2578_v0 }
 0x266   :  { %v860_v6 = vpop.permute.xlu0 %859  ;;  %v858_v8 = vpop.permute.xlu1 %857 }
 0x26a   :  { %v864_v9 = vpop.permute.xlu0 %863  ;;  %v862_v15 = vpop.permute.xlu1 %861 }
 0x26b   :  { %v872_v53 = vsel %vm2915_vm8, %v860_v6, %v864_v9  ;;  %v871_v50 = vsel %vm2915_vm8, %v858_v8, %v862_v15  ;;  %v441_v6 = vld [vmem:[%s3863_s2] sm:$0x3f]  ;;  %s2602_s2 = smov 32  }
 0x26c   :  { %v908_v51 = vmul.f32 %v2911_v62, %v872_v53  ;;  %v907_v59 = vmul.f32 %v2908_v58, %v871_v50  ;;  %v2946_v8 = vmul.f32 0.5, %v441_v6 }
 0x26e   :  { %v876_v20 = vpop.permute.xlu0 %875  ;;  %v874_v21 = vpop.permute.xlu1 %873  ;;  %v910_v7 = vsub.f32 %v906_v46, %v908_v51  ;;  %v909_v2 = vsub.f32 %v905_v47, %v907_v59  ;;  %3921 = vst [vmem:[#allocation5_spill] sm:$0xff] %v2946_v8 }
 0x272   :  { %v880_v28 = vpop.permute.xlu0 %879  ;;  %v878_v11 = vpop.permute.xlu1 %877 }
 0x273   :  { %v882_v24 = vsel %vm2915_vm8, %v876_v20, %v880_v28  ;;  %v881_v23 = vsel %vm2915_vm8, %v874_v21, %v878_v11 }
 0x274   :  { %v902_v39 = vmul.f32 %v2911_v62, %v882_v24  ;;  %v901_v40 = vmul.f32 %v2908_v58, %v881_v23 }
 0x276   :  { %v904_v49 = vadd.f32 %v902_v39, %v892_v44  ;;  %v903_v5 = vadd.f32 %v901_v40, %v891_v48 }
 0x278   :  { %913 = vrot.lane.b32.xlu0 %v904_v49, %s2598_s7  ;;  %911 = vrot.lane.b32.xlu1 %v903_v5, %s2598_s7 }
 0x27c   :  { %917 = vrot.lane.b32.xlu0 %v904_v49, %s2600_s8  ;;  %915 = vrot.lane.b32.xlu1 %v903_v5, %s2600_s8 }
 0x280   :  { %929 = vrot.lane.b32.xlu0 %v910_v7, %s2598_s7  ;;  %927 = vrot.lane.b32.xlu1 %v909_v2, %s2598_s7 }
 0x283   :  { %v2955_v55 = vpop.permute.xlu1 %938  ;;  %v2957_v9 = vpop.permute.xlu0 %942 }
 0x284   :  { %933 = vrot.lane.b32.xlu0 %v910_v7, %s2600_s8  ;;  %931 = vrot.lane.b32.xlu1 %v909_v2, %s2600_s8  ;;  %3922 = vst [vmem:[#allocation6_spill] sm:$0xff] %v2955_v55  ;;  %3923 = vst [vmem:[#allocation7_spill] sm:$0xff] %v2957_v9  ;;  %v946_v47 = vmul.f32 %v2957_v9, %v904_v49  ;;  %v945_v6 = vmul.f32 %v2955_v55, %v903_v5 }
 0x287   :  { %v2959_v15 = vpop.permute.xlu1 %948  ;;  %v691_v18 = vpop.permute.xlu0 %690 }
 0x288   :  { %992 = vperm.xlu0 %2543, %v2741_v13   ;;  %1057 = vperm.xlu1 %2542, %v2946_v8   ;;  %3924 = vst [vmem:[#allocation8_spill] sm:$0xff] %v2959_v15 }
 0x28b   :  { %v2962_v19 = vpop.permute.xlu1 %952 }
 0x28c   :  { %2544 = vset.pattern.permute.xlu1 %v2599_v56  ;;  %1006 = vperm.xlu0 %2543, %v2749_v30   ;;  %v688_v56 = vxor.u32 16, %v2745_v17  ;;  %3925 = vst [vmem:[#allocation9_spill] sm:$0xff] %v2962_v19 }
 0x28d   :  { %996 = vperm.xlu1 %2544, %v2751_v10  }
 0x28e   :  { %v689_v20 = vcvt.s32.f32 %v688_v56 }
 0x290   :  { %2545 = vset.pattern.permute.xlu0 %v2601_v54  ;;  %vm692_vm9 = vcmp.eq.f32.partialorder %v691_v18, %v689_v20  ;;  %v443_v18 = vld [vmem:[%s3864_s3] sm:$0x7f]  ;;  %s2603_s3 = smov 96  }
 0x291   :  { %1002 = vperm.xlu1 %2544, %v2739_v12  }
 0x295   :  { %695 = vrot.lane.b32.xlu1 %v2756_v4, %s2602_s2  ;;  %v919_v4 = vsel %vm692_vm9, 1, %v2578_v0 }
 0x296   :  { %2546 = vset.pattern.permute.xlu1 %v2601_v54  ;;  %v923_v23 = vrot.slane %v919_v4, %v2779_v45 }
 0x298   :  { %vm2966_vm10 = vcmp.eq.s32.totalorder %v923_v23, 1  ;;  %v2989_v23 = vmul.f32 0.5, %v443_v18 }
 0x29a   :  { %v448_v49 = vand.u32 2139095040, %v2989_v23  ;;  %vm447_vm3 = vcmp.lt.s32.totalorder %v2989_v23, 0 }
 0x2ea   :  { %v914_v21 = vpop.permute.xlu0 %913  ;;  %v912_v28 = vpop.permute.xlu1 %911 }
 0x2ee   :  { %v918_v11 = vpop.permute.xlu0 %917  ;;  %v916_v24 = vpop.permute.xlu1 %915 }
 0x2ef   :  { %v926_v20 = vsel %vm2966_vm10, %v914_v21, %v918_v11  ;;  %v925_v4 = vsel %vm2966_vm10, %v912_v28, %v916_v24  ;;  %v960_v21 = vmul.f32 %v2957_v9, %v910_v7  ;;  %v959_v28 = vmul.f32 %v2955_v55, %v909_v2 }
 0x2f0   :  { %v962_v5 = vmul.f32 %v2962_v19, %v926_v20  ;;  %v445_v7 = vand.u32 2147483647, %v2989_v23 }
 0x2f2   :  { %v930_v39 = vpop.permute.xlu0 %929  ;;  %v928_v40 = vpop.permute.xlu1 %927  ;;  %v3004_v24 = vsub.f32 %v960_v21, %v962_v5  ;;  %vm446_vm5 = vcmp.le.f32.partialorder %v445_v7, 0.7853982 }
 0x2f6   :  { %v934_v48 = vpop.permute.xlu0 %933  ;;  %v932_v53 = vpop.permute.xlu1 %931 }
 0x2f7   :  { %v936_v50 = vsel %vm2966_vm10, %v930_v39, %v934_v48  ;;  %v935_v51 = vsel %vm2966_vm10, %v928_v40, %v932_v53  ;;  %v961_v39 = vmul.f32 %v2959_v15, %v925_v4  ;;  %v449_v40 = vshrl.u32 %v448_v49, 23 }
 0x2f8   :  { %v956_v59 = vmul.f32 %v2962_v19, %v936_v50  ;;  %v955_v46 = vmul.f32 %v2959_v15, %v935_v51 }
 0x2f9   :  { %v2422_v11 = vadd.s32 4294967169, %v449_v40  ;;  %v3006_v48 = vsub.f32 %v959_v28, %v961_v39 }
 0x2fa   :  { %v2978_v54 = vadd.f32 %v956_v59, %v946_v47  ;;  %v2980_v56 = vadd.f32 %v955_v46, %v945_v6  ;;  %v452_v46 = vand.u32 8388607, %v445_v7 }
 0x2fb   :  { %v455_v53 = vadd.s32 1, %v2422_v11 }
 0x2fc   :  { %967 = vrot.lane.b32.xlu1 %v2978_v54, %s2602_s2  ;;  %965 = vrot.lane.b32.xlu0 %v2980_v56, %s2602_s2 }
 0x2fd   :  { %vm456_vm11 = vcmp.gt.s32.totalorder %v455_v53, 0 }
 0x2fe   :  { %v457_v50 = vsel %vm456_vm11, %v455_v53, 0 }
 0x2ff   :  { %v459_v51 = vand.u32 31, %v457_v50  ;;  %v458_v59 = vshrl.u32 %v457_v50, 5  ;;  %v453_v50 = vor.u32 8388608, %v452_v46 }
 0x300   :  { %971 = vrot.lane.b32.xlu1 %v2978_v54, %s2603_s3  ;;  %969 = vrot.lane.b32.xlu0 %v2980_v56, %s2603_s3 }
 0x301   :  { %v460_v2 = vsub.s32 32, %v459_v51  ;;  %v462_v47 = vshll.u32 %v3876_v27, %v459_v51  ;;  %v471_v18 = vshll.u32 %v3888_v33, %v459_v51  ;;  %v465_v20 = vshll.u32 %v3874_v29, %v459_v51 }
 0x302   :  { %v468_v49 = vshll.u32 %v3868_v31, %v459_v51  ;;  %v474_v39 = vshll.u32 %v3895_v35, %v459_v51  ;;  %vm477_vm12 = vcmp.lt.s32.totalorder %v458_v59, 1  ;;  %vm479_vm13 = vcmp.lt.s32.totalorder %v458_v59, 3 }
 0x303   :  { %v463_v6 = vshrl.u32 %v3874_v29, %v460_v2  ;;  %v466_v4 = vshrl.u32 %v3868_v31, %v460_v2  ;;  %v472_v5 = vshrl.u32 %v3895_v35, %v460_v2  ;;  %v475_v28 = vshrl.u32 %v3878_v43, %v460_v2 }
 0x304   :  { %983 = vrot.lane.b32.xlu1 %v3004_v24, %s2602_s2  ;;  %981 = vrot.lane.b32.xlu0 %v3006_v48, %s2602_s2  ;;  %v461_v11 = vshrl.u32 %v3876_v27, %v460_v2  ;;  %vm480_vm14 = vcmp.lt.s32.totalorder %v458_v59, 4  ;;  %vm478_vm15 = vcmp.lt.s32.totalorder %v458_v59, 2  ;;  %v3057_v59 = vld [vmem:[%s3865_s4 + $0x1] sm:$0x1] }
 0x305   :  { %v467_v40 = vor.u32 %v466_v4, %v465_v20  ;;  %v473_v53 = vor.u32 %v472_v5, %v471_v18  ;;  %v476_v31 = vor.u32 %v475_v28, %v474_v39  ;;  %3928 = vst [vmem:[#allocation10_spill] sm:$0xff] %v3057_v59 }
 0x307   :  { %v490_v20 = vsel %vm480_vm14, %v476_v31, 1326507024 }
 0x308   :  { %987 = vrot.lane.b32.xlu1 %v3004_v24, %s2603_s3  ;;  %985 = vrot.lane.b32.xlu0 %v3006_v48, %s2603_s3  ;;  %v491_v4 = vsel %vm479_vm13, %v473_v53, %v490_v20 }
 0x30c   :  { %1032 = vperm.xlu1 %2546, %v2751_v10   ;;  %1028 = vperm.xlu0 %2545, %v2741_v13   ;;  %v469_v10 = vshrl.u32 %v3888_v33, %v460_v2  ;;  %v464_v13 = vor.u32 %v463_v6, %v462_v47  ;;  %v486_v6 = vsel %vm480_vm14, %v473_v53, 920167782 }
 0x30e   :  { %v470_v21 = vor.u32 %v469_v10, %v468_v49  ;;  %v485_v47 = vsel %vm477_vm12, %v464_v13, %v467_v40  ;;  %v481_v2 = vsel %vm477_vm12, %v461_v11, %v464_v13  ;;  %v493_v49 = vshll.u32 %v453_v50, 8 }
 0x310   :  { %1038 = vperm.xlu1 %2546, %v2739_v12   ;;  %1042 = vperm.xlu0 %2545, %v2749_v30   ;;  %v482_v12 = vsel %vm480_vm14, %v470_v21, 2102212464  ;;  %v487_v30 = vsel %vm479_vm13, %v470_v21, %v486_v6  ;;  %v489_v51 = vsel %vm477_vm12, %v467_v40, %v470_v21  ;;  %vm537_vm12 = vweird.f32 %v2989_v23 }
 0x311   :  { %v483_v46 = vsel %vm479_vm13, %v467_v40, %v482_v12  ;;  %v488_v18 = vsel %vm478_vm15, %v485_v47, %v487_v30  ;;  %v492_v10 = vsel %vm478_vm15, %v489_v51, %v491_v4 }
 0x312   :  { %v3044_v5 = vmul.u32.u64.low %v493_v49, %v492_v10  ;;  %v3045_v39 = vmul.u32.u64.high %v493_v49, %v492_v10, %v3044_v5  ;;  %v484_v28 = vsel %vm478_vm15, %v481_v2, %v483_v46 }
 0x313   :  { %v3048_v21 = vmul.u32.u64.low %v493_v49, %v488_v18  ;;  %v3049_v31 = vmul.u32.u64.high %v493_v49, %v488_v18, %v3048_v21  ;;  %v500_v6 = vmul.u32 %v493_v49, %v484_v28  ;;  %v3870_v18 = vrot.slane %v3057_v59, 7  ;;  %v3064_v49 = vld [vmem:[%s3865_s4 + $0x2] sm:$0x1] }
 0x314   :  { %2547 = vset.pattern.permute.xlu1 %v2578_v0  ;;  %2548 = vset.pattern.permute.xlu0 %v3873_v34  ;;  %3929 = vst [vmem:[#allocation11_spill] sm:$0xff] %v3064_v49 }
 0x315   :  { %vm502_vm0 = vc.u32 %v3045_v39, %v3048_v21  ;;  %v503_v13 = vadd.s32 1, %v3049_v31  ;;  %v501_v46 = vadd.s32 %v3048_v21, %v3045_v39  ;;  %v659_v21 = vld [vmem:[%s3865_s4] sm:$0x1] }
 0x317   :  { %v504_v40 = vsel %vm502_vm0, %v503_v13, %v3049_v31  ;;  %v1058_v31 = vpop.permute.xlu1 %1057 }
 0x318   :  { %v505_v11 = vadd.s32 %v504_v40, %v500_v6  ;;  %v3871_v40 = vrot.slane %v3064_v49, 6  ;;  %v1064_v39 = vmul.f32 %v3870_v18, %v1058_v31 }
 0x31a   :  { %v506_v53 = vadd.s32 536870912, %v505_v11 }
 0x31c   :  { %v507_v50 = vshrl.u32 %v506_v53, 30 }
 0x31e   :  { %v508_v12 = vshll.u32 %v507_v50, 30 }
 0x320   :  { %v509_v47 = vsub.s32 %v505_v11, %v508_v12  ;;  %v3075_v11 = vld [vmem:[%s3865_s4 + $0x3] sm:$0x1] }
 0x321   :  { %3930 = vst [vmem:[#allocation12_spill] sm:$0xff] %v3075_v11 }
 0x322   :  { %v511_v30 = vsub.s32 0, %v509_v47 }
 0x324   :  { %v2423_v51 = vmin.u32 %v511_v30, %v509_v47 }
 0x326   :  { %v513_v20 = vclz %v2423_v51  ;;  %v3080_v51 = vld [vmem:[%s3865_s4 + $0x4] sm:$0x1] }
 0x327   :  { %3931 = vst [vmem:[#allocation13_spill] sm:$0xff] %v3080_v51 }
 0x328   :  { %v2424_v2 = vadd.s32 4294967294, %v513_v20  ;;  %v3872_v20 = vrot.slane %v3075_v11, 5  ;;  %v3935_v11 = vmov 2475754826  }
 0x32a   :  { %vm2425_vm1 = vcmp.lt.s32.totalorder %v2424_v2, 0 }
 0x32b   :  { %v516_v4 = vsel %vm2425_vm1, 0, %v2424_v2  ;;  %v1060_v2 = vmul.f32 %v1058_v31, %v659_v21  ;;  %v531_v21 = vsub.s32 4, %v507_v50 }
 0x32c   :  { %v517_v10 = vsub.s32 32, %v516_v4  ;;  %v518_v5 = vshll.u32 %v509_v47, %v516_v4  ;;  %v521_v28 = vsub.s32 4294967266, %v516_v4  ;;  %v1072_v4 = vmul.f32 %v3871_v40, %v1058_v31 }
 0x32e   :  { %v519_v6 = vshrl.u32 %v501_v46, %v517_v10  ;;  %v522_v13 = vadd.s32 127, %v521_v28  ;;  %v1066_v46 = vrot.slane %v1064_v39, 1  ;;  %v3881_v28 = vrot.slane %v3080_v51, 4 }
 0x32f   :  { %v3934_v51 = vmov 683565275  }
 0x330   :  { %v520_v53 = vor.u32 %v519_v6, %v518_v5  ;;  %v523_v12 = vshll.u32 %v522_v13, 23  ;;  %v3089_v5 = vld [vmem:[%s3865_s4 + $0x5] sm:$0x1]  ;;  %v1068_v6 = vadd.f32 %v1066_v46, %v1060_v2  ;;  %v1074_v13 = vrot.slane %v1072_v4, 2 }
 0x331   :  { %3932 = vst [vmem:[#allocation14_spill] sm:$0xff] %v3089_v5  ;;  %v1088_v40 = vmul.f32 %v3881_v28, %v1058_v31  ;;  %v532_v46 = vsel %vm447_vm3, %v531_v21, %v507_v50  ;;  %v3123_v21 = vpop.permute.xlu1 %996 }
 0x332   :  { %v524_v47 = vor.u32 4788187, %v523_v12  ;;  %v527_v30 = vcvt.s32.f32 %v520_v53  ;;  %v1080_v53 = vmul.f32 %v3872_v20, %v1058_v31  ;;  %v3880_v12 = vrot.slane %v3089_v5, 3 }
 0x333   :  { %v1090_v20 = vrot.slane %v1088_v40, 4  ;;  %v534_v34 = vsel %vm446_vm5, 0, %v532_v46 }
 0x334   :  { %v525_v10 = vand.u32 2147483647, %v524_v47  ;;  %v1096_v7 = vmul.f32 %v3880_v12, %v1058_v31  ;;  %v538_v29 = vand.u32 3, %v534_v34  ;;  %v641_v9 = vadd.s32 3, %v534_v34 }
 0x336   :  { %v528_v18 = vmul.f32 %v527_v30, %v525_v10  ;;  %v1076_v30 = vadd.f32 %v1074_v13, %v1068_v6  ;;  %v1082_v10 = vrot.slane %v1080_v53, 3  ;;  %v1098_v43 = vrot.slane %v1096_v7, 5 }
 0x337   :  { %vm543_vm7 = vcmp.eq.s32.totalorder %v538_v29, 2  ;;  %vm540_vm9 = vcmp.eq.s32.totalorder %v538_v29, 0  ;;  %vm539_vm11 = vcmp.lt.s32.totalorder %v538_v29, 2 }
 0x338   :  { %v529_v39 = vxor.u32 2147483648, %v528_v18  ;;  %v1084_v4 = vadd.f32 %v1082_v10, %v1076_v30  ;;  %v3125_v30 = vpop.permute.xlu1 %1002  ;;  %v693_v10 = vxor.u32 32, %v2745_v17 }
 0x33a   :  { %v530_v47 = vsel %vm447_vm3, %v529_v39, %v528_v18  ;;  %v1092_v27 = vadd.f32 %v1090_v20, %v1084_v4  ;;  %v694_v7 = vcvt.s32.f32 %v693_v10 }
 0x33b   :  { %v533_v2 = vsel %vm446_vm5, %v2989_v23, %v530_v47  ;;  %v3943_v23 = vmov 1  }
 0x33c   :  { %2558 = vcosq.f32 %v533_v2  ;;  %v3106_v13 = vadd.f32 %v1098_v43, %v1092_v27  ;;  %v696_v4 = vpop.permute.xlu1 %695 }
 0x33d   :  { %2560 = vsinq.f32 %v533_v2  ;;  %v3128_v2 = vpop.permute.xlu0 %992  ;;  %vm697_vm14 = vcmp.eq.f32.partialorder %v696_v4, %v694_v7  ;;  %v3933_v7 = vmov 1326507024  }
 0x33e   :  { %v1104_v53 = vand.u32 2139095040, %v3106_v13 }
 0x340   :  { %v1105_v29 = vshrl.u32 %v1104_v53, 23 }
 0x342   :  { %v2431_v39 = vadd.s32 4294967169, %v1105_v29 }
 0x344   :  { %v1111_v47 = vadd.s32 1, %v2431_v39  ;;  %v973_v39 = vsel %vm697_vm14, 1, %v2578_v0  ;;  %vm1103_vm14 = vcmp.lt.s32.totalorder %v3106_v13, 0 }
 0x346   :  { %v3102_v18 = vpop.eup %2558  ;;  %vm1112_vm13 = vcmp.gt.s32.totalorder %v1111_v47, 0 }
 0x347   :  { %v3104_v6 = vpop.eup %2560  ;;  %v3882_v50 = vxor.u32 2147483648, %v3102_v18  ;;  %v1113_v46 = vsel %vm1112_vm13, %v1111_v47, 0 }
 0x348   :  { %v3883_v40 = vxor.u32 2147483648, %v3104_v6  ;;  %v3139_v10 = vshrl.u32 %v1113_v46, 5 }
 0x349   :  { %v545_v31 = vsel %vm543_vm7, %v3882_v50, %v3104_v6 }
 0x34a   :  { %v542_v20 = vsel %vm540_vm9, %v3102_v18, %v3883_v40  ;;  %v977_v40 = vrot.slane %v973_v39, %v2779_v45  ;;  %v3937_v39 = vmov 2102212464   ;;  %vm1136_vm15 = vcmp.lt.s32.totalorder %v3139_v10, 4 }
 0x34b   :  { %v546_v27 = vsel %vm539_vm11, %v542_v20, %v545_v31  ;;  %v1115_v31 = vand.u32 31, %v1113_v46  ;;  %v3130_v20 = vpop.permute.xlu0 %1006  ;;  %vm1133_vm1 = vcmp.lt.s32.totalorder %v3139_v10, 1  ;;  %vm1135_vm3 = vcmp.lt.s32.totalorder %v3139_v10, 3 }
 0x34c   :  { %v3120_v43 = vsel %vm537_vm12, nan, %v546_v27  ;;  %vm3157_vm0 = vcmp.eq.s32.totalorder %v977_v40, 1  ;;  %vm1134_vm5 = vcmp.lt.s32.totalorder %v3139_v10, 2 }
 0x34d   :  { %2463 = vpush %v3120_v43  ;;  %v3132_v27 = vsub.s32 32, %v1115_v31  ;;  %v1127_v17 = vshll.u32 %v3888_v33, %v1115_v31  ;;  %v1130_v4 = vshll.u32 %v3895_v35, %v1115_v31  ;;  %v1118_v0 = vshll.u32 %v3934_v51, %v1115_v31 }
 0x34e   :  { %v1121_v50 = vshll.u32 %v3935_v11, %v1115_v31  ;;  %v3936_v33 = vmov 2131351028  }
 0x34f   :  { %v1128_v47 = vshrl.u32 %v3895_v35, %v3132_v27  ;;  %v1131_v5 = vshrl.u32 %v3933_v7, %v3132_v27  ;;  %v1119_v49 = vshrl.u32 %v3935_v11, %v3132_v27  ;;  %v1122_v59 = vshrl.u32 %v3936_v33, %v3132_v27 }
 0x350   :  { %v1124_v46 = vshll.u32 %v3936_v33, %v1115_v31  ;;  %v1125_v19 = vshrl.u32 %v3937_v39, %v3132_v27  ;;  %v3938_v7 = vand.u32 2147483647, %v3106_v13  ;;  %v999_v31 = vmul.f32 %v3128_v2, %v2980_v56 }
 0x351   :  { %v1129_v8 = vor.u32 %v1128_v47, %v1127_v17  ;;  %v1132_v58 = vor.u32 %v1131_v5, %v1130_v4  ;;  %v1120_v57 = vor.u32 %v1119_v49, %v1118_v0  ;;  %v1123_v34 = vor.u32 %v1122_v59, %v1121_v50 }
 0x352   :  { %v1108_v55 = vand.u32 8388607, %v3938_v7  ;;  %v642_v33 = vand.u32 3, %v641_v9  ;;  %v1126_v39 = vor.u32 %v1125_v19, %v1124_v46  ;;  %v1000_v17 = vmul.f32 %v3123_v21, %v2978_v54 }
 0x353   :  { %v1142_v40 = vsel %vm1136_vm15, %v1129_v8, 920167782  ;;  %v1146_v19 = vsel %vm1136_vm15, %v1132_v58, 1326507024  ;;  %v1014_v47 = vmul.f32 %v3123_v21, %v3004_v24  ;;  %v3941_v7 = vxor.u32 2147483648, %v3104_v6 }
 0x354   :  { %v1109_v5 = vor.u32 8388608, %v1108_v55  ;;  %vm644_vm7 = vcmp.eq.s32.totalorder %v642_v33, 0  ;;  %vm647_vm9 = vcmp.eq.s32.totalorder %v642_v33, 2  ;;  %vm643_vm11 = vcmp.lt.s32.totalorder %v642_v33, 2 }
 0x355   :  { %v646_v0 = vsel %vm644_vm7, %v3102_v18, %v3941_v7  ;;  %v1013_v24 = vmul.f32 %v3128_v2, %v3006_v48  ;;  %v1138_v48 = vsel %vm1136_vm15, %v1126_v39, 2102212464 }
 0x356   :  { %v1149_v4 = vshll.u32 %v1109_v5, 8 }
 0x36e   :  { %v966_v53 = vpop.permute.xlu0 %965  ;;  %v968_v29 = vpop.permute.xlu1 %967 }
 0x372   :  { %v970_v12 = vpop.permute.xlu0 %969  ;;  %v972_v28 = vpop.permute.xlu1 %971 }
 0x373   :  { %v980_v59 = vsel %vm3157_vm0, %v968_v29, %v972_v28  ;;  %v979_v55 = vsel %vm3157_vm0, %v966_v53, %v970_v12  ;;  %v1141_v28 = vsel %vm1133_vm1, %v1120_v57, %v1123_v34  ;;  %v1145_v12 = vsel %vm1133_vm1, %v1123_v34, %v1126_v39 }
 0x374   :  { %v1016_v58 = vmul.f32 %v3130_v20, %v980_v59  ;;  %v1015_v53 = vmul.f32 %v3125_v30, %v979_v55 }
 0x376   :  { %v984_v35 = vpop.permute.xlu1 %983  ;;  %v982_v15 = vpop.permute.xlu0 %981  ;;  %v3216_v5 = vsub.f32 %v1013_v24, %v1015_v53 }
 0x37a   :  { %v988_v62 = vpop.permute.xlu1 %987  ;;  %v986_v9 = vpop.permute.xlu0 %985 }
 0x37b   :  { %v990_v56 = vsel %vm3157_vm0, %v984_v35, %v988_v62  ;;  %v989_v49 = vsel %vm3157_vm0, %v982_v15, %v986_v9  ;;  %v1143_v35 = vsel %vm1135_vm3, %v1126_v39, %v1142_v40  ;;  %v1147_v15 = vsel %vm1135_vm3, %v1129_v8, %v1146_v19 }
 0x37c   :  { %v1010_v54 = vmul.f32 %v3130_v20, %v990_v56  ;;  %v1009_v50 = vmul.f32 %v3125_v30, %v989_v49  ;;  %v3942_v8 = vxor.u32 2147483648, %v3102_v18  ;;  %v1148_v33 = vsel %vm1134_vm5, %v1145_v12, %v1147_v15 }
 0x37d   :  { %v3225_v56 = vmul.u32.u64.low %v1149_v4, %v1148_v33  ;;  %v3226_v9 = vmul.u32.u64.high %v1149_v4, %v1148_v33, %v3225_v56  ;;  %v1397_v39 = vrot.slane %v3120_v43, 1 }
 0x37e   :  { %v3187_v62 = vadd.f32 %v1010_v54, %v1000_v17  ;;  %v3194_v29 = vadd.f32 %v1009_v50, %v999_v31  ;;  %v649_v46 = vsel %vm647_vm9, %v3942_v8, %v3104_v6  ;;  %v1144_v31 = vsel %vm1134_vm5, %v1141_v28, %v1143_v35  ;;  %s2464_s12 = spop %2463 }
 0x37f   :  { %v3214_v17 = vsub.f32 %v1014_v47, %v1016_v58  ;;  %v650_v40 = vsel %vm643_vm11, %v646_v0, %v649_v46  ;;  %v3218_v59 = vmul.u32.u64.low %v1149_v4, %v1144_v31  ;;  %v3219_v18 = vmul.u32.u64.high %v1149_v4, %v1144_v31, %v3218_v59  ;;  %2465 = vpush %v1397_v39 }
 0x380   :  { %1021 = vrot.lane.b32.xlu0 %v3187_v62, %s2604_s9  ;;  %1019 = vrot.lane.b32.xlu1 %v3194_v29, %s2604_s9  ;;  %v1117_v6 = vshrl.u32 %v3934_v51, %v3132_v27  ;;  %v3234_v19 = vsel %vm537_vm12, nan, %v650_v40  ;;  %v1139_v54 = vsel %vm1135_vm3, %v1123_v34, %v1138_v48 }
 0x381   :  { %v1159_v49 = vadd.s32 1, %v3219_v18  ;;  %vm1158_vm13 = vc.u32 %v3226_v9, %v3218_v59  ;;  %v1157_v8 = vadd.s32 %v3218_v59, %v3226_v9 }
 0x382   :  { %v1137_v55 = vsel %vm1133_vm1, %v1117_v6, %v1120_v57 }
 0x383   :  { %v1140_v27 = vsel %vm1134_vm5, %v1137_v55, %v1139_v54  ;;  %v1160_v57 = vsel %vm1158_vm13, %v1159_v49, %v3219_v18  ;;  %v3944_v54 = vand.u32 2147483647, %v3106_v13  ;;  %vm1193_vm13 = vweird.f32 %v3106_v13 }
 0x384   :  { %1025 = vrot.lane.b32.xlu0 %v3214_v17, %s2604_s9  ;;  %1023 = vrot.lane.b32.xlu1 %v3216_v5, %s2604_s9  ;;  %v1156_v28 = vmul.u32 %v1149_v4, %v1140_v27 }
 0x385   :  { %vm1102_vm15 = vcmp.le.f32.partialorder %v3944_v54, 0.7853982 }
 0x386   :  { %v1161_v34 = vadd.s32 %v1160_v57, %v1156_v28 }
 0x388   :  { %1330 = vperm.xlu1 %2547, %v3234_v19   ;;  %v1162_v50 = vadd.s32 536870912, %v1161_v34 }
 0x38a   :  { %v1163_v35 = vshrl.u32 %v1162_v50, 30 }
 0x38c   :  { %2549 = vset.pattern.permute.xlu1 %v3943_v23  ;;  %v1164_v58 = vshll.u32 %v1163_v35, 30  ;;  %v1187_v49 = vsub.s32 4, %v1163_v35 }
 0x38e   :  { %v1165_v10 = vsub.s32 %v1161_v34, %v1164_v58  ;;  %v1188_v9 = vsel %vm1103_vm14, %v1187_v49, %v1163_v35  ;;  %v3255_v34 = vpop.permute.xlu0 %1028 }
 0x38f   :  { %v1190_v23 = vsel %vm1102_vm15, 0, %v1188_v9 }
 0x390   :  { %v1167_v12 = vsub.s32 0, %v1165_v10  ;;  %v1297_v28 = vadd.s32 3, %v1190_v23  ;;  %v1194_v58 = vand.u32 3, %v1190_v23  ;;  %v1035_v23 = vmul.f32 %v3255_v34, %v3194_v29 }
 0x392   :  { %v2432_v15 = vmin.u32 %v1167_v12, %v1165_v10  ;;  %v3257_v12 = vpop.permute.xlu1 %1032  ;;  %vm1196_vm1 = vcmp.eq.s32.totalorder %v1194_v58, 0  ;;  %vm1199_vm3 = vcmp.eq.s32.totalorder %v1194_v58, 2  ;;  %vm1195_vm9 = vcmp.lt.s32.totalorder %v1194_v58, 2 }
 0x394   :  { %v1169_v53 = vclz %v2432_v15  ;;  %v3259_v15 = vpop.permute.xlu0 %1042 }
 0x396   :  { %v2433_v47 = vadd.s32 4294967294, %v1169_v53  ;;  %v3261_v35 = vpop.permute.xlu1 %1038 }
 0x398   :  { %vm2434_vm12 = vcmp.lt.s32.totalorder %v2433_v47, 0 }
 0x399   :  { %v1172_v7 = vsel %vm2434_vm12, 0, %v2433_v47 }
 0x39a   :  { %v1177_v0 = vsub.s32 4294967266, %v1172_v7  ;;  %v1173_v4 = vsub.s32 32, %v1172_v7  ;;  %v1174_v31 = vshll.u32 %v1165_v10, %v1172_v7  ;;  %v1298_v10 = vand.u32 3, %v1297_v28 }
 0x39c   :  { %v1178_v46 = vadd.s32 127, %v1177_v0  ;;  %v1175_v24 = vshrl.u32 %v1157_v8, %v1173_v4  ;;  %vm1300_vm5 = vcmp.eq.s32.totalorder %v1298_v10, 0  ;;  %vm1303_vm7 = vcmp.eq.s32.totalorder %v1298_v10, 2 }
 0x39d   :  { %vm1299_vm11 = vcmp.lt.s32.totalorder %v1298_v10, 2 }
 0x39e   :  { %v1179_v33 = vshll.u32 %v1178_v46, 23  ;;  %v1176_v40 = vor.u32 %v1175_v24, %v1174_v31 }
 0x3a0   :  { %v1180_v18 = vor.u32 4788187, %v1179_v33  ;;  %v1183_v56 = vcvt.s32.f32 %v1176_v40 }
 0x3a2   :  { %v1181_v6 = vand.u32 2147483647, %v1180_v18 }
 0x3a4   :  { %v1184_v48 = vmul.f32 %v1183_v56, %v1181_v6  ;;  %v1050_v6 = vmul.f32 %v3257_v12, %v3214_v17 }
 0x3a6   :  { %v1185_v55 = vxor.u32 2147483648, %v1184_v48 }
 0x3a8   :  { %v1186_v27 = vsel %vm1103_vm14, %v1185_v55, %v1184_v48  ;;  %v1049_v55 = vmul.f32 %v3255_v34, %v3216_v5 }
 0x3a9   :  { %v1189_v59 = vsel %vm1102_vm15, %v3106_v13, %v1186_v27  ;;  %v1036_v13 = vmul.f32 %v3257_v12, %v3187_v62 }
 0x3aa   :  { %2562 = vcosq.f32 %v1189_v59 }
 0x3ab   :  { %2564 = vsinq.f32 %v1189_v59 }
 0x3b0   :  { %s2466_s15 = spop %2465 }
 0x3b4   :  { %v2563_v57 = vpop.eup %2562 }
 0x3b5   :  { %v2565_v50 = vpop.eup %2564  ;;  %v1200_v47 = vxor.u32 2147483648, %v2563_v57 }
 0x3b6   :  { %v1197_v53 = vxor.u32 2147483648, %v2565_v50 }
 0x3b7   :  { %v1201_v0 = vsel %vm1199_vm3, %v1200_v47, %v2565_v50  ;;  %v1305_v4 = vsel %vm1303_vm7, %v1200_v47, %v2565_v50 }
 0x3b8   :  { %v1198_v7 = vsel %vm1196_vm1, %v2563_v57, %v1197_v53  ;;  %v1302_v8 = vsel %vm1300_vm5, %v2563_v57, %v1197_v53 }
 0x3b9   :  { %v1202_v31 = vsel %vm1195_vm9, %v1198_v7, %v1201_v0  ;;  %v1306_v24 = vsel %vm1299_vm11, %v1302_v8, %v1305_v4 }
 0x3ba   :  { %v1203_v56 = vsel %vm1193_vm13, nan, %v1202_v31  ;;  %v1307_v48 = vsel %vm1193_vm13, nan, %v1306_v24  ;;  %v1440_v24 = vrot.slane %v3120_v43, 2 }
 0x3bb   :  { %v1311_v17 = vrot.slane %v1203_v56, %v2779_v45  ;;  %v1317_v57 = vrot.slane %v1307_v48, %v2779_v45 }
 0x3bc   :  { %2467 = vpush %v1440_v24 }
 0x3ed   :  { %s2468_s18 = spop %2467 }
 0x3f2   :  { %v1022_v46 = vpop.permute.xlu0 %1021  ;;  %v1020_v33 = vpop.permute.xlu1 %1019 }
 0x3f3   :  { %v1052_v40 = vmul.f32 %v3259_v15, %v1022_v46  ;;  %v1051_v18 = vmul.f32 %v3261_v35, %v1020_v33 }
 0x3f5   :  { %v1054_v27 = vsub.f32 %v1050_v6, %v1052_v40  ;;  %v1053_v9 = vsub.f32 %v1049_v55, %v1051_v18  ;;  %v652_v40 = vld [vmem:[%s3866_s5] sm:$0x1]  ;;  %v1356_v55 = vstv %s2464_s12 }
 0x3f6   :  { %v1026_v54 = vpop.permute.xlu0 %1025  ;;  %v1024_v59 = vpop.permute.xlu1 %1023 }
 0x3f7   :  { %v1046_v49 = vmul.f32 %v3259_v15, %v1026_v54  ;;  %v1045_v28 = vmul.f32 %v3261_v35, %v1024_v59  ;;  %v1319_v58 = vmul.f32 %v1317_v57, %v1054_v27  ;;  %v1323_v10 = vmul.f32 %v1311_v17, %v1054_v27 }
 0x3f8   :  { %v1318_v62 = vmul.f32 %v1317_v57, %v1053_v9  ;;  %v1322_v7 = vmul.f32 %v1311_v17, %v1053_v9 }
 0x3f9   :  { %v1048_v50 = vadd.f32 %v1046_v49, %v1036_v13  ;;  %v1047_v5 = vadd.f32 %v1045_v28, %v1035_v23 }
 0x3fb   :  { %v1313_v53 = vmul.f32 %v1311_v17, %v1048_v50  ;;  %v1325_v47 = vmul.f32 %v1317_v57, %v1048_v50  ;;  %v1312_v0 = vmul.f32 %v1311_v17, %v1047_v5  ;;  %v1324_v8 = vmul.f32 %v1317_v57, %v1047_v5 }
 0x3fd   :  { %v1321_v4 = vadd.f32 %v1319_v58, %v1313_v53  ;;  %v1327_v46 = vsub.f32 %v1323_v10, %v1325_v47  ;;  %v1320_v31 = vadd.f32 %v1318_v62, %v1312_v0  ;;  %v1326_v29 = vsub.f32 %v1322_v7, %v1324_v8 }
 0x3ff   :  { %1336 = vrot.lane.b32.xlu1 %v1321_v4, %s2586_s0  ;;  %1334 = vrot.lane.b32.xlu0 %v1320_v31, %s2586_s0  ;;  %v1359_v9 = vmul.f32 %v1356_v55, %v1321_v4  ;;  %v1358_v28 = vmul.f32 %v1356_v55, %v1320_v31  ;;  %v1369_v47 = vmul.f32 %v1356_v55, %v1327_v46 }
 0x400   :  { %v1368_v8 = vmul.f32 %v1356_v55, %v1326_v29 }
 0x403   :  { %1340 = vrot.lane.b32.xlu1 %v1321_v4, %s2588_s1  ;;  %1338 = vrot.lane.b32.xlu0 %v1320_v31, %s2588_s1 }
 0x407   :  { %1346 = vrot.lane.b32.xlu1 %v1327_v46, %s2586_s0  ;;  %1344 = vrot.lane.b32.xlu0 %v1326_v29, %s2586_s0  ;;  %v3289_v33 = vpop.permute.xlu1 %1330 }
 0x408   :  { %v1333_v18 = vmul.f32 %v3289_v33, %v652_v40  ;;  %v1483_v40 = vrot.slane %v3120_v43, 3 }
 0x40a   :  { %v1363_v48 = vrot.slane %v1333_v18, %v2779_v45  ;;  %2469 = vpush %v1483_v40 }
 0x40b   :  { %1350 = vrot.lane.b32.xlu1 %v1327_v46, %s2588_s1  ;;  %1348 = vrot.lane.b32.xlu0 %v1326_v29, %s2588_s1  ;;  %v1374_v46 = vrot.slane %v3289_v33, 1  ;;  %v653_v29 = vld [vmem:[%s3866_s5 + $0x1] sm:$0x1] }
 0x43b   :  { %s2470_s21 = spop %2469 }
 0x471   :  { %v1337_v6 = vpop.permute.xlu1 %1336  ;;  %v1335_v56 = vpop.permute.xlu0 %1334 }
 0x475   :  { %v1341_v54 = vpop.permute.xlu1 %1340  ;;  %v1339_v13 = vpop.permute.xlu0 %1338 }
 0x476   :  { %v1343_v27 = vsel %vm2783_vm2, %v1337_v6, %v1341_v54  ;;  %v1342_v59 = vsel %vm2783_vm2, %v1335_v56, %v1339_v13  ;;  %v1376_v6 = vmul.f32 %v1374_v46, %v653_v29 }
 0x477   :  { %v1365_v49 = vmul.f32 %v1363_v48, %v1343_v27  ;;  %v1364_v23 = vmul.f32 %v1363_v48, %v1342_v59 }
 0x478   :  { %v1406_v55 = vrot.slane %v1376_v6, %v2779_v45 }
 0x479   :  { %v1347_v17 = vpop.permute.xlu1 %1346  ;;  %v1367_v57 = vadd.f32 %v1365_v49, %v1359_v9  ;;  %v1345_v50 = vpop.permute.xlu0 %1344  ;;  %v1366_v5 = vadd.f32 %v1364_v23, %v1358_v28 }
 0x47b   :  { %1379 = vrot.lane.b32.xlu1 %v1367_v57, %s2589_s25  ;;  %1377 = vrot.lane.b32.xlu0 %v1366_v5, %s2589_s25 }
 0x47d   :  { %v1351_v58 = vpop.permute.xlu1 %1350  ;;  %v1349_v53 = vpop.permute.xlu0 %1348 }
 0x47e   :  { %v1353_v10 = vsel %vm2783_vm2, %v1347_v17, %v1351_v58  ;;  %v1352_v7 = vsel %vm2783_vm2, %v1345_v50, %v1349_v53 }
 0x47f   :  { %v1371_v62 = vmul.f32 %v1363_v48, %v1353_v10  ;;  %1383 = vrot.lane.b32.xlu1 %v1367_v57, %s2591_s26  ;;  %v1370_v0 = vmul.f32 %v1363_v48, %v1352_v7  ;;  %1381 = vrot.lane.b32.xlu0 %v1366_v5, %s2591_s26  ;;  %v1399_v48 = vstv %s2466_s15 }
 0x480   :  { %v1402_v49 = vmul.f32 %v1399_v48, %v1367_v57  ;;  %v1401_v28 = vmul.f32 %v1399_v48, %v1366_v5 }
 0x481   :  { %v1373_v4 = vadd.f32 %v1371_v62, %v1369_v47  ;;  %v1372_v31 = vadd.f32 %v1370_v0, %v1368_v8 }
 0x483   :  { %1389 = vrot.lane.b32.xlu1 %v1373_v4, %s2589_s25  ;;  %1387 = vrot.lane.b32.xlu0 %v1372_v31, %s2589_s25  ;;  %v1412_v57 = vmul.f32 %v1399_v48, %v1373_v4  ;;  %v1411_v8 = vmul.f32 %v1399_v48, %v1372_v31 }
 0x487   :  { %1393 = vrot.lane.b32.xlu1 %v1373_v4, %s2591_s26  ;;  %1391 = vrot.lane.b32.xlu0 %v1372_v31, %s2591_s26  ;;  %v1417_v4 = vrot.slane %v3289_v33, 2  ;;  %v654_v31 = vld [vmem:[%s3866_s5 + $0x2] sm:$0x1] }
 0x4ed   :  { %v1380_v18 = vpop.permute.xlu1 %1379  ;;  %v1378_v56 = vpop.permute.xlu0 %1377 }
 0x4f1   :  { %v1384_v54 = vpop.permute.xlu1 %1383  ;;  %v1382_v13 = vpop.permute.xlu0 %1381 }
 0x4f2   :  { %v1386_v27 = vsel %vm2824_vm4, %v1380_v18, %v1384_v54  ;;  %v1385_v9 = vsel %vm2824_vm4, %v1378_v56, %v1382_v13  ;;  %v1526_v18 = vrot.slane %v3120_v43, 4  ;;  %v1419_v56 = vmul.f32 %v1417_v4, %v654_v31 }
 0x4f3   :  { %v1408_v59 = vmul.f32 %v1406_v55, %v1386_v27  ;;  %v1407_v23 = vmul.f32 %v1406_v55, %v1385_v9 }
 0x4f4   :  { %2471 = vpush %v1526_v18  ;;  %v1449_v54 = vrot.slane %v1419_v56, %v2779_v45  ;;  %v1569_v56 = vrot.slane %v3120_v43, 5 }
 0x4f5   :  { %v1410_v17 = vadd.f32 %v1408_v59, %v1402_v49  ;;  %v1390_v50 = vpop.permute.xlu1 %1389  ;;  %v1388_v58 = vpop.permute.xlu0 %1387  ;;  %v1409_v10 = vadd.f32 %v1407_v23, %v1401_v28 }
 0x4f6   :  { %2473 = vpush %v1569_v56 }
 0x4f7   :  { %1422 = vrot.lane.b32.xlu1 %v1410_v17, %s2592_s27  ;;  %1420 = vrot.lane.b32.xlu0 %v1409_v10, %s2592_s27 }
 0x4f9   :  { %v1394_v53 = vpop.permute.xlu1 %1393  ;;  %v1392_v62 = vpop.permute.xlu0 %1391 }
 0x4fa   :  { %v1396_v47 = vsel %vm2824_vm4, %v1390_v50, %v1394_v53  ;;  %v1395_v0 = vsel %vm2824_vm4, %v1388_v58, %v1392_v62 }
 0x4fb   :  { %v1414_v7 = vmul.f32 %v1406_v55, %v1396_v47  ;;  %1426 = vrot.lane.b32.xlu1 %v1410_v17, %s2594_s28  ;;  %v1413_v5 = vmul.f32 %v1406_v55, %v1395_v0  ;;  %1424 = vrot.lane.b32.xlu0 %v1409_v10, %s2594_s28  ;;  %v1442_v55 = vstv %s2468_s18 }
 0x4fc   :  { %v1445_v59 = vmul.f32 %v1442_v55, %v1410_v17  ;;  %v1444_v28 = vmul.f32 %v1442_v55, %v1409_v10 }
 0x4fd   :  { %v1416_v46 = vadd.f32 %v1414_v7, %v1412_v57  ;;  %v1415_v29 = vadd.f32 %v1413_v5, %v1411_v8 }
 0x4ff   :  { %1432 = vrot.lane.b32.xlu1 %v1416_v46, %s2592_s27  ;;  %1430 = vrot.lane.b32.xlu0 %v1415_v29, %s2592_s27  ;;  %v1455_v17 = vmul.f32 %v1442_v55, %v1416_v46  ;;  %v1454_v10 = vmul.f32 %v1442_v55, %v1415_v29 }
 0x503   :  { %1436 = vrot.lane.b32.xlu1 %v1416_v46, %s2594_s28  ;;  %1434 = vrot.lane.b32.xlu0 %v1415_v29, %s2594_s28  ;;  %v1460_v46 = vrot.slane %v3289_v33, 3  ;;  %v655_v29 = vld [vmem:[%s3866_s5 + $0x3] sm:$0x1] }
 0x505   :  { %v1462_v55 = vmul.f32 %v1460_v46, %v655_v29 }
 0x525   :  { %s2472_s24 = spop %2471 }
 0x527   :  { %s2474_s12 = spop %2473 }
 0x569   :  { %v1423_v6 = vpop.permute.xlu1 %1422  ;;  %v1421_v48 = vpop.permute.xlu0 %1420 }
 0x56d   :  { %v1427_v27 = vpop.permute.xlu1 %1426  ;;  %v1425_v49 = vpop.permute.xlu0 %1424 }
 0x56e   :  { %v1429_v13 = vsel %vm2869_vm6, %v1423_v6, %v1427_v27  ;;  %v1428_v23 = vsel %vm2869_vm6, %v1421_v48, %v1425_v49  ;;  %v1485_v27 = vstv %s2470_s21 }
 0x56f   :  { %v1451_v9 = vmul.f32 %v1449_v54, %v1429_v13  ;;  %v1450_v50 = vmul.f32 %v1449_v54, %v1428_v23  ;;  %v1492_v13 = vrot.slane %v1462_v55, %v2779_v45 }
 0x571   :  { %v1453_v58 = vadd.f32 %v1451_v9, %v1445_v59  ;;  %v1433_v53 = vpop.permute.xlu1 %1432  ;;  %v1452_v47 = vadd.f32 %v1450_v50, %v1444_v28  ;;  %v1431_v62 = vpop.permute.xlu0 %1430 }
 0x573   :  { %1465 = vrot.lane.b32.xlu1 %v1453_v58, %s2595_s29  ;;  %1463 = vrot.lane.b32.xlu0 %v1452_v47, %s2595_s29  ;;  %v1488_v23 = vmul.f32 %v1485_v27, %v1453_v58 }
 0x575   :  { %v1437_v57 = vpop.permute.xlu1 %1436  ;;  %v1435_v0 = vpop.permute.xlu0 %1434 }
 0x576   :  { %v1439_v7 = vsel %vm2869_vm6, %v1433_v53, %v1437_v57  ;;  %v1438_v8 = vsel %vm2869_vm6, %v1431_v62, %v1435_v0  ;;  %v1487_v53 = vmul.f32 %v1485_v27, %v1452_v47 }
 0x577   :  { %v1457_v5 = vmul.f32 %v1449_v54, %v1439_v7  ;;  %1469 = vrot.lane.b32.xlu1 %v1453_v58, %s2597_s30  ;;  %v1456_v4 = vmul.f32 %v1449_v54, %v1438_v8  ;;  %1467 = vrot.lane.b32.xlu0 %v1452_v47, %s2597_s30 }
 0x579   :  { %v1459_v31 = vadd.f32 %v1457_v5, %v1455_v17  ;;  %v1458_v6 = vadd.f32 %v1456_v4, %v1454_v10 }
 0x57b   :  { %1475 = vrot.lane.b32.xlu1 %v1459_v31, %s2595_s29  ;;  %1473 = vrot.lane.b32.xlu0 %v1458_v6, %s2595_s29  ;;  %v1498_v58 = vmul.f32 %v1485_v27, %v1459_v31  ;;  %v1497_v47 = vmul.f32 %v1485_v27, %v1458_v6 }
 0x57f   :  { %1479 = vrot.lane.b32.xlu1 %v1459_v31, %s2597_s30  ;;  %1477 = vrot.lane.b32.xlu0 %v1458_v6, %s2597_s30  ;;  %v1503_v31 = vrot.slane %v3289_v33, 4  ;;  %v656_v6 = vld [vmem:[%s3866_s5 + $0x4] sm:$0x1] }
 0x5e5   :  { %v1466_v48 = vpop.permute.xlu1 %1465  ;;  %v1464_v54 = vpop.permute.xlu0 %1463 }
 0x5e9   :  { %v1470_v49 = vpop.permute.xlu1 %1469  ;;  %v1468_v9 = vpop.permute.xlu0 %1467 }
 0x5ea   :  { %v1472_v59 = vsel %vm2915_vm8, %v1466_v48, %v1470_v49  ;;  %v1471_v50 = vsel %vm2915_vm8, %v1464_v54, %v1468_v9  ;;  %v1600_v54 = vrot.slane %v3120_v43, 6 }
 0x5eb   :  { %v1494_v28 = vmul.f32 %v1492_v13, %v1472_v59  ;;  %v1493_v62 = vmul.f32 %v1492_v13, %v1471_v50  ;;  %v1528_v59 = vstv %s2472_s24 }
 0x5ec   :  { %2475 = vpush %v1600_v54 }
 0x5ed   :  { %v1496_v57 = vadd.f32 %v1494_v28, %v1488_v23  ;;  %v1476_v7 = vpop.permute.xlu1 %1475  ;;  %v1495_v0 = vadd.f32 %v1493_v62, %v1487_v53  ;;  %v1474_v17 = vpop.permute.xlu0 %1473 }
 0x5ef   :  { %1508 = vrot.lane.b32.xlu1 %v1496_v57, %s2598_s7  ;;  %1506 = vrot.lane.b32.xlu0 %v1495_v0, %s2598_s7  ;;  %v1531_v53 = vmul.f32 %v1528_v59, %v1496_v57 }
 0x5f1   :  { %v1480_v5 = vpop.permute.xlu1 %1479  ;;  %v1478_v10 = vpop.permute.xlu0 %1477 }
 0x5f2   :  { %v1482_v8 = vsel %vm2915_vm8, %v1476_v7, %v1480_v5  ;;  %v1481_v46 = vsel %vm2915_vm8, %v1474_v17, %v1478_v10  ;;  %v1530_v17 = vmul.f32 %v1528_v59, %v1495_v0 }
 0x5f3   :  { %v1500_v4 = vmul.f32 %v1492_v13, %v1482_v8  ;;  %1512 = vrot.lane.b32.xlu1 %v1496_v57, %s2600_s8  ;;  %v1499_v29 = vmul.f32 %v1492_v13, %v1481_v46  ;;  %1510 = vrot.lane.b32.xlu0 %v1495_v0, %s2600_s8  ;;  %v1505_v13 = vmul.f32 %v1503_v31, %v656_v6 }
 0x5f5   :  { %v1502_v48 = vadd.f32 %v1500_v4, %v1498_v58  ;;  %v1501_v55 = vadd.f32 %v1499_v29, %v1497_v47  ;;  %v1535_v9 = vrot.slane %v1505_v13, %v2779_v45 }
 0x5f7   :  { %1518 = vrot.lane.b32.xlu1 %v1502_v48, %s2598_s7  ;;  %1516 = vrot.lane.b32.xlu0 %v1501_v55, %s2598_s7  ;;  %v1541_v57 = vmul.f32 %v1528_v59, %v1502_v48  ;;  %v1540_v0 = vmul.f32 %v1528_v59, %v1501_v55 }
 0x5fb   :  { %1522 = vrot.lane.b32.xlu1 %v1502_v48, %s2600_s8  ;;  %1520 = vrot.lane.b32.xlu0 %v1501_v55, %s2600_s8  ;;  %v1546_v48 = vrot.slane %v3289_v33, 5 }
 0x61d   :  { %s2476_s15 = spop %2475 }
 0x661   :  { %v1509_v27 = vpop.permute.xlu1 %1508  ;;  %v1507_v49 = vpop.permute.xlu0 %1506 }
 0x665   :  { %v1513_v23 = vpop.permute.xlu1 %1512  ;;  %v1511_v50 = vpop.permute.xlu0 %1510 }
 0x666   :  { %v1515_v28 = vsel %vm2966_vm10, %v1509_v27, %v1513_v23  ;;  %v1514_v7 = vsel %vm2966_vm10, %v1507_v49, %v1511_v50  ;;  %v657_v23 = vld [vmem:[%s3866_s5 + $0x5] sm:$0x1] }
 0x667   :  { %v1537_v62 = vmul.f32 %v1535_v9, %v1515_v28  ;;  %v1536_v5 = vmul.f32 %v1535_v9, %v1514_v7  ;;  %v1548_v59 = vmul.f32 %v1546_v48, %v657_v23  ;;  %v1571_v28 = vstv %s2474_s12 }
 0x669   :  { %v1539_v8 = vadd.f32 %v1537_v62, %v1531_v53  ;;  %v1519_v10 = vpop.permute.xlu1 %1518  ;;  %v1538_v58 = vadd.f32 %v1536_v5, %v1530_v17  ;;  %v1517_v4 = vpop.permute.xlu0 %1516  ;;  %v1578_v50 = vrot.slane %v1548_v59, %v2779_v45 }
 0x66b   :  { %1551 = vrot.lane.b32.xlu1 %v1539_v8, %s2602_s2  ;;  %1549 = vrot.lane.b32.xlu0 %v1538_v58, %s2602_s2  ;;  %v1574_v17 = vmul.f32 %v1571_v28, %v1539_v8 }
 0x66d   :  { %v1523_v46 = vpop.permute.xlu1 %1522  ;;  %v1521_v29 = vpop.permute.xlu0 %1520 }
 0x66e   :  { %v1525_v47 = vsel %vm2966_vm10, %v1519_v10, %v1523_v46  ;;  %v1524_v6 = vsel %vm2966_vm10, %v1517_v4, %v1521_v29  ;;  %v1573_v4 = vmul.f32 %v1571_v28, %v1538_v58 }
 0x66f   :  { %v1543_v31 = vmul.f32 %v1535_v9, %v1525_v47  ;;  %1555 = vrot.lane.b32.xlu1 %v1539_v8, %s2603_s3  ;;  %v1542_v27 = vmul.f32 %v1535_v9, %v1524_v6  ;;  %1553 = vrot.lane.b32.xlu0 %v1538_v58, %s2603_s3 }
 0x671   :  { %v1545_v13 = vadd.f32 %v1543_v31, %v1541_v57  ;;  %v1544_v49 = vadd.f32 %v1542_v27, %v1540_v0 }
 0x673   :  { %1561 = vrot.lane.b32.xlu1 %v1545_v13, %s2602_s2  ;;  %1559 = vrot.lane.b32.xlu0 %v1544_v49, %s2602_s2  ;;  %v1584_v8 = vmul.f32 %v1571_v28, %v1545_v13  ;;  %v1583_v58 = vmul.f32 %v1571_v28, %v1544_v49 }
 0x677   :  { %1565 = vrot.lane.b32.xlu1 %v1545_v13, %s2603_s3  ;;  %1563 = vrot.lane.b32.xlu0 %v1544_v49, %s2603_s3 }
 0x6dd   :  { %v1552_v55 = vpop.permute.xlu1 %1551  ;;  %v1550_v9 = vpop.permute.xlu0 %1549 }
 0x6e1   :  { %v1556_v53 = vpop.permute.xlu1 %1555  ;;  %v1554_v7 = vpop.permute.xlu0 %1553 }
 0x6e2   :  { %v1558_v62 = vsel %vm3157_vm0, %v1552_v55, %v1556_v53  ;;  %v1557_v10 = vsel %vm3157_vm0, %v1550_v9, %v1554_v7  ;;  %v1589_v53 = vrot.slane %v3289_v33, 6  ;;  %v1602_v7 = vstv %s2476_s15 }
 0x6e3   :  { %v1580_v5 = vmul.f32 %v1578_v50, %v1558_v62  ;;  %v1579_v46 = vmul.f32 %v1578_v50, %v1557_v10  ;;  %v658_v62 = vld [vmem:[%s3866_s5 + $0x6] sm:$0x1] }
 0x6e4   :  { %v1591_v13 = vmul.f32 %v1589_v53, %v658_v62 }
 0x6e5   :  { %v1582_v47 = vadd.f32 %v1580_v5, %v1574_v17  ;;  %v1562_v29 = vpop.permute.xlu1 %1561  ;;  %v1581_v57 = vadd.f32 %v1579_v46, %v1573_v4  ;;  %v1560_v31 = vpop.permute.xlu0 %1559 }
 0x6e6   :  { %v1609_v17 = vrot.slane %v1591_v13, %v2779_v45 }
 0x6e7   :  { %1594 = vrot.lane.b32.xlu1 %v1582_v47, %s2604_s9  ;;  %1592 = vrot.lane.b32.xlu0 %v1581_v57, %s2604_s9  ;;  %v1605_v49 = vmul.f32 %v1602_v7, %v1582_v47  ;;  %v1604_v10 = vmul.f32 %v1602_v7, %v1581_v57 }
 0x6e9   :  { %v1566_v6 = vpop.permute.xlu1 %1565  ;;  %v1564_v27 = vpop.permute.xlu0 %1563 }
 0x6ea   :  { %v1568_v0 = vsel %vm3157_vm0, %v1562_v29, %v1566_v6  ;;  %v1567_v23 = vsel %vm3157_vm0, %v1560_v31, %v1564_v27 }
 0x6eb   :  { %v1586_v48 = vmul.f32 %v1578_v50, %v1568_v0  ;;  %v1585_v55 = vmul.f32 %v1578_v50, %v1567_v23 }
 0x6ed   :  { %v1588_v59 = vadd.f32 %v1586_v48, %v1584_v8  ;;  %v1587_v9 = vadd.f32 %v1585_v55, %v1583_v58 }
 0x6ef   :  { %1598 = vrot.lane.b32.xlu1 %v1588_v59, %s2604_s9  ;;  %1596 = vrot.lane.b32.xlu0 %v1587_v9, %s2604_s9  ;;  %v1615_v31 = vmul.f32 %v1602_v7, %v1588_v59  ;;  %v1614_v27 = vmul.f32 %v1602_v7, %v1587_v9 }
 0x759   :  { %v1595_v5 = vpop.permute.xlu1 %1594  ;;  %v1593_v50 = vpop.permute.xlu0 %1592 }
 0x75a   :  { %v1611_v28 = vmul.f32 %v1609_v17, %v1595_v5  ;;  %v1610_v4 = vmul.f32 %v1609_v17, %v1593_v50 }
 0x75c   :  { %v1613_v46 = vadd.f32 %v1611_v28, %v1605_v49  ;;  %v1612_v29 = vadd.f32 %v1610_v4, %v1604_v10 }
 0x75e   :  { %1622 = vrot.lane.b32.xlu1 %v1613_v46, %s2586_s0  ;;  %1620 = vrot.lane.b32.xlu0 %v1612_v29, %s2586_s0  ;;  %v1641_v7 = vmul.f32 %v1613_v46, %v2777_v42  ;;  %v1640_v49 = vmul.f32 %v1612_v29, %v2772_v38 }
 0x761   :  { %v1599_v33 = vpop.permute.xlu1 %1598  ;;  %v1597_v0 = vpop.permute.xlu0 %1596 }
 0x762   :  { %v1617_v6 = vmul.f32 %v1609_v17, %v1599_v33  ;;  %1626 = vrot.lane.b32.xlu1 %v1613_v46, %s2588_s1  ;;  %v1616_v8 = vmul.f32 %v1609_v17, %v1597_v0  ;;  %1624 = vrot.lane.b32.xlu0 %v1612_v29, %s2588_s1 }
 0x764   :  { %v1619_v47 = vadd.f32 %v1617_v6, %v1615_v31  ;;  %v1618_v48 = vadd.f32 %v1616_v8, %v1614_v27 }
 0x766   :  { %1632 = vrot.lane.b32.xlu1 %v1619_v47, %s2586_s0  ;;  %1630 = vrot.lane.b32.xlu0 %v1618_v48, %s2586_s0  ;;  %v1647_v29 = vmul.f32 %v1619_v47, %v2777_v42  ;;  %v1646_v6 = vmul.f32 %v1618_v48, %v2772_v38 }
 0x76a   :  { %1636 = vrot.lane.b32.xlu1 %v1619_v47, %s2588_s1  ;;  %1634 = vrot.lane.b32.xlu0 %v1618_v48, %s2588_s1 }
 0x7d0   :  { %v1623_v57 = vpop.permute.xlu1 %1622  ;;  %v1621_v23 = vpop.permute.xlu0 %1620 }
 0x7d4   :  { %v1627_v58 = vpop.permute.xlu1 %1626  ;;  %v1625_v55 = vpop.permute.xlu0 %1624 }
 0x7d5   :  { %v1629_v10 = vsel %vm2783_vm2, %v1623_v57, %v1627_v58  ;;  %v1628_v33 = vsel %vm2783_vm2, %v1621_v23, %v1625_v55 }
 0x7d6   :  { %v1649_v46 = vmul.f32 %v1629_v10, %v2775_v41  ;;  %v1648_v31 = vmul.f32 %v1628_v33, %v2770_v36 }
 0x7d8   :  { %v1633_v59 = vpop.permute.xlu1 %1632  ;;  %v1631_v53 = vpop.permute.xlu0 %1630  ;;  %v1651_v0 = vsub.f32 %v1647_v29, %v1649_v46  ;;  %v1650_v27 = vsub.f32 %v1646_v6, %v1648_v31 }
 0x7dc   :  { %v1637_v9 = vpop.permute.xlu1 %1636  ;;  %v1635_v13 = vpop.permute.xlu0 %1634 }
 0x7dd   :  { %v1639_v62 = vsel %vm2783_vm2, %v1633_v59, %v1637_v9  ;;  %v1638_v5 = vsel %vm2783_vm2, %v1631_v53, %v1635_v13 }
 0x7de   :  { %v1643_v17 = vmul.f32 %v1639_v62, %v2775_v41  ;;  %v1642_v28 = vmul.f32 %v1638_v5, %v2770_v36 }
 0x7e0   :  { %v1645_v50 = vadd.f32 %v1643_v17, %v1641_v7  ;;  %v1644_v4 = vadd.f32 %v1642_v28, %v1640_v49  ;;  %v1679_v28 = vmul.f32 %v1651_v0, %v2818_v3 }
 0x7e2   :  { %1654 = vrot.lane.b32.xlu1 %v1645_v50, %s2589_s25  ;;  %1652 = vrot.lane.b32.xlu0 %v1644_v4, %s2589_s25  ;;  %v1673_v58 = vmul.f32 %v1645_v50, %v2818_v3  ;;  %v1672_v53 = vmul.f32 %v1644_v4, %v2813_v25 }
 0x7e6   :  { %1658 = vrot.lane.b32.xlu1 %v1645_v50, %s2591_s26  ;;  %1656 = vrot.lane.b32.xlu0 %v1644_v4, %s2591_s26  ;;  %v1678_v50 = vmul.f32 %v1650_v27, %v2813_v25 }
 0x7ea   :  { %1664 = vrot.lane.b32.xlu1 %v1651_v0, %s2589_s25  ;;  %1662 = vrot.lane.b32.xlu0 %v1650_v27, %s2589_s25 }
 0x7ee   :  { %1668 = vrot.lane.b32.xlu1 %v1651_v0, %s2591_s26  ;;  %1666 = vrot.lane.b32.xlu0 %v1650_v27, %s2591_s26 }
 0x854   :  { %v1655_v41 = vpop.permute.xlu1 %1654  ;;  %v1653_v36 = vpop.permute.xlu0 %1652 }
 0x858   :  { %v1659_v8 = vpop.permute.xlu1 %1658  ;;  %v1657_v42 = vpop.permute.xlu0 %1656 }
 0x859   :  { %v1661_v13 = vsel %vm2824_vm4, %v1655_v41, %v1659_v8  ;;  %v1660_v17 = vsel %vm2824_vm4, %v1653_v36, %v1657_v42 }
 0x85a   :  { %v1681_v5 = vmul.f32 %v1661_v13, %v2820_v16  ;;  %v1680_v49 = vmul.f32 %v1660_v17, %v2815_v14 }
 0x85c   :  { %v1665_v47 = vpop.permute.xlu1 %1664  ;;  %v1663_v57 = vpop.permute.xlu0 %1662  ;;  %v1683_v10 = vsub.f32 %v1679_v28, %v1681_v5  ;;  %v1682_v4 = vsub.f32 %v1678_v50, %v1680_v49  ;;  %v3945_v49 = vld [vmem:[#allocation4_spill] sm:$0xff] }
 0x860   :  { %v1669_v23 = vpop.permute.xlu1 %1668  ;;  %v1667_v48 = vpop.permute.xlu0 %1666 }
 0x861   :  { %v1671_v38 = vsel %vm2824_vm4, %v1665_v47, %v1669_v23  ;;  %v1670_v59 = vsel %vm2824_vm4, %v1663_v57, %v1667_v48 }
 0x862   :  { %v1675_v55 = vmul.f32 %v1671_v38, %v2820_v16  ;;  %v1674_v9 = vmul.f32 %v1670_v59, %v2815_v14 }
 0x864   :  { %v1677_v62 = vadd.f32 %v1675_v55, %v1673_v58  ;;  %v1676_v7 = vadd.f32 %v1674_v9, %v1672_v53  ;;  %v1711_v58 = vmul.f32 %v1683_v10, %v2860_v61  ;;  %v1710_v55 = vmul.f32 %v1682_v4, %v2858_v60 }
 0x866   :  { %1686 = vrot.lane.b32.xlu1 %v1677_v62, %s2592_s27  ;;  %1684 = vrot.lane.b32.xlu0 %v1676_v7, %s2592_s27  ;;  %v1705_v0 = vmul.f32 %v1677_v62, %v2860_v61  ;;  %v1704_v36 = vmul.f32 %v1676_v7, %v2858_v60 }
 0x86a   :  { %1690 = vrot.lane.b32.xlu1 %v1677_v62, %s2594_s28  ;;  %1688 = vrot.lane.b32.xlu0 %v1676_v7, %s2594_s28 }
 0x86e   :  { %1696 = vrot.lane.b32.xlu1 %v1683_v10, %s2592_s27  ;;  %1694 = vrot.lane.b32.xlu0 %v1682_v4, %s2592_s27 }
 0x872   :  { %1700 = vrot.lane.b32.xlu1 %v1683_v10, %s2594_s28  ;;  %1698 = vrot.lane.b32.xlu0 %v1682_v4, %s2594_s28  ;;  %v3946_v10 = vld [vmem:[#allocation2_spill] sm:$0xff] }
 0x8d8   :  { %v1687_v16 = vpop.permute.xlu1 %1686  ;;  %v1685_v14 = vpop.permute.xlu0 %1684 }
 0x8dc   :  { %v1691_v33 = vpop.permute.xlu1 %1690  ;;  %v1689_v3 = vpop.permute.xlu0 %1688 }
 0x8dd   :  { %v1693_v47 = vsel %vm2869_vm6, %v1687_v16, %v1691_v33  ;;  %v1692_v23 = vsel %vm2869_vm6, %v1685_v14, %v1689_v3  ;;  %v3947_v16 = vld [vmem:[#allocation3_spill] sm:$0xff] }
 0x8de   :  { %v1713_v38 = vmul.f32 %v1693_v47, %v2865_v1  ;;  %v1712_v48 = vmul.f32 %v1692_v23, %v2862_v63 }
 0x8e0   :  { %v1697_v46 = vpop.permute.xlu1 %1696  ;;  %v1695_v31 = vpop.permute.xlu0 %1694  ;;  %v1715_v59 = vsub.f32 %v1711_v58, %v1713_v38  ;;  %v1714_v53 = vsub.f32 %v1710_v55, %v1712_v48 }
 0x8e4   :  { %v1701_v29 = vpop.permute.xlu1 %1700  ;;  %v1699_v6 = vpop.permute.xlu0 %1698 }
 0x8e5   :  { %v1703_v25 = vsel %vm2869_vm6, %v1697_v46, %v1701_v29  ;;  %v1702_v41 = vsel %vm2869_vm6, %v1695_v31, %v1699_v6  ;;  %v1743_v6 = vmul.f32 %v1715_v59, %v2906_v37 }
 0x8e6   :  { %v1707_v27 = vmul.f32 %v1703_v25, %v2865_v1  ;;  %v1706_v8 = vmul.f32 %v1702_v41, %v2862_v63 }
 0x8e8   :  { %v1709_v42 = vadd.f32 %v1707_v27, %v1705_v0  ;;  %v1708_v57 = vadd.f32 %v1706_v8, %v1704_v36  ;;  %v1742_v0 = vmul.f32 %v1714_v53, %v3946_v10  ;;  %v3948_v36 = vld [vmem:[#allocation5_spill] sm:$0xff] }
 0x8ea   :  { %1718 = vrot.lane.b32.xlu1 %v1709_v42, %s2595_s29  ;;  %1716 = vrot.lane.b32.xlu0 %v1708_v57, %s2595_s29  ;;  %v1737_v5 = vmul.f32 %v1709_v42, %v2906_v37  ;;  %v1736_v4 = vmul.f32 %v1708_v57, %v3946_v10 }
 0x8ee   :  { %1722 = vrot.lane.b32.xlu1 %v1709_v42, %s2597_s30  ;;  %1720 = vrot.lane.b32.xlu0 %v1708_v57, %s2597_s30 }
 0x8f2   :  { %1728 = vrot.lane.b32.xlu1 %v1715_v59, %s2595_s29  ;;  %1726 = vrot.lane.b32.xlu0 %v1714_v53, %s2595_s29 }
 0x8f6   :  { %1732 = vrot.lane.b32.xlu1 %v1715_v59, %s2597_s30  ;;  %1730 = vrot.lane.b32.xlu0 %v1714_v53, %s2597_s30  ;;  %v3949_v53 = vld [vmem:[#allocation6_spill] sm:$0xff] }
 0x95c   :  { %v1719_v1 = vpop.permute.xlu1 %1718  ;;  %v1717_v63 = vpop.permute.xlu0 %1716 }
 0x960   :  { %v1723_v9 = vpop.permute.xlu1 %1722  ;;  %v1721_v61 = vpop.permute.xlu0 %1720 }
 0x961   :  { %v1725_v3 = vsel %vm2915_vm8, %v1719_v1, %v1723_v9  ;;  %v1724_v31 = vsel %vm2915_vm8, %v1717_v63, %v1721_v61  ;;  %v3950_v63 = vld [vmem:[#allocation8_spill] sm:$0xff] }
 0x962   :  { %v1745_v29 = vmul.f32 %v1725_v3, %v3945_v49  ;;  %v1744_v25 = vmul.f32 %v1724_v31, %v3947_v16  ;;  %v2570_v31 = vld [vmem:[%s3865_s4] sm:$0x1] }
 0x964   :  { %v1729_v62 = vpop.permute.xlu1 %1728  ;;  %v1727_v13 = vpop.permute.xlu0 %1726  ;;  %v1747_v27 = vsub.f32 %v1743_v6, %v1745_v29  ;;  %v1746_v41 = vsub.f32 %v1742_v0, %v1744_v25  ;;  %v3955_v6 = vld [vmem:[#allocation11_spill] sm:$0xff] }
 0x965   :  { %v3956_v0 = vrot.slane %v3955_v6, 6 }
 0x968   :  { %v1733_v7 = vpop.permute.xlu1 %1732  ;;  %v1731_v17 = vpop.permute.xlu0 %1730 }
 0x969   :  { %v1735_v60 = vsel %vm2915_vm8, %v1729_v62, %v1733_v7  ;;  %v1734_v50 = vsel %vm2915_vm8, %v1727_v13, %v1731_v17  ;;  %v3951_v62 = vld [vmem:[#allocation9_spill] sm:$0xff]  ;;  %v3952_v17 = vld [vmem:[#allocation7_spill] sm:$0xff] }
 0x96a   :  { %v1739_v28 = vmul.f32 %v1735_v60, %v3945_v49  ;;  %v1738_v14 = vmul.f32 %v1734_v50, %v3947_v16  ;;  %v1774_v60 = vmul.f32 %v1746_v41, %v3949_v53 }
 0x96c   :  { %v1741_v33 = vadd.f32 %v1739_v28, %v1737_v5  ;;  %v1740_v46 = vadd.f32 %v1738_v14, %v1736_v4  ;;  %v1775_v4 = vmul.f32 %v1747_v27, %v3952_v17 }
 0x96e   :  { %1750 = vrot.lane.b32.xlu1 %v1741_v33, %s2598_s7  ;;  %1748 = vrot.lane.b32.xlu0 %v1740_v46, %s2598_s7  ;;  %v1768_v1 = vmul.f32 %v1740_v46, %v3949_v53  ;;  %v1769_v5 = vmul.f32 %v1741_v33, %v3952_v17 }
 0x972   :  { %1754 = vrot.lane.b32.xlu1 %v1741_v33, %s2600_s8  ;;  %1752 = vrot.lane.b32.xlu0 %v1740_v46, %s2600_s8  ;;  %v3953_v33 = vld [vmem:[#allocation10_spill] sm:$0xff] }
 0x973   :  { %v3954_v3 = vrot.slane %v3953_v33, 7 }
 0x976   :  { %1760 = vrot.lane.b32.xlu1 %v1747_v27, %s2598_s7  ;;  %1758 = vrot.lane.b32.xlu0 %v1746_v41, %s2598_s7 }
 0x97a   :  { %1764 = vrot.lane.b32.xlu1 %v1747_v27, %s2600_s8  ;;  %1762 = vrot.lane.b32.xlu0 %v1746_v41, %s2600_s8 }
 0x97e   :  { %1833 = vperm.xlu0 %2548, %v3948_v36  }
 0x9e0   :  { %v1751_v8 = vpop.permute.xlu1 %1750  ;;  %v1749_v37 = vpop.permute.xlu0 %1748 }
 0x9e4   :  { %v1755_v42 = vpop.permute.xlu1 %1754  ;;  %v1753_v47 = vpop.permute.xlu0 %1752 }
 0x9e5   :  { %v1756_v58 = vsel %vm2966_vm10, %v1749_v37, %v1753_v47  ;;  %v1757_v50 = vsel %vm2966_vm10, %v1751_v8, %v1755_v42  ;;  %v3957_v8 = vld [vmem:[#allocation12_spill] sm:$0xff] }
 0x9e6   :  { %v1776_v61 = vmul.f32 %v1756_v58, %v3950_v63  ;;  %v1777_v10 = vmul.f32 %v1757_v50, %v3951_v62  ;;  %v3958_v37 = vrot.slane %v3957_v8, 5  ;;  %v3967_v8 = vmov 2131351028  }
 0x9e8   :  { %v1761_v57 = vpop.permute.xlu1 %1760  ;;  %v1759_v23 = vpop.permute.xlu0 %1758  ;;  %v3553_v49 = vsub.f32 %v1774_v60, %v1776_v61  ;;  %v3569_v16 = vsub.f32 %v1775_v4, %v1777_v10  ;;  %v3963_v4 = vmov 2102212464  }
 0x9ec   :  { %v1765_v38 = vpop.permute.xlu1 %1764  ;;  %v1763_v48 = vpop.permute.xlu0 %1762 }
 0x9ed   :  { %v1767_v55 = vsel %vm2966_vm10, %v1761_v57, %v1765_v38  ;;  %v1766_v59 = vsel %vm2966_vm10, %v1759_v23, %v1763_v48  ;;  %v3959_v23 = vld [vmem:[#allocation13_spill] sm:$0xff] }
 0x9ee   :  { %v1770_v9 = vmul.f32 %v1766_v59, %v3950_v63  ;;  %v1771_v13 = vmul.f32 %v1767_v55, %v3951_v62  ;;  %v3960_v38 = vrot.slane %v3959_v23, 4  ;;  %v3961_v59 = vld [vmem:[#allocation14_spill] sm:$0xff] }
 0x9ef   :  { %v3962_v53 = vrot.slane %v3961_v59, 3 }
 0x9f0   :  { %v3545_v7 = vadd.f32 %v1770_v9, %v1768_v1  ;;  %v3555_v28 = vadd.f32 %v1771_v13, %v1769_v5 }
 0x9f2   :  { %1784 = vrot.lane.b32.xlu0 %v3545_v7, %s2603_s3  ;;  %1780 = vrot.lane.b32.xlu1 %v3545_v7, %s2602_s2 }
 0x9f6   :  { %1790 = vrot.lane.b32.xlu0 %v3553_v49, %s2602_s2  ;;  %1782 = vrot.lane.b32.xlu1 %v3555_v28, %s2602_s2 }
 0x9fa   :  { %1794 = vrot.lane.b32.xlu0 %v3553_v49, %s2603_s3  ;;  %1786 = vrot.lane.b32.xlu1 %v3555_v28, %s2603_s3 }
 0x9fd   :  { %v1834_v14 = vpop.permute.xlu0 %1833 }
 0x9fe   :  { %1792 = vrot.lane.b32.xlu1 %v3569_v16, %s2602_s2  ;;  %v1837_v46 = vmul.f32 %v1834_v14, %v3954_v3  ;;  %v1836_v29 = vmul.f32 %v2570_v31, %v1834_v14  ;;  %v1842_v27 = vmul.f32 %v1834_v14, %v3956_v0  ;;  %v1847_v42 = vmul.f32 %v1834_v14, %v3958_v37 }
 0x9ff   :  { %v1852_v48 = vmul.f32 %v1834_v14, %v3960_v38  ;;  %v1857_v1 = vmul.f32 %v1834_v14, %v3962_v53  ;;  %v3964_v3 = vmov 920167782  }
 0xa00   :  { %v1839_v25 = vrot.slane %v1837_v46, 1  ;;  %v1844_v36 = vrot.slane %v1842_v27, 2  ;;  %v1849_v57 = vrot.slane %v1847_v42, 3  ;;  %v3966_v27 = vmov 2475754826  }
 0xa01   :  { %v1854_v55 = vrot.slane %v1852_v48, 4  ;;  %v1859_v9 = vrot.slane %v1857_v1, 5 }
 0xa02   :  { %1796 = vrot.lane.b32.xlu1 %v3569_v16, %s2603_s3  ;;  %v1841_v41 = vadd.f32 %v1839_v25, %v1836_v29  ;;  %v3965_v29 = vmov 1326507024  }
 0xa04   :  { %v1846_v47 = vadd.f32 %v1844_v36, %v1841_v41 }
 0xa06   :  { %v1851_v58 = vadd.f32 %v1849_v57, %v1846_v47 }
 0xa08   :  { %v1856_v63 = vadd.f32 %v1854_v55, %v1851_v58 }
 0xa0a   :  { %v3588_v61 = vadd.f32 %v1859_v9, %v1856_v63 }
 0xa0c   :  { %v1865_v62 = vand.u32 2139095040, %v3588_v61  ;;  %v1862_v6 = vand.u32 2147483647, %v3588_v61  ;;  %vm1864_vm9 = vcmp.lt.s32.totalorder %v3588_v61, 0 }
 0xa0e   :  { %v1866_v13 = vshrl.u32 %v1865_v62, 23  ;;  %v1869_v58 = vand.u32 8388607, %v1862_v6  ;;  %vm1863_vm11 = vcmp.le.f32.partialorder %v1862_v6, 0.7853982 }
 0xa10   :  { %v2439_v60 = vadd.s32 4294967169, %v1866_v13  ;;  %v1870_v13 = vor.u32 8388608, %v1869_v58 }
 0xa12   :  { %v1872_v17 = vadd.s32 1, %v2439_v60 }
 0xa14   :  { %vm1873_vm12 = vcmp.gt.s32.totalorder %v1872_v17, 0 }
 0xa15   :  { %v1874_v5 = vsel %vm1873_vm12, %v1872_v17, 0 }
 0xa16   :  { %v1876_v50 = vand.u32 31, %v1874_v5  ;;  %v3593_v31 = vshrl.u32 %v1874_v5, 5 }
 0xa18   :  { %v1877_v10 = vsub.s32 32, %v1876_v50  ;;  %v1888_v33 = vshll.u32 %v3963_v4, %v1876_v50  ;;  %v1891_v14 = vshll.u32 %v3964_v3, %v1876_v50  ;;  %v1879_v0 = vshll.u32 %v3934_v51, %v1876_v50 }
 0xa19   :  { %v1882_v41 = vshll.u32 %v3966_v27, %v1876_v50  ;;  %v1885_v42 = vshll.u32 %v3967_v8, %v1876_v50  ;;  %vm1897_vm14 = vcmp.lt.s32.totalorder %v3593_v31, 4  ;;  %vm1894_vm15 = vcmp.lt.s32.totalorder %v3593_v31, 1 }
 0xa1a   :  { %v1889_v46 = vshrl.u32 %v3964_v3, %v1877_v10  ;;  %v1892_v25 = vshrl.u32 %v3965_v29, %v1877_v10  ;;  %v1880_v36 = vshrl.u32 %v3966_v27, %v1877_v10  ;;  %v1883_v37 = vshrl.u32 %v3967_v8, %v1877_v10 }
 0xa1b   :  { %v1886_v47 = vshrl.u32 %v3963_v4, %v1877_v10  ;;  %vm1896_vm1 = vcmp.lt.s32.totalorder %v3593_v31, 3  ;;  %vm1895_vm3 = vcmp.lt.s32.totalorder %v3593_v31, 2  ;;  %v1800_v29 = vmul.f32 %v3545_v7, %v3128_v2 }
 0xa1c   :  { %v1890_v57 = vor.u32 %v1889_v46, %v1888_v33  ;;  %v1893_v48 = vor.u32 %v1892_v25, %v1891_v14  ;;  %v1881_v55 = vor.u32 %v1880_v36, %v1879_v0  ;;  %v1884_v59 = vor.u32 %v1883_v37, %v1882_v41 }
 0xa1d   :  { %v1887_v53 = vor.u32 %v1886_v47, %v1885_v42  ;;  %v1910_v14 = vshll.u32 %v1870_v13, 8  ;;  %v1806_v47 = vmul.f32 %v3553_v49, %v3128_v2  ;;  %v1878_v7 = vshrl.u32 %v3934_v51, %v1877_v10 }
 0xa1e   :  { %v1903_v1 = vsel %vm1897_vm14, %v1890_v57, 920167782  ;;  %v1907_v62 = vsel %vm1897_vm14, %v1893_v48, 1326507024  ;;  %v1902_v60 = vsel %vm1894_vm15, %v1881_v55, %v1884_v59  ;;  %v1801_v49 = vmul.f32 %v3555_v28, %v3123_v21 }
 0xa1f   :  { %v1904_v17 = vsel %vm1896_vm1, %v1887_v53, %v1903_v1  ;;  %v1906_v4 = vsel %vm1894_vm15, %v1884_v59, %v1887_v53  ;;  %v1908_v33 = vsel %vm1896_vm1, %v1890_v57, %v1907_v62  ;;  %v1898_v10 = vsel %vm1894_vm15, %v1878_v7, %v1881_v55 }
 0xa20   :  { %v1905_v0 = vsel %vm1895_vm3, %v1902_v60, %v1904_v17  ;;  %v1909_v27 = vsel %vm1895_vm3, %v1906_v4, %v1908_v33  ;;  %v1807_v62 = vmul.f32 %v3569_v16, %v3123_v21 }
 0xa21   :  { %v3636_v37 = vmul.u32.u64.low %v1910_v14, %v1905_v0  ;;  %v3637_v42 = vmul.u32.u64.high %v1910_v14, %v1905_v0, %v3636_v37 }
 0xa23   :  { %v1920_v28 = vadd.s32 1, %v3637_v42 }
 0xa64   :  { %v1785_v23 = vpop.permute.xlu0 %1784  ;;  %v1781_v38 = vpop.permute.xlu1 %1780 }
 0xa65   :  { %v1788_v3 = vsel %vm3157_vm0, %v1781_v38, %v1785_v23  ;;  %v3644_v57 = vmul.u32.u64.low %v1910_v14, %v1909_v27  ;;  %v3645_v23 = vmul.u32.u64.high %v1910_v14, %v1909_v27, %v3644_v57 }
 0xa66   :  { %v1808_v41 = vmul.f32 %v1788_v3, %v3125_v30 }
 0xa67   :  { %vm1919_vm5 = vc.u32 %v3645_v23, %v3636_v37 }
 0xa68   :  { %v1791_v63 = vpop.permute.xlu0 %1790  ;;  %v1783_v9 = vpop.permute.xlu1 %1782  ;;  %v3649_v38 = vsub.f32 %v1806_v47, %v1808_v41 }
 0xa6c   :  { %v1795_v5 = vpop.permute.xlu0 %1794  ;;  %v1787_v50 = vpop.permute.xlu1 %1786 }
 0xa6d   :  { %v1798_v46 = vsel %vm3157_vm0, %v1791_v63, %v1795_v5  ;;  %v1789_v58 = vsel %vm3157_vm0, %v1783_v9, %v1787_v50 }
 0xa6e   :  { %v1802_v25 = vmul.f32 %v1798_v46, %v3125_v30  ;;  %v1899_v30 = vsel %vm1897_vm14, %v1887_v53, 2102212464  ;;  %v1809_v1 = vmul.f32 %v1789_v58, %v3130_v20  ;;  %v1918_v46 = vadd.s32 %v3636_v37, %v3645_v23 }
 0xa6f   :  { %v1900_v53 = vsel %vm1896_vm1, %v1884_v59, %v1899_v30  ;;  %v1921_v59 = vsel %vm1919_vm5, %v1920_v28, %v3637_v42  ;;  %vm1954_vm5 = vweird.f32 %v3588_v61 }
 0xa70   :  { %v3634_v36 = vadd.f32 %v1802_v25, %v1800_v29  ;;  %v1793_v8 = vpop.permute.xlu1 %1792  ;;  %v1901_v9 = vsel %vm1895_vm3, %v1898_v10, %v1900_v53  ;;  %v3677_v55 = vsub.f32 %v1807_v62, %v1809_v1 }
 0xa72   :  { %1812 = vrot.lane.b32.xlu0 %v3634_v36, %s2604_s9 }
 0xa74   :  { %v1797_v48 = vpop.permute.xlu1 %1796 }
 0xa75   :  { %v1799_v2 = vsel %vm3157_vm0, %v1793_v8, %v1797_v48 }
 0xa76   :  { %v1803_v51 = vmul.f32 %v1799_v2, %v3130_v20  ;;  %1816 = vrot.lane.b32.xlu0 %v3649_v38, %s2604_s9  ;;  %v1917_v20 = vmul.u32 %v1910_v14, %v1901_v9 }
 0xa78   :  { %v3665_v63 = vadd.f32 %v1803_v51, %v1801_v49  ;;  %v1922_v31 = vadd.s32 %v1921_v59, %v1917_v20 }
 0xa7a   :  { %1814 = vrot.lane.b32.xlu1 %v3665_v63, %s2604_s9  ;;  %2114 = vrot.lane.b32.xlu0 %v3120_v43, %s2588_s1  ;;  %v1923_v21 = vadd.s32 536870912, %v1922_v31 }
 0xa7c   :  { %v1924_v16 = vshrl.u32 %v1923_v21, 30 }
 0xa7e   :  { %1818 = vrot.lane.b32.xlu1 %v3677_v55, %s2604_s9  ;;  %v1925_v13 = vshll.u32 %v1924_v16, 30  ;;  %v1948_v30 = vsub.s32 4, %v1924_v16 }
 0xa80   :  { %v1926_v60 = vsub.s32 %v1922_v31, %v1925_v13  ;;  %v1949_v23 = vsel %vm1864_vm9, %v1948_v30, %v1924_v16  ;;  %v1826_v13 = vmul.f32 %v3649_v38, %v3255_v34 }
 0xa81   :  { %v1951_v48 = vsel %vm1863_vm11, 0, %v1949_v23 }
 0xa82   :  { %2090 = vperm.xlu1 %2549, %v3234_v19   ;;  %v1928_v17 = vsub.s32 0, %v1926_v60  ;;  %v2058_v58 = vadd.s32 3, %v1951_v48  ;;  %v1955_v51 = vand.u32 3, %v1951_v48 }
 0xa84   :  { %v2440_v5 = vmin.u32 %v1928_v17, %v1926_v60  ;;  %v2059_v10 = vand.u32 3, %v2058_v58  ;;  %vm1957_vm13 = vcmp.eq.s32.totalorder %v1955_v51, 0  ;;  %vm1960_vm12 = vcmp.eq.s32.totalorder %v1955_v51, 2 }
 0xa85   :  { %vm1956_vm1 = vcmp.lt.s32.totalorder %v1955_v51, 2 }
 0xa86   :  { %v1930_v50 = vclz %v2440_v5  ;;  %vm2061_vm14 = vcmp.eq.s32.totalorder %v2059_v10, 0  ;;  %vm2064_vm15 = vcmp.eq.s32.totalorder %v2059_v10, 2  ;;  %vm2060_vm3 = vcmp.lt.s32.totalorder %v2059_v10, 2 }
 0xa88   :  { %v2441_v4 = vadd.s32 4294967294, %v1930_v50 }
 0xa8a   :  { %vm2442_vm7 = vcmp.lt.s32.totalorder %v2441_v4, 0 }
 0xa8b   :  { %v1933_v33 = vsel %vm2442_vm7, 0, %v2441_v4 }
 0xa8c   :  { %v1938_v3 = vsub.s32 4294967266, %v1933_v33  ;;  %v1934_v14 = vsub.s32 32, %v1933_v33  ;;  %v1935_v25 = vshll.u32 %v1926_v60, %v1933_v33 }
 0xa8e   :  { %v1939_v29 = vadd.s32 127, %v1938_v3  ;;  %v1936_v0 = vshrl.u32 %v1918_v46, %v1934_v14 }
 0xa90   :  { %v1940_v27 = vshll.u32 %v1939_v29, 23  ;;  %v1937_v41 = vor.u32 %v1936_v0, %v1935_v25 }
 0xa92   :  { %v1941_v19 = vor.u32 4788187, %v1940_v27  ;;  %v1944_v42 = vcvt.s32.f32 %v1937_v41  ;;  %v1827_v27 = vmul.f32 %v3677_v55, %v3257_v12 }
 0xa94   :  { %v1942_v8 = vand.u32 2147483647, %v1941_v19 }
 0xa96   :  { %v1945_v47 = vmul.f32 %v1944_v42, %v1942_v8 }
 0xa98   :  { %v1946_v7 = vxor.u32 2147483648, %v1945_v47 }
 0xa9a   :  { %v1947_v57 = vsel %vm1864_vm9, %v1946_v7, %v1945_v47 }
 0xa9b   :  { %v1950_v37 = vsel %vm1863_vm11, %v3588_v61, %v1947_v57  ;;  %v1820_v61 = vmul.f32 %v3634_v36, %v3255_v34  ;;  %v1821_v34 = vmul.f32 %v3665_v63, %v3257_v12 }
 0xa9c   :  { %2566 = vcosq.f32 %v1950_v37 }
 0xa9d   :  { %2568 = vsinq.f32 %v1950_v37 }
 0xaa6   :  { %v2567_v2 = vpop.eup %2566 }
 0xaa7   :  { %v2569_v49 = vpop.eup %2568  ;;  %v1961_v1 = vxor.u32 2147483648, %v2567_v2 }
 0xaa8   :  { %v1958_v53 = vxor.u32 2147483648, %v2569_v49 }
 0xaa9   :  { %v1962_v9 = vsel %vm1960_vm12, %v1961_v1, %v2569_v49  ;;  %v2066_v62 = vsel %vm2064_vm15, %v1961_v1, %v2569_v49 }
 0xaaa   :  { %v1959_v6 = vsel %vm1957_vm13, %v2567_v2, %v1958_v53  ;;  %v2063_v28 = vsel %vm2061_vm14, %v2567_v2, %v1958_v53 }
 0xaab   :  { %v1963_v20 = vsel %vm1956_vm1, %v1959_v6, %v1962_v9  ;;  %v2067_v59 = vsel %vm2060_vm3, %v2063_v28, %v2066_v62 }
 0xaac   :  { %v1964_v31 = vsel %vm1954_vm5, nan, %v1963_v20  ;;  %v2068_v21 = vsel %vm1954_vm5, nan, %v2067_v59 }
 0xaad   :  { %v2072_v17 = vrot.slane %v1964_v31, %v2779_v45  ;;  %v2078_v5 = vrot.slane %v2068_v21, %v2779_v45 }
 0xae4   :  { %v1813_v16 = vpop.permute.xlu0 %1812 }
 0xae5   :  { %v1828_v60 = vmul.f32 %v1813_v16, %v3261_v35 }
 0xae7   :  { %v1830_v50 = vsub.f32 %v1826_v13, %v1828_v60 }
 0xae8   :  { %v1817_v4 = vpop.permute.xlu0 %1816 }
 0xae9   :  { %v2079_v33 = vmul.f32 %v2078_v5, %v1830_v50  ;;  %v2083_v3 = vmul.f32 %v2072_v17, %v1830_v50  ;;  %v1822_v46 = vmul.f32 %v1817_v4, %v3261_v35 }
 0xaeb   :  { %v1824_v14 = vadd.f32 %v1822_v46, %v1820_v61 }
 0xaec   :  { %v1815_v29 = vpop.permute.xlu1 %1814  ;;  %v2115_v25 = vpop.permute.xlu0 %2114 }
 0xaed   :  { %v2073_v0 = vmul.f32 %v2072_v17, %v1824_v14  ;;  %v2085_v38 = vmul.f32 %v2078_v5, %v1824_v14  ;;  %v1829_v41 = vmul.f32 %v1815_v29, %v3259_v15  ;;  %2481 = vpush %v2115_v25  ;;  %v2572_v14 = vld [vmem:[%s3866_s5 + $0x1] sm:$0x1] }
 0xaef   :  { %v2081_v19 = vadd.f32 %v2079_v33, %v2073_v0  ;;  %v2087_v8 = vsub.f32 %v2083_v3, %v2085_v38  ;;  %v1831_v42 = vsub.f32 %v1827_v27, %v1829_v41 }
 0xaf0   :  { %v1819_v47 = vpop.permute.xlu1 %1818 }
 0xaf1   :  { %v2080_v7 = vmul.f32 %v2078_v5, %v1831_v42  ;;  %v2084_v57 = vmul.f32 %v2072_v17, %v1831_v42  ;;  %v1823_v35 = vmul.f32 %v1819_v47, %v3259_v15  ;;  %2094 = vrot.lane.b32.xlu0 %v2081_v19, %s2586_s0  ;;  %v2571_v15 = vld [vmem:[%s3866_s5] sm:$0x1] }
 0xaf3   :  { %v1825_v36 = vadd.f32 %v1823_v35, %v1821_v34 }
 0xaf5   :  { %v2074_v30 = vmul.f32 %v2072_v17, %v1825_v36  ;;  %v2086_v37 = vmul.f32 %v2078_v5, %v1825_v36  ;;  %2098 = vrot.lane.b32.xlu0 %v2081_v19, %s2588_s1 }
 0xaf7   :  { %v2082_v55 = vadd.f32 %v2080_v7, %v2074_v30  ;;  %v2088_v23 = vsub.f32 %v2084_v57, %v2086_v37 }
 0xaf9   :  { %2096 = vrot.lane.b32.xlu1 %v2082_v55, %s2586_s0  ;;  %2104 = vrot.lane.b32.xlu0 %v2087_v8, %s2586_s0 }
 0xafd   :  { %2100 = vrot.lane.b32.xlu1 %v2082_v55, %s2588_s1  ;;  %2108 = vrot.lane.b32.xlu0 %v2087_v8, %s2588_s1 }
 0xb01   :  { %2106 = vrot.lane.b32.xlu1 %v2088_v23, %s2586_s0  ;;  %2158 = vrot.lane.b32.xlu0 %v1397_v39, %s2588_s1  ;;  %v3714_v12 = vpop.permute.xlu1 %2090 }
 0xb02   :  { %v2093_v63 = vmul.f32 %v2571_v15, %v3714_v12  ;;  %v2135_v46 = vrot.slane %v3714_v12, 1 }
 0xb04   :  { %v2124_v58 = vrot.slane %v2093_v63, %v2779_v45  ;;  %v2137_v29 = vmul.f32 %v2572_v14, %v2135_v46 }
 0xb05   :  { %2110 = vrot.lane.b32.xlu1 %v2088_v23, %s2588_s1 }
 0xb06   :  { %v2168_v0 = vrot.slane %v2137_v29, %v2779_v45 }
 0xb1e   :  { %s2482_s19 = spop %2481 }
 0xb1f   :  { %v2117_v2 = vstv %s2482_s19 }
 0xb20   :  { %v2119_v39 = vmul.f32 %v2117_v2, %v2081_v19  ;;  %v2120_v59 = vmul.f32 %v2117_v2, %v2082_v55  ;;  %v2129_v31 = vmul.f32 %v2117_v2, %v2087_v8  ;;  %v2130_v33 = vmul.f32 %v2117_v2, %v2088_v23 }
 0xb63   :  { %v2095_v48 = vpop.permute.xlu0 %2094 }
 0xb67   :  { %v2099_v49 = vpop.permute.xlu0 %2098 }
 0xb68   :  { %v2102_v51 = vsel %vm2783_vm2, %v2095_v48, %v2099_v49 }
 0xb69   :  { %v2125_v10 = vmul.f32 %v2124_v58, %v2102_v51 }
 0xb6b   :  { %v2127_v53 = vadd.f32 %v2125_v10, %v2119_v39  ;;  %v2097_v1 = vpop.permute.xlu1 %2096  ;;  %v2105_v6 = vpop.permute.xlu0 %2104  ;;  %v2179_v39 = vrot.slane %v3714_v12, 2  ;;  %v2573_v10 = vld [vmem:[%s3866_s5 + $0x2] sm:$0x1] }
 0xb6d   :  { %2138 = vrot.lane.b32.xlu1 %v2127_v53, %s2589_s25 }
 0xb6f   :  { %v2101_v9 = vpop.permute.xlu1 %2100  ;;  %v2109_v28 = vpop.permute.xlu0 %2108 }
 0xb70   :  { %v2103_v62 = vsel %vm2783_vm2, %v2097_v1, %v2101_v9  ;;  %v2112_v20 = vsel %vm2783_vm2, %v2105_v6, %v2109_v28 }
 0xb71   :  { %v2126_v21 = vmul.f32 %v2124_v58, %v2103_v62  ;;  %v2131_v16 = vmul.f32 %v2124_v58, %v2112_v20  ;;  %2142 = vrot.lane.b32.xlu1 %v2127_v53, %s2591_s26 }
 0xb73   :  { %v2128_v13 = vadd.f32 %v2126_v21, %v2120_v59  ;;  %v2133_v60 = vadd.f32 %v2131_v16, %v2129_v31  ;;  %v2107_v17 = vpop.permute.xlu1 %2106  ;;  %v2159_v5 = vpop.permute.xlu0 %2158 }
 0xb74   :  { %2483 = vpush %v2159_v5 }
 0xb75   :  { %2140 = vrot.lane.b32.xlu0 %v2128_v13, %s2589_s25  ;;  %2148 = vrot.lane.b32.xlu1 %v2133_v60, %s2589_s25 }
 0xb77   :  { %v2111_v50 = vpop.permute.xlu1 %2110 }
 0xb78   :  { %v2113_v4 = vsel %vm2783_vm2, %v2107_v17, %v2111_v50  ;;  %vm2400_vm2 = vcmask 7168  }
 0xb79   :  { %v2132_v3 = vmul.f32 %v2124_v58, %v2113_v4  ;;  %2144 = vrot.lane.b32.xlu0 %v2128_v13, %s2591_s26  ;;  %2152 = vrot.lane.b32.xlu1 %v2133_v60, %s2591_s26 }
 0xb7b   :  { %v2134_v61 = vadd.f32 %v2132_v3, %v2130_v33 }
 0xb7d   :  { %2150 = vrot.lane.b32.xlu0 %v2134_v61, %s2589_s25  ;;  %2202 = vrot.lane.b32.xlu1 %v1440_v24, %s2588_s1 }
 0xb81   :  { %2154 = vrot.lane.b32.xlu0 %v2134_v61, %s2591_s26 }
 0xba5   :  { %s2484_s0 = spop %2483 }
 0xba6   :  { %v2161_v25 = vstv %s2484_s0 }
 0xba7   :  { %v2163_v41 = vmul.f32 %v2161_v25, %v2127_v53  ;;  %v2164_v35 = vmul.f32 %v2161_v25, %v2128_v13  ;;  %v2173_v36 = vmul.f32 %v2161_v25, %v2133_v60  ;;  %v2174_v2 = vmul.f32 %v2161_v25, %v2134_v61 }
 0xba8   :  { %v2181_v53 = vmul.f32 %v2573_v10, %v2179_v39 }
 0xbaa   :  { %v2212_v6 = vrot.slane %v2181_v53, %v2779_v45 }
 0xbdf   :  { %v2139_v52 = vpop.permute.xlu1 %2138 }
 0xbe3   :  { %v2143_v38 = vpop.permute.xlu1 %2142 }
 0xbe4   :  { %v2146_v27 = vsel %vm2824_vm4, %v2139_v52, %v2143_v38  ;;  %v2223_v38 = vrot.slane %v3714_v12, 3 }
 0xbe5   :  { %v2169_v24 = vmul.f32 %v2168_v0, %v2146_v27  ;;  %v2574_v27 = vld [vmem:[%s3866_s5 + $0x3] sm:$0x1] }
 0xbe7   :  { %v2171_v19 = vadd.f32 %v2169_v24, %v2163_v41  ;;  %v2141_v8 = vpop.permute.xlu0 %2140  ;;  %v2149_v42 = vpop.permute.xlu1 %2148  ;;  %v2225_v41 = vmul.f32 %v2574_v27, %v2223_v38  ;;  %v2311_v27 = vrot.slane %v3714_v12, 5 }
 0xbe9   :  { %2182 = vrot.lane.b32.xlu0 %v2171_v19, %s2592_s27 }
 0xbeb   :  { %v2145_v47 = vpop.permute.xlu0 %2144  ;;  %v2153_v7 = vpop.permute.xlu1 %2152 }
 0xbec   :  { %v2147_v57 = vsel %vm2824_vm4, %v2141_v8, %v2145_v47  ;;  %v2156_v34 = vsel %vm2824_vm4, %v2149_v42, %v2153_v7 }
 0xbed   :  { %v2170_v30 = vmul.f32 %v2168_v0, %v2147_v57  ;;  %v2175_v37 = vmul.f32 %v2168_v0, %v2156_v34  ;;  %2186 = vrot.lane.b32.xlu0 %v2171_v19, %s2594_s28 }
 0xbef   :  { %v2172_v55 = vadd.f32 %v2170_v30, %v2164_v35  ;;  %v2177_v23 = vadd.f32 %v2175_v37, %v2173_v36  ;;  %v2151_v15 = vpop.permute.xlu0 %2150  ;;  %v2203_v63 = vpop.permute.xlu1 %2202 }
 0xbf0   :  { %2485 = vpush %v2203_v63 }
 0xbf1   :  { %2184 = vrot.lane.b32.xlu1 %v2172_v55, %s2592_s27  ;;  %2192 = vrot.lane.b32.xlu0 %v2177_v23, %s2592_s27 }
 0xbf3   :  { %v2155_v48 = vpop.permute.xlu0 %2154 }
 0xbf4   :  { %v2157_v58 = vsel %vm2824_vm4, %v2151_v15, %v2155_v48 }
 0xbf5   :  { %v2176_v49 = vmul.f32 %v2168_v0, %v2157_v58  ;;  %2188 = vrot.lane.b32.xlu1 %v2172_v55, %s2594_s28  ;;  %2196 = vrot.lane.b32.xlu0 %v2177_v23, %s2594_s28 }
 0xbf7   :  { %v2178_v51 = vadd.f32 %v2176_v49, %v2174_v2 }
 0xbf9   :  { %2194 = vrot.lane.b32.xlu1 %v2178_v51, %s2592_s27  ;;  %2246 = vrot.lane.b32.xlu0 %v1483_v40, %s2588_s1 }
 0xbfd   :  { %2198 = vrot.lane.b32.xlu1 %v2178_v51, %s2594_s28 }
 0xc21   :  { %s2486_s25 = spop %2485 }
 0xc22   :  { %v2205_v1 = vstv %s2486_s25 }
 0xc23   :  { %v2207_v62 = vmul.f32 %v2205_v1, %v2171_v19  ;;  %v2208_v17 = vmul.f32 %v2205_v1, %v2172_v55  ;;  %v2217_v5 = vmul.f32 %v2205_v1, %v2177_v23  ;;  %v2218_v29 = vmul.f32 %v2205_v1, %v2178_v51 }
 0xc24   :  { %v2256_v19 = vrot.slane %v2225_v41, %v2779_v45  ;;  %v2267_v1 = vrot.slane %v3714_v12, 4  ;;  %v2576_v41 = vld [vmem:[%s3866_s5 + $0x5] sm:$0x1] }
 0xc5b   :  { %v2183_v32 = vpop.permute.xlu0 %2182 }
 0xc5f   :  { %v2187_v9 = vpop.permute.xlu0 %2186 }
 0xc60   :  { %v2190_v28 = vsel %vm2869_vm6, %v2183_v32, %v2187_v9 }
 0xc61   :  { %v2213_v40 = vmul.f32 %v2212_v6, %v2190_v28 }
 0xc63   :  { %v2215_v20 = vadd.f32 %v2213_v40, %v2207_v62  ;;  %v2185_v59 = vpop.permute.xlu1 %2184  ;;  %v2193_v31 = vpop.permute.xlu0 %2192 }
 0xc65   :  { %2226 = vrot.lane.b32.xlu1 %v2215_v20, %s2595_s29 }
 0xc67   :  { %v2189_v21 = vpop.permute.xlu1 %2188  ;;  %v2197_v16 = vpop.permute.xlu0 %2196 }
 0xc68   :  { %v2191_v13 = vsel %vm2869_vm6, %v2185_v59, %v2189_v21  ;;  %v2200_v60 = vsel %vm2869_vm6, %v2193_v31, %v2197_v16 }
 0xc69   :  { %v2214_v50 = vmul.f32 %v2212_v6, %v2191_v13  ;;  %v2219_v4 = vmul.f32 %v2212_v6, %v2200_v60  ;;  %2230 = vrot.lane.b32.xlu1 %v2215_v20, %s2597_s30 }
 0xc6b   :  { %v2216_v33 = vadd.f32 %v2214_v50, %v2208_v17  ;;  %v2221_v3 = vadd.f32 %v2219_v4, %v2217_v5  ;;  %v2195_v61 = vpop.permute.xlu1 %2194  ;;  %v2247_v46 = vpop.permute.xlu0 %2246 }
 0xc6c   :  { %2487 = vpush %v2247_v46 }
 0xc6d   :  { %2228 = vrot.lane.b32.xlu0 %v2216_v33, %s2595_s29  ;;  %2236 = vrot.lane.b32.xlu1 %v2221_v3, %s2595_s29 }
 0xc6f   :  { %v2199_v52 = vpop.permute.xlu1 %2198 }
 0xc70   :  { %v2201_v14 = vsel %vm2869_vm6, %v2195_v61, %v2199_v52 }
 0xc71   :  { %v2220_v25 = vmul.f32 %v2212_v6, %v2201_v14  ;;  %2232 = vrot.lane.b32.xlu0 %v2216_v33, %s2597_s30  ;;  %2240 = vrot.lane.b32.xlu1 %v2221_v3, %s2597_s30  ;;  %v2575_v6 = vld [vmem:[%s3866_s5 + $0x4] sm:$0x1] }
 0xc72   :  { %v2269_v9 = vmul.f32 %v2575_v6, %v2267_v1  ;;  %v2577_v1 = vld [vmem:[%s3866_s5 + $0x6] sm:$0x1] }
 0xc73   :  { %v2222_v0 = vadd.f32 %v2220_v25, %v2218_v29 }
 0xc74   :  { %v2300_v62 = vrot.slane %v2269_v9, %v2779_v45 }
 0xc75   :  { %2238 = vrot.lane.b32.xlu0 %v2222_v0, %s2595_s29  ;;  %2290 = vrot.lane.b32.xlu1 %v1526_v18, %s2588_s1 }
 0xc79   :  { %2242 = vrot.lane.b32.xlu0 %v2222_v0, %s2597_s30 }
 0xc9d   :  { %s2488_s27 = spop %2487 }
 0xc9e   :  { %v2249_v24 = vstv %s2488_s27 }
 0xc9f   :  { %v2251_v47 = vmul.f32 %v2249_v24, %v2215_v20  ;;  %v2252_v55 = vmul.f32 %v2249_v24, %v2216_v33  ;;  %v2261_v23 = vmul.f32 %v2249_v24, %v2221_v3  ;;  %v2262_v32 = vmul.f32 %v2249_v24, %v2222_v0 }
 0xca0   :  { %v2313_v24 = vmul.f32 %v2576_v41, %v2311_v27 }
 0xcd7   :  { %v2227_v22 = vpop.permute.xlu1 %2226 }
 0xcdb   :  { %v2231_v8 = vpop.permute.xlu1 %2230 }
 0xcdc   :  { %v2234_v42 = vsel %vm2915_vm8, %v2227_v22, %v2231_v8  ;;  %v2344_v8 = vrot.slane %v2313_v24, %v2779_v45 }
 0xcdd   :  { %v2257_v18 = vmul.f32 %v2256_v19, %v2234_v42 }
 0xcdf   :  { %v2259_v7 = vadd.f32 %v2257_v18, %v2251_v47  ;;  %v2229_v57 = vpop.permute.xlu0 %2228  ;;  %v2237_v34 = vpop.permute.xlu1 %2236 }
 0xce1   :  { %2270 = vrot.lane.b32.xlu0 %v2259_v7, %s2598_s7 }
 0xce3   :  { %v2233_v35 = vpop.permute.xlu0 %2232  ;;  %v2241_v36 = vpop.permute.xlu1 %2240 }
 0xce4   :  { %v2235_v30 = vsel %vm2915_vm8, %v2229_v57, %v2233_v35  ;;  %v2244_v37 = vsel %vm2915_vm8, %v2237_v34, %v2241_v36 }
 0xce5   :  { %v2258_v15 = vmul.f32 %v2256_v19, %v2235_v30  ;;  %v2263_v63 = vmul.f32 %v2256_v19, %v2244_v37  ;;  %2274 = vrot.lane.b32.xlu0 %v2259_v7, %s2600_s8 }
 0xce7   :  { %v2260_v48 = vadd.f32 %v2258_v15, %v2252_v55  ;;  %v2265_v58 = vadd.f32 %v2263_v63, %v2261_v23  ;;  %v2239_v2 = vpop.permute.xlu0 %2238  ;;  %v2291_v49 = vpop.permute.xlu1 %2290 }
 0xce8   :  { %2489 = vpush %v2291_v49 }
 0xce9   :  { %2272 = vrot.lane.b32.xlu1 %v2260_v48, %s2598_s7  ;;  %2280 = vrot.lane.b32.xlu0 %v2265_v58, %s2598_s7 }
 0xceb   :  { %v2243_v51 = vpop.permute.xlu0 %2242 }
 0xcec   :  { %v2245_v39 = vsel %vm2915_vm8, %v2239_v2, %v2243_v51 }
 0xced   :  { %v2264_v10 = vmul.f32 %v2256_v19, %v2245_v39  ;;  %2276 = vrot.lane.b32.xlu1 %v2260_v48, %s2600_s8  ;;  %2284 = vrot.lane.b32.xlu0 %v2265_v58, %s2600_s8 }
 0xcef   :  { %v2266_v53 = vadd.f32 %v2264_v10, %v2262_v32 }
 0xcf1   :  { %2282 = vrot.lane.b32.xlu1 %v2266_v53, %s2598_s7  ;;  %2334 = vrot.lane.b32.xlu0 %v1569_v56, %s2588_s1 }
 0xcf5   :  { %2286 = vrot.lane.b32.xlu1 %v2266_v53, %s2600_s8 }
 0xd19   :  { %s2490_s29 = spop %2489 }
 0xd1a   :  { %v2293_v28 = vstv %s2490_s29 }
 0xd1b   :  { %v2295_v59 = vmul.f32 %v2293_v28, %v2259_v7  ;;  %v2296_v50 = vmul.f32 %v2293_v28, %v2260_v48  ;;  %v2305_v4 = vmul.f32 %v2293_v28, %v2265_v58  ;;  %v2306_v0 = vmul.f32 %v2293_v28, %v2266_v53 }
 0xd1c   :  { %v2355_v53 = vrot.slane %v3714_v12, 6 }
 0xd53   :  { %v2271_v26 = vpop.permute.xlu0 %2270 }
 0xd57   :  { %v2275_v40 = vpop.permute.xlu0 %2274 }
 0xd58   :  { %v2278_v20 = vsel %vm2966_vm10, %v2271_v26, %v2275_v40  ;;  %v2357_v26 = vmul.f32 %v2577_v1, %v2355_v53 }
 0xd59   :  { %v2301_v56 = vmul.f32 %v2300_v62, %v2278_v20 }
 0xd5a   :  { %v2376_v28 = vrot.slane %v2357_v26, %v2779_v45 }
 0xd5b   :  { %v2303_v31 = vadd.f32 %v2301_v56, %v2295_v59  ;;  %v2273_v21 = vpop.permute.xlu1 %2272  ;;  %v2281_v16 = vpop.permute.xlu0 %2280 }
 0xd5d   :  { %2314 = vrot.lane.b32.xlu1 %v2303_v31, %s2602_s2 }
 0xd5f   :  { %v2277_v13 = vpop.permute.xlu1 %2276  ;;  %v2285_v60 = vpop.permute.xlu0 %2284 }
 0xd60   :  { %v2279_v17 = vsel %vm2966_vm10, %v2273_v21, %v2277_v13  ;;  %v2288_v5 = vsel %vm2966_vm10, %v2281_v16, %v2285_v60 }
 0xd61   :  { %v2302_v33 = vmul.f32 %v2300_v62, %v2279_v17  ;;  %v2307_v3 = vmul.f32 %v2300_v62, %v2288_v5  ;;  %2318 = vrot.lane.b32.xlu1 %v2303_v31, %s2603_s3 }
 0xd63   :  { %v2304_v61 = vadd.f32 %v2302_v33, %v2296_v50  ;;  %v2309_v46 = vadd.f32 %v2307_v3, %v2305_v4  ;;  %v2283_v52 = vpop.permute.xlu1 %2282  ;;  %v2335_v14 = vpop.permute.xlu0 %2334 }
 0xd64   :  { %2491 = vpush %v2335_v14 }
 0xd65   :  { %2316 = vrot.lane.b32.xlu0 %v2304_v61, %s2602_s2  ;;  %2324 = vrot.lane.b32.xlu1 %v2309_v46, %s2602_s2 }
 0xd67   :  { %v2287_v29 = vpop.permute.xlu1 %2286 }
 0xd68   :  { %v2289_v25 = vsel %vm2966_vm10, %v2283_v52, %v2287_v29 }
 0xd69   :  { %v2308_v38 = vmul.f32 %v2300_v62, %v2289_v25  ;;  %2320 = vrot.lane.b32.xlu0 %v2304_v61, %s2603_s3  ;;  %2328 = vrot.lane.b32.xlu1 %v2309_v46, %s2603_s3 }
 0xd6b   :  { %v2310_v22 = vadd.f32 %v2308_v38, %v2306_v0 }
 0xd6d   :  { %2326 = vrot.lane.b32.xlu0 %v2310_v22, %s2602_s2  ;;  %2366 = vrot.lane.b32.xlu1 %v1600_v54, %s2588_s1 }
 0xd71   :  { %2330 = vrot.lane.b32.xlu0 %v2310_v22, %s2603_s3 }
 0xd95   :  { %s2492_s7 = spop %2491 }
 0xd96   :  { %v2337_v19 = vstv %s2492_s7 }
 0xd97   :  { %v2339_v43 = vmul.f32 %v2337_v19, %v2303_v31  ;;  %v2340_v37 = vmul.f32 %v2337_v19, %v2304_v61  ;;  %v2349_v55 = vmul.f32 %v2337_v19, %v2309_v46  ;;  %v2350_v39 = vmul.f32 %v2337_v19, %v2310_v22 }
 0xdcf   :  { %v2315_v44 = vpop.permute.xlu1 %2314 }
 0xdd3   :  { %v2319_v42 = vpop.permute.xlu1 %2318 }
 0xdd4   :  { %v2322_v47 = vsel %vm3157_vm0, %v2315_v44, %v2319_v42 }
 0xdd5   :  { %v2345_v54 = vmul.f32 %v2344_v8, %v2322_v47 }
 0xdd7   :  { %v2347_v18 = vadd.f32 %v2345_v54, %v2339_v43  ;;  %v2317_v7 = vpop.permute.xlu0 %2316  ;;  %v2325_v57 = vpop.permute.xlu1 %2324 }
 0xdd9   :  { %2358 = vrot.lane.b32.xlu0 %v2347_v18, %s2604_s9 }
 0xddb   :  { %v2321_v34 = vpop.permute.xlu0 %2320  ;;  %v2329_v35 = vpop.permute.xlu1 %2328 }
 0xddc   :  { %v2323_v36 = vsel %vm3157_vm0, %v2317_v7, %v2321_v34  ;;  %v2332_v30 = vsel %vm3157_vm0, %v2325_v57, %v2329_v35 }
 0xddd   :  { %v2346_v23 = vmul.f32 %v2344_v8, %v2323_v36  ;;  %v2351_v15 = vmul.f32 %v2344_v8, %v2332_v30 }
 0xddf   :  { %v2348_v63 = vadd.f32 %v2346_v23, %v2340_v37  ;;  %v2353_v48 = vadd.f32 %v2351_v15, %v2349_v55  ;;  %v2327_v58 = vpop.permute.xlu0 %2326  ;;  %v2367_v2 = vpop.permute.xlu1 %2366 }
 0xde0   :  { %2493 = vpush %v2367_v2 }
 0xde1   :  { %2360 = vrot.lane.b32.xlu1 %v2348_v63, %s2604_s9  ;;  %2362 = vrot.lane.b32.xlu0 %v2353_v48, %s2604_s9 }
 0xde3   :  { %v2331_v49 = vpop.permute.xlu0 %2330 }
 0xde4   :  { %v2333_v51 = vsel %vm3157_vm0, %v2327_v58, %v2331_v49 }
 0xde5   :  { %v2352_v32 = vmul.f32 %v2344_v8, %v2333_v51 }
 0xde7   :  { %v2354_v10 = vadd.f32 %v2352_v32, %v2350_v39 }
 0xde9   :  { %2364 = vrot.lane.b32.xlu1 %v2354_v10, %s2604_s9 }
 0xe11   :  { %s2494_s3 = spop %2493 }
 0xe12   :  { %v2369_v9 = vstv %s2494_s3 }
 0xe13   :  { %v2371_v11 = vmul.f32 %v2369_v9, %v2347_v18  ;;  %v2372_v59 = vmul.f32 %v2369_v9, %v2348_v63  ;;  %v2381_v56 = vmul.f32 %v2369_v9, %v2353_v48  ;;  %v2382_v50 = vmul.f32 %v2369_v9, %v2354_v10 }
 0xe4b   :  { %v2359_v6 = vpop.permute.xlu0 %2358 }
 0xe4c   :  { %v2377_v62 = vmul.f32 %v2376_v28, %v2359_v6 }
 0xe4e   :  { %v2379_v16 = vadd.f32 %v2377_v62, %v2371_v11 }
 0xe53   :  { %v2361_v40 = vpop.permute.xlu1 %2360  ;;  %v2363_v20 = vpop.permute.xlu0 %2362 }
 0xe54   :  { %v2378_v31 = vmul.f32 %v2376_v28, %v2361_v40  ;;  %v2383_v21 = vmul.f32 %v2376_v28, %v2363_v20 }
 0xe56   :  { %v2380_v12 = vadd.f32 %v2378_v31, %v2372_v59  ;;  %v2385_v13 = vadd.f32 %v2383_v21, %v2381_v56 }
 0xe58   :  { %v2387_v60 = vmul.f32 %v2380_v12, %v2379_v16  ;;  %v2392_v17 = vmul.f32 %v2385_v13, %v2380_v12 }
 0xe5b   :  { %v2365_v5 = vpop.permute.xlu1 %2364 }
 0xe5c   :  { %v2384_v4 = vmul.f32 %v2376_v28, %v2365_v5 }
 0xe5e   :  { %v2386_v33 = vadd.f32 %v2384_v4, %v2382_v50 }
 0xe60   :  { %v2388_v3 = vmul.f32 %v2386_v33, %v2385_v13  ;;  %v2393_v61 = vmul.f32 %v2386_v33, %v2379_v16 }
 0xe62   :  { %v2394_v45 = vsub.f32 %v2392_v17, %v2393_v61  ;;  %v2389_v46 = vadd.f32 %v2388_v3, %v2387_v60 }
 0xe64   :  { %2395 = vadd.xlane.f32.xlu1 %v2394_v45  ;;  %2390 = vadd.xlane.f32.xlu0 %v2389_v46 }
 0xef1   :  { %v2396_v52 = vpop.xlane.xlu1 %2395  ;;  %v2391_v14 = vpop.xlane.xlu0 %2390 }
 0xef2   :  { %v2398_v29 = vmul.f32 %v2396_v52, %v2396_v52  ;;  %v2397_v25 = vmul.f32 %v2391_v14, %v2391_v14 }
 0xef4   :  { %v2399_v0 = vadd.f32 %v2398_v29, %v2397_v25 }
 0xef6   :  { %2401 = vst.msk [vmem:[%s3867_s6] sm:$0xff] %vm2400_vm2, %v2399_v0 }

</bundles_post_ra>
